<compile_context>
chip_gen: v7x
topology: tpu7x:2x2x1
jax: 0.10.0
libtpu: 0.0.40
codegen_flags: <defaults>
</compile_context>

<pallas_src>
import functools

import jax
import jax.numpy as jnp
from jax.experimental import pallas as pl
from jax.experimental.pallas import tpu as pltpu


# ----------------------------------------------------------------------------
# Pointwise LSTM cell.  Gate column order is [i, f, o, g] (permuted from
# PyTorch's [i, f, g, o] at param-prep time): sigmoid over the contiguous
# [0:3H] block, tanh only over [3H:4H].
# ----------------------------------------------------------------------------
def _lstm_cell(gates, c_prev, H):
    sig = jax.nn.sigmoid(gates[:, 0:3 * H])
    g_g = jnp.tanh(gates[:, 3 * H:4 * H])
    i_g = sig[:, 0:H]
    f_g = sig[:, H:2 * H]
    o_g = sig[:, 2 * H:3 * H]
    c_new = f_g * c_prev + i_g * g_g
    h_new = o_g * jnp.tanh(c_new)
    return h_new, c_new


# ----------------------------------------------------------------------------
# Fully fused kernel: all biLSTM layers + max-pool over time + Linear(2H -> 1).
#   refs = [x, (w_ih_cat, w_hh_blk, b_cat) * L, fc_w_f, fc_w_b, fc_b,   # inputs
#           out,                                                        # output
#           y_scratch (only if L > 1)]                                  # scratch
#   x:        (T*B, E)      bf16
#   w_ih_cat: (in_dim, 8H)  bf16   cols [0:4H] fwd gates, [4H:8H] bwd gates
#   w_hh_blk: (2H, 8H)      bf16   block-diagonal (fwd | bwd)
#   b_cat:    (1, 8H)       f32    (b_ih + b_hh, both directions)
#   y_scratch:(T*B, 2H)     bf16   inter-layer activation, cols [:H] fwd [H:] bwd
#   out:      (B, 1)        f32
# ----------------------------------------------------------------------------
def _birnn_fused_kernel(*refs, T, B, H, num_layers):
    x_ref = refs[0]
    layer_refs = refs[1:1 + 3 * num_layers]
    fcw_f_ref = refs[1 + 3 * num_layers]
    fcw_b_ref = refs[2 + 3 * num_layers]
    fcb_ref = refs[3 + 3 * num_layers]
    out_ref = refs[4 + 3 * num_layers]
    y_ref = refs[5 + 3 * num_layers] if num_layers > 1 else None

    H4, H8 = 4 * H, 8 * H

    x_val = x_ref[...]                                   # (T*B, E) bf16
    pooled_f = pooled_b = None
    for l in range(num_layers):
        wih_ref, whh_ref, b_ref = layer_refs[3 * l:3 * l + 3]
        last = (l == num_layers - 1)
        if l > 0:
            # Read the previous layer's output fully before overwriting it.
            x_val = y_ref[...]                           # (T*B, 2H) bf16

        # Hoisted input projection for BOTH directions: one MXU matmul/layer.
        gx = jnp.dot(x_val, wih_ref[...],
                     preferred_element_type=jnp.float32) + b_ref[...]
        whh = whh_ref[...]                               # (2H, 8H) bf16

        h_cat = jnp.zeros((B, 2 * H), jnp.bfloat16)      # [h_f | h_b]
        c_f = jnp.zeros((B, H), jnp.float32)
        c_b = jnp.zeros((B, H), jnp.float32)
        if last:
            pooled_f = jnp.full((B, H), -jnp.inf, jnp.float32)
            pooled_b = jnp.full((B, H), -jnp.inf, jnp.float32)

        # Fully unrolled in-kernel recurrence (toy T); only the block-diagonal
        # h @ W_hh (one MXU push for both directions) stays in the loop.
        for t in range(T):
            tr = T - 1 - t
            if t == 0:
                g_f = gx[0:B, 0:H4]
                g_b = gx[tr * B:(tr + 1) * B, H4:H8]
            else:
                g_rec = jnp.dot(h_cat, whh, preferred_element_type=jnp.float32)
                g_f = g_rec[:, 0:H4] + gx[t * B:(t + 1) * B, 0:H4]
                g_b = g_rec[:, H4:H8] + gx[tr * B:(tr + 1) * B, H4:H8]
            h_f, c_f = _lstm_cell(g_f, c_f, H)
            h_b, c_b = _lstm_cell(g_b, c_b, H)
            h_cat = jnp.concatenate([h_f, h_b], axis=1).astype(jnp.bfloat16)
            if last:
                # Max-pool is order independent: accumulate in the epilogue of
                # the recurrence; the (T,B,2H) activation never leaves VMEM.
                pooled_f = jnp.maximum(pooled_f, h_f)
                pooled_b = jnp.maximum(pooled_b, h_b)
            else:
                # Write straight into the concatenated bf16 layer output.
                y_ref[t * B:(t + 1) * B, 0:H] = h_f.astype(jnp.bfloat16)
                y_ref[tr * B:(tr + 1) * B, H:2 * H] = h_b.astype(jnp.bfloat16)

    # Linear(2H -> 1): VPU multiply + lane reduction (no 1-column MXU matmul).
    logits = (jnp.sum(pooled_f * fcw_f_ref[...], axis=-1, keepdims=True)
              + jnp.sum(pooled_b * fcw_b_ref[...], axis=-1, keepdims=True)
              + fcb_ref[...])
    out_ref[...] = logits.astype(out_ref.dtype)


# ----------------------------------------------------------------------------
# Host-side wrapper (gridless pallas_call: everything resident in VMEM).
# ----------------------------------------------------------------------------
def _vmem_limit_bytes():
    # Generation-aware budget: ~75% of physical VMEM, capped at 100 MiB.
    # (v7x: 64 MiB -> ~48 MiB; v5e/v6e: 128 MiB -> ~96 MiB.)
    cap = 64 * 1024 * 1024
    try:
        info = pltpu.get_tpu_info()
        cap = int(getattr(info, "vmem_capacity_bytes", cap))
    except Exception:
        pass
    return max(32 * 1024 * 1024, min(cap * 3 // 4, 100 * 1024 * 1024))


def birnn_classifier_forward(x_ids, params):
    B, T = x_ids.shape
    # Embedding lookup (gather) kept in plain JAX glue.
    emb = jnp.take(params["embedding"], x_ids, axis=0)          # (B, T, E)
    x = jnp.transpose(emb, (1, 0, 2))                           # (T, B, E)

    # Pad batch to a multiple of 16 (bf16 sublane tile); padded rows are
    # independent and sliced off at the end.
    B_pad = max(16, ((B + 15) // 16) * 16)
    if B_pad != B:
        x = jnp.pad(x, ((0, 0), (0, B_pad - B), (0, 0)))
    x = x.reshape(T * B_pad, x.shape[-1]).astype(jnp.bfloat16)  # (T*B_pad, E)

    layers = params["lstm"]
    num_layers = len(layers)
    H = layers[0]["whh_blk"].shape[0] // 2

    kern = functools.partial(_birnn_fused_kernel, T=T, B=B_pad, H=H,
                             num_layers=num_layers)
    args = [x]
    for lp in layers:
        args += [lp["wih_cat"], lp["whh_blk"], lp["b_cat"]]
    args += [params["fc_w_fwd"], params["fc_w_bwd"], params["fc_b"]]

    scratch = ([pltpu.VMEM((T * B_pad, 2 * H), jnp.bfloat16)]
               if num_layers > 1 else [])

    logits = pl.pallas_call(
        kern,
        out_shape=jax.ShapeDtypeStruct((B_pad, 1), jnp.float32),
        scratch_shapes=scratch,
        compiler_params=pltpu.CompilerParams(
            vmem_limit_bytes=_vmem_limit_bytes()),
    )(*args)
    return logits[:B, 0]                                        # (B,)


# ----------------------------------------------------------------------------
# Deterministic parameter construction (mirrors nn.Module __init__ shapes),
# plus the kernel-side packing: gate reorder [i,f,g,o] -> [i,f,o,g], merged
# (in_dim, 8H) input projection, block-diagonal (2H, 8H) recurrent matrix.
# ----------------------------------------------------------------------------
def init_params(key, vocab_size, embed_dim, hidden_dim, num_layers):
    H = hidden_dim
    keys = jax.random.split(key, 3 + 8 * num_layers)
    kit = iter(keys)

    def nrm(k, shape, scale=0.1):
        return (scale * jax.random.normal(k, shape)).astype(jnp.float32)

    # PyTorch gate order [i, f, g, o] -> kernel order [i, f, o, g].
    perm = jnp.concatenate([jnp.arange(0, H), jnp.arange(H, 2 * H),
                            jnp.arange(3 * H, 4 * H), jnp.arange(2 * H, 3 * H)])

    params = {}
    # "pretrained_embeddings" copied into nn.Embedding -> just a dense table.
    params["embedding"] = nrm(next(kit), (vocab_size, embed_dim), scale=1.0)

    lstm_layers = []
    for l in range(num_layers):
        in_dim = embed_dim if l == 0 else 2 * H
        dirs = {}
        for d in ("fwd", "bwd"):
            w_ih = nrm(next(kit), (4 * H, in_dim))      # weight_ih_l{l}(_reverse)
            w_hh = nrm(next(kit), (4 * H, H))           # weight_hh_l{l}(_reverse)
            b_ih = nrm(next(kit), (4 * H,))
            b_hh = nrm(next(kit), (4 * H,))
            dirs[d] = {
                "w_ih_t": jnp.transpose(w_ih[perm]),    # (in_dim, 4H) [i,f,o,g]
                "w_hh_t": jnp.transpose(w_hh[perm]),    # (H, 4H)
                "b": (b_ih + b_hh)[perm],               # (4H,)
            }
        # Merge both directions: cols [0:4H] fwd, [4H:8H] bwd.
        wih_cat = jnp.concatenate(
            [dirs["fwd"]["w_ih_t"], dirs["bwd"]["w_ih_t"]], axis=1)
        whh_blk = jnp.zeros((2 * H, 8 * H), jnp.float32)
        whh_blk = whh_blk.at[:H, :4 * H].set(dirs["fwd"]["w_hh_t"])
        whh_blk = whh_blk.at[H:, 4 * H:].set(dirs["bwd"]["w_hh_t"])
        b_cat = jnp.concatenate(
            [dirs["fwd"]["b"], dirs["bwd"]["b"]]).reshape(1, 8 * H)
        lstm_layers.append({
            # bf16 weights for the MXU (f32 accumulation); bias kept f32.
            "wih_cat": wih_cat.astype(jnp.bfloat16),    # (in_dim, 8H)
            "whh_blk": whh_blk.astype(jnp.bfloat16),    # (2H, 8H) block-diag
            "b_cat": b_cat,                             # (1, 8H) f32
        })
    params["lstm"] = lstm_layers

    fc_w = nrm(next(kit), (1, 2 * H))                   # nn.Linear(2H, 1)
    fc_b = nrm(next(kit), (1,))
    params["fc_w_fwd"] = fc_w[:, :H]                    # (1, H)
    params["fc_w_bwd"] = fc_w[:, H:]                    # (1, H)
    params["fc_b"] = fc_b.reshape(1, 1)
    return params


if __name__ == "__main__":
    VOCAB, EMBED, HIDDEN, NUM_LAYERS = 50, 32, 32, 2
    BATCH, SEQ = 2, 8

    key = jax.random.PRNGKey(0)
    k_param, k_data = jax.random.split(key)
    params = init_params(k_param, VOCAB, EMBED, HIDDEN, NUM_LAYERS)

    x_ids = jax.random.randint(k_data, (BATCH, SEQ), 0, VOCAB, dtype=jnp.int32)

    # Eval semantics: inter-layer dropout is identity.
    logits = jax.jit(birnn_classifier_forward)(x_ids, params)
    logits = jax.block_until_ready(logits)
    assert logits.shape == (BATCH,), logits.shape
    print("KERNEL_OK")
</pallas_src>

<mosaic_0001>
module attributes {stable_mosaic.version = 11 : i64} {
  func.func @_birnn_fused_kernel(%arg0: memref<128x32xbf16, #tpu.memory_space<vmem>>, %arg1: memref<32x256xbf16, #tpu.memory_space<vmem>>, %arg2: memref<64x256xbf16, #tpu.memory_space<vmem>>, %arg3: memref<1x256xf32, #tpu.memory_space<vmem>>, %arg4: memref<64x256xbf16, #tpu.memory_space<vmem>>, %arg5: memref<64x256xbf16, #tpu.memory_space<vmem>>, %arg6: memref<1x256xf32, #tpu.memory_space<vmem>>, %arg7: memref<1x32xf32, #tpu.memory_space<vmem>>, %arg8: memref<1x32xf32, #tpu.memory_space<vmem>>, %arg9: memref<1x1xf32, #tpu.memory_space<vmem>>, %arg10: memref<16x1xf32, #tpu.memory_space<vmem>>, %arg11: memref<128x64xbf16, #tpu.memory_space<vmem>>) attributes {dimension_semantics = [], scalar_prefetch = 0 : i64, scratch_operands = 1 : i64, tpu.core_type = #tpu.core_type<tc>} {
    %c0 = arith.constant 0 : index
    %c0_0 = arith.constant 0 : index
    %0 = vector.load %arg0[%c0, %c0_0] : memref<128x32xbf16, #tpu.memory_space<vmem>>, vector<128x32xbf16>
    %c0_1 = arith.constant 0 : index
    %c0_2 = arith.constant 0 : index
    %1 = vector.load %arg1[%c0_1, %c0_2] : memref<32x256xbf16, #tpu.memory_space<vmem>>, vector<32x256xbf16>
    %cst = arith.constant dense<0.000000e+00> : vector<128x256xf32>
    %2 = tpu.matmul %0, %1, %cst {dimension_numbers = #tpu.dot_dimension_numbers<[1], [0], [0], [1], [0, 0, 1, 1], [], []>} : vector<128x32xbf16>, vector<32x256xbf16>, vector<128x256xf32> -> vector<128x256xf32>
    %c0_3 = arith.constant 0 : index
    %c0_4 = arith.constant 0 : index
    %3 = vector.load %arg3[%c0_3, %c0_4] : memref<1x256xf32, #tpu.memory_space<vmem>>, vector<1x256xf32>
    %4 = vector.broadcast %3 : vector<1x256xf32> to vector<128x256xf32>
    %5 = arith.addf %2, %4 : vector<128x256xf32>
    %c0_5 = arith.constant 0 : index
    %c0_6 = arith.constant 0 : index
    %6 = vector.load %arg2[%c0_5, %c0_6] : memref<64x256xbf16, #tpu.memory_space<vmem>>, vector<64x256xbf16>
    %cst_7 = arith.constant 0.000000e+00 : f32
    %7 = vector.broadcast %cst_7 : f32 to vector<16x32xf32>
    %cst_8 = arith.constant 0.000000e+00 : f32
    %8 = vector.broadcast %cst_8 : f32 to vector<16x32xf32>
    %9 = vector.extract_strided_slice %5 {offsets = [0, 0], sizes = [16, 128], strides = [1, 1]} : vector<128x256xf32> to vector<16x128xf32>
    %10 = vector.extract_strided_slice %5 {offsets = [112, 128], sizes = [16, 128], strides = [1, 1]} : vector<128x256xf32> to vector<16x128xf32>
    %11 = vector.extract_strided_slice %9 {offsets = [0, 0], sizes = [16, 96], strides = [1, 1]} : vector<16x128xf32> to vector<16x96xf32>
    %12 = arith.negf %11 : vector<16x96xf32>
    %13 = math.exp %12 : vector<16x96xf32>
    %cst_9 = arith.constant 1.000000e+00 : f32
    %14 = vector.broadcast %cst_9 : f32 to vector<16x96xf32>
    %15 = arith.addf %14, %13 : vector<16x96xf32>
    %16 = arith.divf %14, %15 : vector<16x96xf32>
    %17 = vector.extract_strided_slice %9 {offsets = [0, 96], sizes = [16, 32], strides = [1, 1]} : vector<16x128xf32> to vector<16x32xf32>
    %18 = math.tanh %17 : vector<16x32xf32>
    %19 = vector.extract_strided_slice %16 {offsets = [0, 0], sizes = [16, 32], strides = [1, 1]} : vector<16x96xf32> to vector<16x32xf32>
    %20 = vector.extract_strided_slice %16 {offsets = [0, 32], sizes = [16, 32], strides = [1, 1]} : vector<16x96xf32> to vector<16x32xf32>
    %21 = vector.extract_strided_slice %16 {offsets = [0, 64], sizes = [16, 32], strides = [1, 1]} : vector<16x96xf32> to vector<16x32xf32>
    %22 = arith.mulf %20, %7 : vector<16x32xf32>
    %23 = arith.mulf %19, %18 : vector<16x32xf32>
    %24 = arith.addf %22, %23 : vector<16x32xf32>
    %25 = math.tanh %24 : vector<16x32xf32>
    %26 = arith.mulf %21, %25 : vector<16x32xf32>
    %27 = vector.extract_strided_slice %10 {offsets = [0, 0], sizes = [16, 96], strides = [1, 1]} : vector<16x128xf32> to vector<16x96xf32>
    %28 = arith.negf %27 : vector<16x96xf32>
    %29 = math.exp %28 : vector<16x96xf32>
    %cst_10 = arith.constant 1.000000e+00 : f32
    %30 = vector.broadcast %cst_10 : f32 to vector<16x96xf32>
    %31 = arith.addf %30, %29 : vector<16x96xf32>
    %32 = arith.divf %30, %31 : vector<16x96xf32>
    %33 = vector.extract_strided_slice %10 {offsets = [0, 96], sizes = [16, 32], strides = [1, 1]} : vector<16x128xf32> to vector<16x32xf32>
    %34 = math.tanh %33 : vector<16x32xf32>
    %35 = vector.extract_strided_slice %32 {offsets = [0, 0], sizes = [16, 32], strides = [1, 1]} : vector<16x96xf32> to vector<16x32xf32>
    %36 = vector.extract_strided_slice %32 {offsets = [0, 32], sizes = [16, 32], strides = [1, 1]} : vector<16x96xf32> to vector<16x32xf32>
    %37 = vector.extract_strided_slice %32 {offsets = [0, 64], sizes = [16, 32], strides = [1, 1]} : vector<16x96xf32> to vector<16x32xf32>
    %38 = arith.mulf %36, %8 : vector<16x32xf32>
    %39 = arith.mulf %35, %34 : vector<16x32xf32>
    %40 = arith.addf %38, %39 : vector<16x32xf32>
    %41 = math.tanh %40 : vector<16x32xf32>
    %42 = arith.mulf %37, %41 : vector<16x32xf32>
    %43 = tpu.concatenate %26, %42 in 1 : vector<16x32xf32>, vector<16x32xf32> -> vector<16x64xf32>
    %44 = arith.truncf %43 : vector<16x64xf32> to vector<16x64xbf16>
    %45 = arith.truncf %26 : vector<16x32xf32> to vector<16x32xbf16>
    %c0_11 = arith.constant 0 : index
    %c0_12 = arith.constant 0 : index
    %46 = vector.load %arg11[%c0_11, %c0_12] : memref<128x64xbf16, #tpu.memory_space<vmem>>, vector<16x32xbf16>
    tpu.vector_store %arg11[%c0_11, %c0_12], %45 {strides = array<i32>} : memref<128x64xbf16, #tpu.memory_space<vmem>>, vector<16x32xbf16>,
    %47 = arith.truncf %42 : vector<16x32xf32> to vector<16x32xbf16>
    %c112 = arith.constant 112 : index
    %c32 = arith.constant 32 : index
    %48 = vector.load %arg11[%c112, %c32] : memref<128x64xbf16, #tpu.memory_space<vmem>>, vector<16x32xbf16>
    tpu.vector_store %arg11[%c112, %c32], %47 {strides = array<i32>} : memref<128x64xbf16, #tpu.memory_space<vmem>>, vector<16x32xbf16>,
    %cst_13 = arith.constant dense<0.000000e+00> : vector<16x256xf32>
    %49 = tpu.matmul %44, %6, %cst_13 {dimension_numbers = #tpu.dot_dimension_numbers<[1], [0], [0], [1], [0, 0, 1, 1], [], []>} : vector<16x64xbf16>, vector<64x256xbf16>, vector<16x256xf32> -> vector<16x256xf32>
    %50 = vector.extract_strided_slice %49 {offsets = [0, 0], sizes = [16, 128], strides = [1, 1]} : vector<16x256xf32> to vector<16x128xf32>
    %51 = vector.extract_strided_slice %5 {offsets = [16, 0], sizes = [16, 128], strides = [1, 1]} : vector<128x256xf32> to vector<16x128xf32>
    %52 = arith.addf %50, %51 : vector<16x128xf32>
    %53 = vector.extract_strided_slice %49 {offsets = [0, 128], sizes = [16, 128], strides = [1, 1]} : vector<16x256xf32> to vector<16x128xf32>
    %54 = vector.extract_strided_slice %5 {offsets = [96, 128], sizes = [16, 128], strides = [1, 1]} : vector<128x256xf32> to vector<16x128xf32>
    %55 = arith.addf %53, %54 : vector<16x128xf32>
    %56 = vector.extract_strided_slice %52 {offsets = [0, 0], sizes = [16, 96], strides = [1, 1]} : vector<16x128xf32> to vector<16x96xf32>
    %57 = arith.negf %56 : vector<16x96xf32>
    %58 = math.exp %57 : vector<16x96xf32>
    %cst_14 = arith.constant 1.000000e+00 : f32
    %59 = vector.broadcast %cst_14 : f32 to vector<16x96xf32>
    %60 = arith.addf %59, %58 : vector<16x96xf32>
    %61 = arith.divf %59, %60 : vector<16x96xf32>
    %62 = vector.extract_strided_slice %52 {offsets = [0, 96], sizes = [16, 32], strides = [1, 1]} : vector<16x128xf32> to vector<16x32xf32>
    %63 = math.tanh %62 : vector<16x32xf32>
    %64 = vector.extract_strided_slice %61 {offsets = [0, 0], sizes = [16, 32], strides = [1, 1]} : vector<16x96xf32> to vector<16x32xf32>
    %65 = vector.extract_strided_slice %61 {offsets = [0, 32], sizes = [16, 32], strides = [1, 1]} : vector<16x96xf32> to vector<16x32xf32>
    %66 = vector.extract_strided_slice %61 {offsets = [0, 64], sizes = [16, 32], strides = [1, 1]} : vector<16x96xf32> to vector<16x32xf32>
    %67 = arith.mulf %65, %24 : vector<16x32xf32>
    %68 = arith.mulf %64, %63 : vector<16x32xf32>
    %69 = arith.addf %67, %68 : vector<16x32xf32>
    %70 = math.tanh %69 : vector<16x32xf32>
    %71 = arith.mulf %66, %70 : vector<16x32xf32>
    %72 = vector.extract_strided_slice %55 {offsets = [0, 0], sizes = [16, 96], strides = [1, 1]} : vector<16x128xf32> to vector<16x96xf32>
    %73 = arith.negf %72 : vector<16x96xf32>
    %74 = math.exp %73 : vector<16x96xf32>
    %cst_15 = arith.constant 1.000000e+00 : f32
    %75 = vector.broadcast %cst_15 : f32 to vector<16x96xf32>
    %76 = arith.addf %75, %74 : vector<16x96xf32>
    %77 = arith.divf %75, %76 : vector<16x96xf32>
    %78 = vector.extract_strided_slice %55 {offsets = [0, 96], sizes = [16, 32], strides = [1, 1]} : vector<16x128xf32> to vector<16x32xf32>
    %79 = math.tanh %78 : vector<16x32xf32>
    %80 = vector.extract_strided_slice %77 {offsets = [0, 0], sizes = [16, 32], strides = [1, 1]} : vector<16x96xf32> to vector<16x32xf32>
    %81 = vector.extract_strided_slice %77 {offsets = [0, 32], sizes = [16, 32], strides = [1, 1]} : vector<16x96xf32> to vector<16x32xf32>
    %82 = vector.extract_strided_slice %77 {offsets = [0, 64], sizes = [16, 32], strides = [1, 1]} : vector<16x96xf32> to vector<16x32xf32>
    %83 = arith.mulf %81, %40 : vector<16x32xf32>
    %84 = arith.mulf %80, %79 : vector<16x32xf32>
    %85 = arith.addf %83, %84 : vector<16x32xf32>
    %86 = math.tanh %85 : vector<16x32xf32>
    %87 = arith.mulf %82, %86 : vector<16x32xf32>
    %88 = tpu.concatenate %71, %87 in 1 : vector<16x32xf32>, vector<16x32xf32> -> vector<16x64xf32>
    %89 = arith.truncf %88 : vector<16x64xf32> to vector<16x64xbf16>
    %90 = arith.truncf %71 : vector<16x32xf32> to vector<16x32xbf16>
    %c16 = arith.constant 16 : index
    %c0_16 = arith.constant 0 : index
    %91 = vector.load %arg11[%c16, %c0_16] : memref<128x64xbf16, #tpu.memory_space<vmem>>, vector<16x32xbf16>
    tpu.vector_store %arg11[%c16, %c0_16], %90 {strides = array<i32>} : memref<128x64xbf16, #tpu.memory_space<vmem>>, vector<16x32xbf16>,
    %92 = arith.truncf %87 : vector<16x32xf32> to vector<16x32xbf16>
    %c96 = arith.constant 96 : index
    %c32_17 = arith.constant 32 : index
    %93 = vector.load %arg11[%c96, %c32_17] : memref<128x64xbf16, #tpu.memory_space<vmem>>, vector<16x32xbf16>
    tpu.vector_store %arg11[%c96, %c32_17], %92 {strides = array<i32>} : memref<128x64xbf16, #tpu.memory_space<vmem>>, vector<16x32xbf16>,
    %cst_18 = arith.constant dense<0.000000e+00> : vector<16x256xf32>
    %94 = tpu.matmul %89, %6, %cst_18 {dimension_numbers = #tpu.dot_dimension_numbers<[1], [0], [0], [1], [0, 0, 1, 1], [], []>} : vector<16x64xbf16>, vector<64x256xbf16>, vector<16x256xf32> -> vector<16x256xf32>
    %95 = vector.extract_strided_slice %94 {offsets = [0, 0], sizes = [16, 128], strides = [1, 1]} : vector<16x256xf32> to vector<16x128xf32>
    %96 = vector.extract_strided_slice %5 {offsets = [32, 0], sizes = [16, 128], strides = [1, 1]} : vector<128x256xf32> to vector<16x128xf32>
    %97 = arith.addf %95, %96 : vector<16x128xf32>
    %98 = vector.extract_strided_slice %94 {offsets = [0, 128], sizes = [16, 128], strides = [1, 1]} : vector<16x256xf32> to vector<16x128xf32>
    %99 = vector.extract_strided_slice %5 {offsets = [80, 128], sizes = [16, 128], strides = [1, 1]} : vector<128x256xf32> to vector<16x128xf32>
    %100 = arith.addf %98, %99 : vector<16x128xf32>
    %101 = vector.extract_strided_slice %97 {offsets = [0, 0], sizes = [16, 96], strides = [1, 1]} : vector<16x128xf32> to vector<16x96xf32>
    %102 = arith.negf %101 : vector<16x96xf32>
    %103 = math.exp %102 : vector<16x96xf32>
    %cst_19 = arith.constant 1.000000e+00 : f32
    %104 = vector.broadcast %cst_19 : f32 to vector<16x96xf32>
    %105 = arith.addf %104, %103 : vector<16x96xf32>
    %106 = arith.divf %104, %105 : vector<16x96xf32>
    %107 = vector.extract_strided_slice %97 {offsets = [0, 96], sizes = [16, 32], strides = [1, 1]} : vector<16x128xf32> to vector<16x32xf32>
    %108 = math.tanh %107 : vector<16x32xf32>
    %109 = vector.extract_strided_slice %106 {offsets = [0, 0], sizes = [16, 32], strides = [1, 1]} : vector<16x96xf32> to vector<16x32xf32>
    %110 = vector.extract_strided_slice %106 {offsets = [0, 32], sizes = [16, 32], strides = [1, 1]} : vector<16x96xf32> to vector<16x32xf32>
    %111 = vector.extract_strided_slice %106 {offsets = [0, 64], sizes = [16, 32], strides = [1, 1]} : vector<16x96xf32> to vector<16x32xf32>
    %112 = arith.mulf %110, %69 : vector<16x32xf32>
    %113 = arith.mulf %109, %108 : vector<16x32xf32>
    %114 = arith.addf %112, %113 : vector<16x32xf32>
    %115 = math.tanh %114 : vector<16x32xf32>
    %116 = arith.mulf %111, %115 : vector<16x32xf32>
    %117 = vector.extract_strided_slice %100 {offsets = [0, 0], sizes = [16, 96], strides = [1, 1]} : vector<16x128xf32> to vector<16x96xf32>
    %118 = arith.negf %117 : vector<16x96xf32>
    %119 = math.exp %118 : vector<16x96xf32>
    %cst_20 = arith.constant 1.000000e+00 : f32
    %120 = vector.broadcast %cst_20 : f32 to vector<16x96xf32>
    %121 = arith.addf %120, %119 : vector<16x96xf32>
    %122 = arith.divf %120, %121 : vector<16x96xf32>
    %123 = vector.extract_strided_slice %100 {offsets = [0, 96], sizes = [16, 32], strides = [1, 1]} : vector<16x128xf32> to vector<16x32xf32>
    %124 = math.tanh %123 : vector<16x32xf32>
    %125 = vector.extract_strided_slice %122 {offsets = [0, 0], sizes = [16, 32], strides = [1, 1]} : vector<16x96xf32> to vector<16x32xf32>
    %126 = vector.extract_strided_slice %122 {offsets = [0, 32], sizes = [16, 32], strides = [1, 1]} : vector<16x96xf32> to vector<16x32xf32>
    %127 = vector.extract_strided_slice %122 {offsets = [0, 64], sizes = [16, 32], strides = [1, 1]} : vector<16x96xf32> to vector<16x32xf32>
    %128 = arith.mulf %126, %85 : vector<16x32xf32>
    %129 = arith.mulf %125, %124 : vector<16x32xf32>
    %130 = arith.addf %128, %129 : vector<16x32xf32>
    %131 = math.tanh %130 : vector<16x32xf32>
    %132 = arith.mulf %127, %131 : vector<16x32xf32>
    %133 = tpu.concatenate %116, %132 in 1 : vector<16x32xf32>, vector<16x32xf32> -> vector<16x64xf32>
    %134 = arith.truncf %133 : vector<16x64xf32> to vector<16x64xbf16>
    %135 = arith.truncf %116 : vector<16x32xf32> to vector<16x32xbf16>
    %c32_21 = arith.constant 32 : index
    %c0_22 = arith.constant 0 : index
    %136 = vector.load %arg11[%c32_21, %c0_22] : memref<128x64xbf16, #tpu.memory_space<vmem>>, vector<16x32xbf16>
    tpu.vector_store %arg11[%c32_21, %c0_22], %135 {strides = array<i32>} : memref<128x64xbf16, #tpu.memory_space<vmem>>, vector<16x32xbf16>,
    %137 = arith.truncf %132 : vector<16x32xf32> to vector<16x32xbf16>
    %c80 = arith.constant 80 : index
    %c32_23 = arith.constant 32 : index
    %138 = vector.load %arg11[%c80, %c32_23] : memref<128x64xbf16, #tpu.memory_space<vmem>>, vector<16x32xbf16>
    tpu.vector_store %arg11[%c80, %c32_23], %137 {strides = array<i32>} : memref<128x64xbf16, #tpu.memory_space<vmem>>, vector<16x32xbf16>,
    %cst_24 = arith.constant dense<0.000000e+00> : vector<16x256xf32>
    %139 = tpu.matmul %134, %6, %cst_24 {dimension_numbers = #tpu.dot_dimension_numbers<[1], [0], [0], [1], [0, 0, 1, 1], [], []>} : vector<16x64xbf16>, vector<64x256xbf16>, vector<16x256xf32> -> vector<16x256xf32>
    %140 = vector.extract_strided_slice %139 {offsets = [0, 0], sizes = [16, 128], strides = [1, 1]} : vector<16x256xf32> to vector<16x128xf32>
    %141 = vector.extract_strided_slice %5 {offsets = [48, 0], sizes = [16, 128], strides = [1, 1]} : vector<128x256xf32> to vector<16x128xf32>
    %142 = arith.addf %140, %141 : vector<16x128xf32>
    %143 = vector.extract_strided_slice %139 {offsets = [0, 128], sizes = [16, 128], strides = [1, 1]} : vector<16x256xf32> to vector<16x128xf32>
    %144 = vector.extract_strided_slice %5 {offsets = [64, 128], sizes = [16, 128], strides = [1, 1]} : vector<128x256xf32> to vector<16x128xf32>
    %145 = arith.addf %143, %144 : vector<16x128xf32>
    %146 = vector.extract_strided_slice %142 {offsets = [0, 0], sizes = [16, 96], strides = [1, 1]} : vector<16x128xf32> to vector<16x96xf32>
    %147 = arith.negf %146 : vector<16x96xf32>
    %148 = math.exp %147 : vector<16x96xf32>
    %cst_25 = arith.constant 1.000000e+00 : f32
    %149 = vector.broadcast %cst_25 : f32 to vector<16x96xf32>
    %150 = arith.addf %149, %148 : vector<16x96xf32>
    %151 = arith.divf %149, %150 : vector<16x96xf32>
    %152 = vector.extract_strided_slice %142 {offsets = [0, 96], sizes = [16, 32], strides = [1, 1]} : vector<16x128xf32> to vector<16x32xf32>
    %153 = math.tanh %152 : vector<16x32xf32>
    %154 = vector.extract_strided_slice %151 {offsets = [0, 0], sizes = [16, 32], strides = [1, 1]} : vector<16x96xf32> to vector<16x32xf32>
    %155 = vector.extract_strided_slice %151 {offsets = [0, 32], sizes = [16, 32], strides = [1, 1]} : vector<16x96xf32> to vector<16x32xf32>
    %156 = vector.extract_strided_slice %151 {offsets = [0, 64], sizes = [16, 32], strides = [1, 1]} : vector<16x96xf32> to vector<16x32xf32>
    %157 = arith.mulf %155, %114 : vector<16x32xf32>
    %158 = arith.mulf %154, %153 : vector<16x32xf32>
    %159 = arith.addf %157, %158 : vector<16x32xf32>
    %160 = math.tanh %159 : vector<16x32xf32>
    %161 = arith.mulf %156, %160 : vector<16x32xf32>
    %162 = vector.extract_strided_slice %145 {offsets = [0, 0], sizes = [16, 96], strides = [1, 1]} : vector<16x128xf32> to vector<16x96xf32>
    %163 = arith.negf %162 : vector<16x96xf32>
    %164 = math.exp %163 : vector<16x96xf32>
    %cst_26 = arith.constant 1.000000e+00 : f32
    %165 = vector.broadcast %cst_26 : f32 to vector<16x96xf32>
    %166 = arith.addf %165, %164 : vector<16x96xf32>
    %167 = arith.divf %165, %166 : vector<16x96xf32>
    %168 = vector.extract_strided_slice %145 {offsets = [0, 96], sizes = [16, 32], strides = [1, 1]} : vector<16x128xf32> to vector<16x32xf32>
    %169 = math.tanh %168 : vector<16x32xf32>
    %170 = vector.extract_strided_slice %167 {offsets = [0, 0], sizes = [16, 32], strides = [1, 1]} : vector<16x96xf32> to vector<16x32xf32>
    %171 = vector.extract_strided_slice %167 {offsets = [0, 32], sizes = [16, 32], strides = [1, 1]} : vector<16x96xf32> to vector<16x32xf32>
    %172 = vector.extract_strided_slice %167 {offsets = [0, 64], sizes = [16, 32], strides = [1, 1]} : vector<16x96xf32> to vector<16x32xf32>
    %173 = arith.mulf %171, %130 : vector<16x32xf32>
    %174 = arith.mulf %170, %169 : vector<16x32xf32>
    %175 = arith.addf %173, %174 : vector<16x32xf32>
    %176 = math.tanh %175 : vector<16x32xf32>
    %177 = arith.mulf %172, %176 : vector<16x32xf32>
    %178 = tpu.concatenate %161, %177 in 1 : vector<16x32xf32>, vector<16x32xf32> -> vector<16x64xf32>
    %179 = arith.truncf %178 : vector<16x64xf32> to vector<16x64xbf16>
    %180 = arith.truncf %161 : vector<16x32xf32> to vector<16x32xbf16>
    %c48 = arith.constant 48 : index
    %c0_27 = arith.constant 0 : index
    %181 = vector.load %arg11[%c48, %c0_27] : memref<128x64xbf16, #tpu.memory_space<vmem>>, vector<16x32xbf16>
    tpu.vector_store %arg11[%c48, %c0_27], %180 {strides = array<i32>} : memref<128x64xbf16, #tpu.memory_space<vmem>>, vector<16x32xbf16>,
    %182 = arith.truncf %177 : vector<16x32xf32> to vector<16x32xbf16>
    %c64 = arith.constant 64 : index
    %c32_28 = arith.constant 32 : index
    %183 = vector.load %arg11[%c64, %c32_28] : memref<128x64xbf16, #tpu.memory_space<vmem>>, vector<16x32xbf16>
    tpu.vector_store %arg11[%c64, %c32_28], %182 {strides = array<i32>} : memref<128x64xbf16, #tpu.memory_space<vmem>>, vector<16x32xbf16>,
    %cst_29 = arith.constant dense<0.000000e+00> : vector<16x256xf32>
    %184 = tpu.matmul %179, %6, %cst_29 {dimension_numbers = #tpu.dot_dimension_numbers<[1], [0], [0], [1], [0, 0, 1, 1], [], []>} : vector<16x64xbf16>, vector<64x256xbf16>, vector<16x256xf32> -> vector<16x256xf32>
    %185 = vector.extract_strided_slice %184 {offsets = [0, 0], sizes = [16, 128], strides = [1, 1]} : vector<16x256xf32> to vector<16x128xf32>
    %186 = vector.extract_strided_slice %5 {offsets = [64, 0], sizes = [16, 128], strides = [1, 1]} : vector<128x256xf32> to vector<16x128xf32>
    %187 = arith.addf %185, %186 : vector<16x128xf32>
    %188 = vector.extract_strided_slice %184 {offsets = [0, 128], sizes = [16, 128], strides = [1, 1]} : vector<16x256xf32> to vector<16x128xf32>
    %189 = vector.extract_strided_slice %5 {offsets = [48, 128], sizes = [16, 128], strides = [1, 1]} : vector<128x256xf32> to vector<16x128xf32>
    %190 = arith.addf %188, %189 : vector<16x128xf32>
    %191 = vector.extract_strided_slice %187 {offsets = [0, 0], sizes = [16, 96], strides = [1, 1]} : vector<16x128xf32> to vector<16x96xf32>
    %192 = arith.negf %191 : vector<16x96xf32>
    %193 = math.exp %192 : vector<16x96xf32>
    %cst_30 = arith.constant 1.000000e+00 : f32
    %194 = vector.broadcast %cst_30 : f32 to vector<16x96xf32>
    %195 = arith.addf %194, %193 : vector<16x96xf32>
    %196 = arith.divf %194, %195 : vector<16x96xf32>
    %197 = vector.extract_strided_slice %187 {offsets = [0, 96], sizes = [16, 32], strides = [1, 1]} : vector<16x128xf32> to vector<16x32xf32>
    %198 = math.tanh %197 : vector<16x32xf32>
    %199 = vector.extract_strided_slice %196 {offsets = [0, 0], sizes = [16, 32], strides = [1, 1]} : vector<16x96xf32> to vector<16x32xf32>
    %200 = vector.extract_strided_slice %196 {offsets = [0, 32], sizes = [16, 32], strides = [1, 1]} : vector<16x96xf32> to vector<16x32xf32>
    %201 = vector.extract_strided_slice %196 {offsets = [0, 64], sizes = [16, 32], strides = [1, 1]} : vector<16x96xf32> to vector<16x32xf32>
    %202 = arith.mulf %200, %159 : vector<16x32xf32>
    %203 = arith.mulf %199, %198 : vector<16x32xf32>
    %204 = arith.addf %202, %203 : vector<16x32xf32>
    %205 = math.tanh %204 : vector<16x32xf32>
    %206 = arith.mulf %201, %205 : vector<16x32xf32>
    %207 = vector.extract_strided_slice %190 {offsets = [0, 0], sizes = [16, 96], strides = [1, 1]} : vector<16x128xf32> to vector<16x96xf32>
    %208 = arith.negf %207 : vector<16x96xf32>
    %209 = math.exp %208 : vector<16x96xf32>
    %cst_31 = arith.constant 1.000000e+00 : f32
    %210 = vector.broadcast %cst_31 : f32 to vector<16x96xf32>
    %211 = arith.addf %210, %209 : vector<16x96xf32>
    %212 = arith.divf %210, %211 : vector<16x96xf32>
    %213 = vector.extract_strided_slice %190 {offsets = [0, 96], sizes = [16, 32], strides = [1, 1]} : vector<16x128xf32> to vector<16x32xf32>
    %214 = math.tanh %213 : vector<16x32xf32>
    %215 = vector.extract_strided_slice %212 {offsets = [0, 0], sizes = [16, 32], strides = [1, 1]} : vector<16x96xf32> to vector<16x32xf32>
    %216 = vector.extract_strided_slice %212 {offsets = [0, 32], sizes = [16, 32], strides = [1, 1]} : vector<16x96xf32> to vector<16x32xf32>
    %217 = vector.extract_strided_slice %212 {offsets = [0, 64], sizes = [16, 32], strides = [1, 1]} : vector<16x96xf32> to vector<16x32xf32>
    %218 = arith.mulf %216, %175 : vector<16x32xf32>
    %219 = arith.mulf %215, %214 : vector<16x32xf32>
    %220 = arith.addf %218, %219 : vector<16x32xf32>
    %221 = math.tanh %220 : vector<16x32xf32>
    %222 = arith.mulf %217, %221 : vector<16x32xf32>
    %223 = tpu.concatenate %206, %222 in 1 : vector<16x32xf32>, vector<16x32xf32> -> vector<16x64xf32>
    %224 = arith.truncf %223 : vector<16x64xf32> to vector<16x64xbf16>
    %225 = arith.truncf %206 : vector<16x32xf32> to vector<16x32xbf16>
    %c64_32 = arith.constant 64 : index
    %c0_33 = arith.constant 0 : index
    %226 = vector.load %arg11[%c64_32, %c0_33] : memref<128x64xbf16, #tpu.memory_space<vmem>>, vector<16x32xbf16>
    tpu.vector_store %arg11[%c64_32, %c0_33], %225 {strides = array<i32>} : memref<128x64xbf16, #tpu.memory_space<vmem>>, vector<16x32xbf16>,
    %227 = arith.truncf %222 : vector<16x32xf32> to vector<16x32xbf16>
    %c48_34 = arith.constant 48 : index
    %c32_35 = arith.constant 32 : index
    %228 = vector.load %arg11[%c48_34, %c32_35] : memref<128x64xbf16, #tpu.memory_space<vmem>>, vector<16x32xbf16>
    tpu.vector_store %arg11[%c48_34, %c32_35], %227 {strides = array<i32>} : memref<128x64xbf16, #tpu.memory_space<vmem>>, vector<16x32xbf16>,
    %cst_36 = arith.constant dense<0.000000e+00> : vector<16x256xf32>
    %229 = tpu.matmul %224, %6, %cst_36 {dimension_numbers = #tpu.dot_dimension_numbers<[1], [0], [0], [1], [0, 0, 1, 1], [], []>} : vector<16x64xbf16>, vector<64x256xbf16>, vector<16x256xf32> -> vector<16x256xf32>
    %230 = vector.extract_strided_slice %229 {offsets = [0, 0], sizes = [16, 128], strides = [1, 1]} : vector<16x256xf32> to vector<16x128xf32>
    %231 = vector.extract_strided_slice %5 {offsets = [80, 0], sizes = [16, 128], strides = [1, 1]} : vector<128x256xf32> to vector<16x128xf32>
    %232 = arith.addf %230, %231 : vector<16x128xf32>
    %233 = vector.extract_strided_slice %229 {offsets = [0, 128], sizes = [16, 128], strides = [1, 1]} : vector<16x256xf32> to vector<16x128xf32>
    %234 = vector.extract_strided_slice %5 {offsets = [32, 128], sizes = [16, 128], strides = [1, 1]} : vector<128x256xf32> to vector<16x128xf32>
    %235 = arith.addf %233, %234 : vector<16x128xf32>
    %236 = vector.extract_strided_slice %232 {offsets = [0, 0], sizes = [16, 96], strides = [1, 1]} : vector<16x128xf32> to vector<16x96xf32>
    %237 = arith.negf %236 : vector<16x96xf32>
    %238 = math.exp %237 : vector<16x96xf32>
    %cst_37 = arith.constant 1.000000e+00 : f32
    %239 = vector.broadcast %cst_37 : f32 to vector<16x96xf32>
    %240 = arith.addf %239, %238 : vector<16x96xf32>
    %241 = arith.divf %239, %240 : vector<16x96xf32>
    %242 = vector.extract_strided_slice %232 {offsets = [0, 96], sizes = [16, 32], strides = [1, 1]} : vector<16x128xf32> to vector<16x32xf32>
    %243 = math.tanh %242 : vector<16x32xf32>
    %244 = vector.extract_strided_slice %241 {offsets = [0, 0], sizes = [16, 32], strides = [1, 1]} : vector<16x96xf32> to vector<16x32xf32>
    %245 = vector.extract_strided_slice %241 {offsets = [0, 32], sizes = [16, 32], strides = [1, 1]} : vector<16x96xf32> to vector<16x32xf32>
    %246 = vector.extract_strided_slice %241 {offsets = [0, 64], sizes = [16, 32], strides = [1, 1]} : vector<16x96xf32> to vector<16x32xf32>
    %247 = arith.mulf %245, %204 : vector<16x32xf32>
    %248 = arith.mulf %244, %243 : vector<16x32xf32>
    %249 = arith.addf %247, %248 : vector<16x32xf32>
    %250 = math.tanh %249 : vector<16x32xf32>
    %251 = arith.mulf %246, %250 : vector<16x32xf32>
    %252 = vector.extract_strided_slice %235 {offsets = [0, 0], sizes = [16, 96], strides = [1, 1]} : vector<16x128xf32> to vector<16x96xf32>
    %253 = arith.negf %252 : vector<16x96xf32>
    %254 = math.exp %253 : vector<16x96xf32>
    %cst_38 = arith.constant 1.000000e+00 : f32
    %255 = vector.broadcast %cst_38 : f32 to vector<16x96xf32>
    %256 = arith.addf %255, %254 : vector<16x96xf32>
    %257 = arith.divf %255, %256 : vector<16x96xf32>
    %258 = vector.extract_strided_slice %235 {offsets = [0, 96], sizes = [16, 32], strides = [1, 1]} : vector<16x128xf32> to vector<16x32xf32>
    %259 = math.tanh %258 : vector<16x32xf32>
    %260 = vector.extract_strided_slice %257 {offsets = [0, 0], sizes = [16, 32], strides = [1, 1]} : vector<16x96xf32> to vector<16x32xf32>
    %261 = vector.extract_strided_slice %257 {offsets = [0, 32], sizes = [16, 32], strides = [1, 1]} : vector<16x96xf32> to vector<16x32xf32>
    %262 = vector.extract_strided_slice %257 {offsets = [0, 64], sizes = [16, 32], strides = [1, 1]} : vector<16x96xf32> to vector<16x32xf32>
    %263 = arith.mulf %261, %220 : vector<16x32xf32>
    %264 = arith.mulf %260, %259 : vector<16x32xf32>
    %265 = arith.addf %263, %264 : vector<16x32xf32>
    %266 = math.tanh %265 : vector<16x32xf32>
    %267 = arith.mulf %262, %266 : vector<16x32xf32>
    %268 = tpu.concatenate %251, %267 in 1 : vector<16x32xf32>, vector<16x32xf32> -> vector<16x64xf32>
    %269 = arith.truncf %268 : vector<16x64xf32> to vector<16x64xbf16>
    %270 = arith.truncf %251 : vector<16x32xf32> to vector<16x32xbf16>
    %c80_39 = arith.constant 80 : index
    %c0_40 = arith.constant 0 : index
    %271 = vector.load %arg11[%c80_39, %c0_40] : memref<128x64xbf16, #tpu.memory_space<vmem>>, vector<16x32xbf16>
    tpu.vector_store %arg11[%c80_39, %c0_40], %270 {strides = array<i32>} : memref<128x64xbf16, #tpu.memory_space<vmem>>, vector<16x32xbf16>,
    %272 = arith.truncf %267 : vector<16x32xf32> to vector<16x32xbf16>
    %c32_41 = arith.constant 32 : index
    %c32_42 = arith.constant 32 : index
    %273 = vector.load %arg11[%c32_41, %c32_42] : memref<128x64xbf16, #tpu.memory_space<vmem>>, vector<16x32xbf16>
    tpu.vector_store %arg11[%c32_41, %c32_42], %272 {strides = array<i32>} : memref<128x64xbf16, #tpu.memory_space<vmem>>, vector<16x32xbf16>,
    %cst_43 = arith.constant dense<0.000000e+00> : vector<16x256xf32>
    %274 = tpu.matmul %269, %6, %cst_43 {dimension_numbers = #tpu.dot_dimension_numbers<[1], [0], [0], [1], [0, 0, 1, 1], [], []>} : vector<16x64xbf16>, vector<64x256xbf16>, vector<16x256xf32> -> vector<16x256xf32>
    %275 = vector.extract_strided_slice %274 {offsets = [0, 0], sizes = [16, 128], strides = [1, 1]} : vector<16x256xf32> to vector<16x128xf32>
    %276 = vector.extract_strided_slice %5 {offsets = [96, 0], sizes = [16, 128], strides = [1, 1]} : vector<128x256xf32> to vector<16x128xf32>
    %277 = arith.addf %275, %276 : vector<16x128xf32>
    %278 = vector.extract_strided_slice %274 {offsets = [0, 128], sizes = [16, 128], strides = [1, 1]} : vector<16x256xf32> to vector<16x128xf32>
    %279 = vector.extract_strided_slice %5 {offsets = [16, 128], sizes = [16, 128], strides = [1, 1]} : vector<128x256xf32> to vector<16x128xf32>
    %280 = arith.addf %278, %279 : vector<16x128xf32>
    %281 = vector.extract_strided_slice %277 {offsets = [0, 0], sizes = [16, 96], strides = [1, 1]} : vector<16x128xf32> to vector<16x96xf32>
    %282 = arith.negf %281 : vector<16x96xf32>
    %283 = math.exp %282 : vector<16x96xf32>
    %cst_44 = arith.constant 1.000000e+00 : f32
    %284 = vector.broadcast %cst_44 : f32 to vector<16x96xf32>
    %285 = arith.addf %284, %283 : vector<16x96xf32>
    %286 = arith.divf %284, %285 : vector<16x96xf32>
    %287 = vector.extract_strided_slice %277 {offsets = [0, 96], sizes = [16, 32], strides = [1, 1]} : vector<16x128xf32> to vector<16x32xf32>
    %288 = math.tanh %287 : vector<16x32xf32>
    %289 = vector.extract_strided_slice %286 {offsets = [0, 0], sizes = [16, 32], strides = [1, 1]} : vector<16x96xf32> to vector<16x32xf32>
    %290 = vector.extract_strided_slice %286 {offsets = [0, 32], sizes = [16, 32], strides = [1, 1]} : vector<16x96xf32> to vector<16x32xf32>
    %291 = vector.extract_strided_slice %286 {offsets = [0, 64], sizes = [16, 32], strides = [1, 1]} : vector<16x96xf32> to vector<16x32xf32>
    %292 = arith.mulf %290, %249 : vector<16x32xf32>
    %293 = arith.mulf %289, %288 : vector<16x32xf32>
    %294 = arith.addf %292, %293 : vector<16x32xf32>
    %295 = math.tanh %294 : vector<16x32xf32>
    %296 = arith.mulf %291, %295 : vector<16x32xf32>
    %297 = vector.extract_strided_slice %280 {offsets = [0, 0], sizes = [16, 96], strides = [1, 1]} : vector<16x128xf32> to vector<16x96xf32>
    %298 = arith.negf %297 : vector<16x96xf32>
    %299 = math.exp %298 : vector<16x96xf32>
    %cst_45 = arith.constant 1.000000e+00 : f32
    %300 = vector.broadcast %cst_45 : f32 to vector<16x96xf32>
    %301 = arith.addf %300, %299 : vector<16x96xf32>
    %302 = arith.divf %300, %301 : vector<16x96xf32>
    %303 = vector.extract_strided_slice %280 {offsets = [0, 96], sizes = [16, 32], strides = [1, 1]} : vector<16x128xf32> to vector<16x32xf32>
    %304 = math.tanh %303 : vector<16x32xf32>
    %305 = vector.extract_strided_slice %302 {offsets = [0, 0], sizes = [16, 32], strides = [1, 1]} : vector<16x96xf32> to vector<16x32xf32>
    %306 = vector.extract_strided_slice %302 {offsets = [0, 32], sizes = [16, 32], strides = [1, 1]} : vector<16x96xf32> to vector<16x32xf32>
    %307 = vector.extract_strided_slice %302 {offsets = [0, 64], sizes = [16, 32], strides = [1, 1]} : vector<16x96xf32> to vector<16x32xf32>
    %308 = arith.mulf %306, %265 : vector<16x32xf32>
    %309 = arith.mulf %305, %304 : vector<16x32xf32>
    %310 = arith.addf %308, %309 : vector<16x32xf32>
    %311 = math.tanh %310 : vector<16x32xf32>
    %312 = arith.mulf %307, %311 : vector<16x32xf32>
    %313 = tpu.concatenate %296, %312 in 1 : vector<16x32xf32>, vector<16x32xf32> -> vector<16x64xf32>
    %314 = arith.truncf %313 : vector<16x64xf32> to vector<16x64xbf16>
    %315 = arith.truncf %296 : vector<16x32xf32> to vector<16x32xbf16>
    %c96_46 = arith.constant 96 : index
    %c0_47 = arith.constant 0 : index
    %316 = vector.load %arg11[%c96_46, %c0_47] : memref<128x64xbf16, #tpu.memory_space<vmem>>, vector<16x32xbf16>
    tpu.vector_store %arg11[%c96_46, %c0_47], %315 {strides = array<i32>} : memref<128x64xbf16, #tpu.memory_space<vmem>>, vector<16x32xbf16>,
    %317 = arith.truncf %312 : vector<16x32xf32> to vector<16x32xbf16>
    %c16_48 = arith.constant 16 : index
    %c32_49 = arith.constant 32 : index
    %318 = vector.load %arg11[%c16_48, %c32_49] : memref<128x64xbf16, #tpu.memory_space<vmem>>, vector<16x32xbf16>
    tpu.vector_store %arg11[%c16_48, %c32_49], %317 {strides = array<i32>} : memref<128x64xbf16, #tpu.memory_space<vmem>>, vector<16x32xbf16>,
    %cst_50 = arith.constant dense<0.000000e+00> : vector<16x256xf32>
    %319 = tpu.matmul %314, %6, %cst_50 {dimension_numbers = #tpu.dot_dimension_numbers<[1], [0], [0], [1], [0, 0, 1, 1], [], []>} : vector<16x64xbf16>, vector<64x256xbf16>, vector<16x256xf32> -> vector<16x256xf32>
    %320 = vector.extract_strided_slice %319 {offsets = [0, 0], sizes = [16, 128], strides = [1, 1]} : vector<16x256xf32> to vector<16x128xf32>
    %321 = vector.extract_strided_slice %5 {offsets = [112, 0], sizes = [16, 128], strides = [1, 1]} : vector<128x256xf32> to vector<16x128xf32>
    %322 = arith.addf %320, %321 : vector<16x128xf32>
    %323 = vector.extract_strided_slice %319 {offsets = [0, 128], sizes = [16, 128], strides = [1, 1]} : vector<16x256xf32> to vector<16x128xf32>
    %324 = vector.extract_strided_slice %5 {offsets = [0, 128], sizes = [16, 128], strides = [1, 1]} : vector<128x256xf32> to vector<16x128xf32>
    %325 = arith.addf %323, %324 : vector<16x128xf32>
    %326 = vector.extract_strided_slice %322 {offsets = [0, 0], sizes = [16, 96], strides = [1, 1]} : vector<16x128xf32> to vector<16x96xf32>
    %327 = arith.negf %326 : vector<16x96xf32>
    %328 = math.exp %327 : vector<16x96xf32>
    %cst_51 = arith.constant 1.000000e+00 : f32
    %329 = vector.broadcast %cst_51 : f32 to vector<16x96xf32>
    %330 = arith.addf %329, %328 : vector<16x96xf32>
    %331 = arith.divf %329, %330 : vector<16x96xf32>
    %332 = vector.extract_strided_slice %322 {offsets = [0, 96], sizes = [16, 32], strides = [1, 1]} : vector<16x128xf32> to vector<16x32xf32>
    %333 = math.tanh %332 : vector<16x32xf32>
    %334 = vector.extract_strided_slice %331 {offsets = [0, 0], sizes = [16, 32], strides = [1, 1]} : vector<16x96xf32> to vector<16x32xf32>
    %335 = vector.extract_strided_slice %331 {offsets = [0, 32], sizes = [16, 32], strides = [1, 1]} : vector<16x96xf32> to vector<16x32xf32>
    %336 = vector.extract_strided_slice %331 {offsets = [0, 64], sizes = [16, 32], strides = [1, 1]} : vector<16x96xf32> to vector<16x32xf32>
    %337 = arith.mulf %335, %294 : vector<16x32xf32>
    %338 = arith.mulf %334, %333 : vector<16x32xf32>
    %339 = arith.addf %337, %338 : vector<16x32xf32>
    %340 = math.tanh %339 : vector<16x32xf32>
    %341 = arith.mulf %336, %340 : vector<16x32xf32>
    %342 = vector.extract_strided_slice %325 {offsets = [0, 0], sizes = [16, 96], strides = [1, 1]} : vector<16x128xf32> to vector<16x96xf32>
    %343 = arith.negf %342 : vector<16x96xf32>
    %344 = math.exp %343 : vector<16x96xf32>
    %cst_52 = arith.constant 1.000000e+00 : f32
    %345 = vector.broadcast %cst_52 : f32 to vector<16x96xf32>
    %346 = arith.addf %345, %344 : vector<16x96xf32>
    %347 = arith.divf %345, %346 : vector<16x96xf32>
    %348 = vector.extract_strided_slice %325 {offsets = [0, 96], sizes = [16, 32], strides = [1, 1]} : vector<16x128xf32> to vector<16x32xf32>
    %349 = math.tanh %348 : vector<16x32xf32>
    %350 = vector.extract_strided_slice %347 {offsets = [0, 0], sizes = [16, 32], strides = [1, 1]} : vector<16x96xf32> to vector<16x32xf32>
    %351 = vector.extract_strided_slice %347 {offsets = [0, 32], sizes = [16, 32], strides = [1, 1]} : vector<16x96xf32> to vector<16x32xf32>
    %352 = vector.extract_strided_slice %347 {offsets = [0, 64], sizes = [16, 32], strides = [1, 1]} : vector<16x96xf32> to vector<16x32xf32>
    %353 = arith.mulf %351, %310 : vector<16x32xf32>
    %354 = arith.mulf %350, %349 : vector<16x32xf32>
    %355 = arith.addf %353, %354 : vector<16x32xf32>
    %356 = math.tanh %355 : vector<16x32xf32>
    %357 = arith.mulf %352, %356 : vector<16x32xf32>
    %358 = arith.truncf %341 : vector<16x32xf32> to vector<16x32xbf16>
    %c112_53 = arith.constant 112 : index
    %c0_54 = arith.constant 0 : index
    %359 = vector.load %arg11[%c112_53, %c0_54] : memref<128x64xbf16, #tpu.memory_space<vmem>>, vector<16x32xbf16>
    tpu.vector_store %arg11[%c112_53, %c0_54], %358 {strides = array<i32>} : memref<128x64xbf16, #tpu.memory_space<vmem>>, vector<16x32xbf16>,
    %360 = arith.truncf %357 : vector<16x32xf32> to vector<16x32xbf16>
    %c0_55 = arith.constant 0 : index
    %c32_56 = arith.constant 32 : index
    %361 = vector.load %arg11[%c0_55, %c32_56] : memref<128x64xbf16, #tpu.memory_space<vmem>>, vector<16x32xbf16>
    tpu.vector_store %arg11[%c0_55, %c32_56], %360 {strides = array<i32>} : memref<128x64xbf16, #tpu.memory_space<vmem>>, vector<16x32xbf16>,
    %c0_57 = arith.constant 0 : index
    %c0_58 = arith.constant 0 : index
    %362 = vector.load %arg11[%c0_57, %c0_58] : memref<128x64xbf16, #tpu.memory_space<vmem>>, vector<128x64xbf16>
    %c0_59 = arith.constant 0 : index
    %c0_60 = arith.constant 0 : index
    %363 = vector.load %arg4[%c0_59, %c0_60] : memref<64x256xbf16, #tpu.memory_space<vmem>>, vector<64x256xbf16>
    %cst_61 = arith.constant dense<0.000000e+00> : vector<128x256xf32>
    %364 = tpu.matmul %362, %363, %cst_61 {dimension_numbers = #tpu.dot_dimension_numbers<[1], [0], [0], [1], [0, 0, 1, 1], [], []>} : vector<128x64xbf16>, vector<64x256xbf16>, vector<128x256xf32> -> vector<128x256xf32>
    %c0_62 = arith.constant 0 : index
    %c0_63 = arith.constant 0 : index
    %365 = vector.load %arg6[%c0_62, %c0_63] : memref<1x256xf32, #tpu.memory_space<vmem>>, vector<1x256xf32>
    %366 = vector.broadcast %365 : vector<1x256xf32> to vector<128x256xf32>
    %367 = arith.addf %364, %366 : vector<128x256xf32>
    %c0_64 = arith.constant 0 : index
    %c0_65 = arith.constant 0 : index
    %368 = vector.load %arg5[%c0_64, %c0_65] : memref<64x256xbf16, #tpu.memory_space<vmem>>, vector<64x256xbf16>
    %cst_66 = arith.constant 0.000000e+00 : f32
    %369 = vector.broadcast %cst_66 : f32 to vector<16x32xf32>
    %cst_67 = arith.constant 0.000000e+00 : f32
    %370 = vector.broadcast %cst_67 : f32 to vector<16x32xf32>
    %cst_68 = arith.constant 0xFF800000 : f32
    %371 = vector.broadcast %cst_68 : f32 to vector<16x32xf32>
    %cst_69 = arith.constant 0xFF800000 : f32
    %372 = vector.broadcast %cst_69 : f32 to vector<16x32xf32>
    %373 = vector.extract_strided_slice %367 {offsets = [0, 0], sizes = [16, 128], strides = [1, 1]} : vector<128x256xf32> to vector<16x128xf32>
    %374 = vector.extract_strided_slice %367 {offsets = [112, 128], sizes = [16, 128], strides = [1, 1]} : vector<128x256xf32> to vector<16x128xf32>
    %375 = vector.extract_strided_slice %373 {offsets = [0, 0], sizes = [16, 96], strides = [1, 1]} : vector<16x128xf32> to vector<16x96xf32>
    %376 = arith.negf %375 : vector<16x96xf32>
    %377 = math.exp %376 : vector<16x96xf32>
    %cst_70 = arith.constant 1.000000e+00 : f32
    %378 = vector.broadcast %cst_70 : f32 to vector<16x96xf32>
    %379 = arith.addf %378, %377 : vector<16x96xf32>
    %380 = arith.divf %378, %379 : vector<16x96xf32>
    %381 = vector.extract_strided_slice %373 {offsets = [0, 96], sizes = [16, 32], strides = [1, 1]} : vector<16x128xf32> to vector<16x32xf32>
    %382 = math.tanh %381 : vector<16x32xf32>
    %383 = vector.extract_strided_slice %380 {offsets = [0, 0], sizes = [16, 32], strides = [1, 1]} : vector<16x96xf32> to vector<16x32xf32>
    %384 = vector.extract_strided_slice %380 {offsets = [0, 32], sizes = [16, 32], strides = [1, 1]} : vector<16x96xf32> to vector<16x32xf32>
    %385 = vector.extract_strided_slice %380 {offsets = [0, 64], sizes = [16, 32], strides = [1, 1]} : vector<16x96xf32> to vector<16x32xf32>
    %386 = arith.mulf %384, %369 : vector<16x32xf32>
    %387 = arith.mulf %383, %382 : vector<16x32xf32>
    %388 = arith.addf %386, %387 : vector<16x32xf32>
    %389 = math.tanh %388 : vector<16x32xf32>
    %390 = arith.mulf %385, %389 : vector<16x32xf32>
    %391 = vector.extract_strided_slice %374 {offsets = [0, 0], sizes = [16, 96], strides = [1, 1]} : vector<16x128xf32> to vector<16x96xf32>
    %392 = arith.negf %391 : vector<16x96xf32>
    %393 = math.exp %392 : vector<16x96xf32>
    %cst_71 = arith.constant 1.000000e+00 : f32
    %394 = vector.broadcast %cst_71 : f32 to vector<16x96xf32>
    %395 = arith.addf %394, %393 : vector<16x96xf32>
    %396 = arith.divf %394, %395 : vector<16x96xf32>
    %397 = vector.extract_strided_slice %374 {offsets = [0, 96], sizes = [16, 32], strides = [1, 1]} : vector<16x128xf32> to vector<16x32xf32>
    %398 = math.tanh %397 : vector<16x32xf32>
    %399 = vector.extract_strided_slice %396 {offsets = [0, 0], sizes = [16, 32], strides = [1, 1]} : vector<16x96xf32> to vector<16x32xf32>
    %400 = vector.extract_strided_slice %396 {offsets = [0, 32], sizes = [16, 32], strides = [1, 1]} : vector<16x96xf32> to vector<16x32xf32>
    %401 = vector.extract_strided_slice %396 {offsets = [0, 64], sizes = [16, 32], strides = [1, 1]} : vector<16x96xf32> to vector<16x32xf32>
    %402 = arith.mulf %400, %370 : vector<16x32xf32>
    %403 = arith.mulf %399, %398 : vector<16x32xf32>
    %404 = arith.addf %402, %403 : vector<16x32xf32>
    %405 = math.tanh %404 : vector<16x32xf32>
    %406 = arith.mulf %401, %405 : vector<16x32xf32>
    %407 = tpu.concatenate %390, %406 in 1 : vector<16x32xf32>, vector<16x32xf32> -> vector<16x64xf32>
    %408 = arith.truncf %407 : vector<16x64xf32> to vector<16x64xbf16>
    %409 = arith.maximumf %371, %390 : vector<16x32xf32>
    %410 = arith.maximumf %372, %406 : vector<16x32xf32>
    %cst_72 = arith.constant dense<0.000000e+00> : vector<16x256xf32>
    %411 = tpu.matmul %408, %368, %cst_72 {dimension_numbers = #tpu.dot_dimension_numbers<[1], [0], [0], [1], [0, 0, 1, 1], [], []>} : vector<16x64xbf16>, vector<64x256xbf16>, vector<16x256xf32> -> vector<16x256xf32>
    %412 = vector.extract_strided_slice %411 {offsets = [0, 0], sizes = [16, 128], strides = [1, 1]} : vector<16x256xf32> to vector<16x128xf32>
    %413 = vector.extract_strided_slice %367 {offsets = [16, 0], sizes = [16, 128], strides = [1, 1]} : vector<128x256xf32> to vector<16x128xf32>
    %414 = arith.addf %412, %413 : vector<16x128xf32>
    %415 = vector.extract_strided_slice %411 {offsets = [0, 128], sizes = [16, 128], strides = [1, 1]} : vector<16x256xf32> to vector<16x128xf32>
    %416 = vector.extract_strided_slice %367 {offsets = [96, 128], sizes = [16, 128], strides = [1, 1]} : vector<128x256xf32> to vector<16x128xf32>
    %417 = arith.addf %415, %416 : vector<16x128xf32>
    %418 = vector.extract_strided_slice %414 {offsets = [0, 0], sizes = [16, 96], strides = [1, 1]} : vector<16x128xf32> to vector<16x96xf32>
    %419 = arith.negf %418 : vector<16x96xf32>
    %420 = math.exp %419 : vector<16x96xf32>
    %cst_73 = arith.constant 1.000000e+00 : f32
    %421 = vector.broadcast %cst_73 : f32 to vector<16x96xf32>
    %422 = arith.addf %421, %420 : vector<16x96xf32>
    %423 = arith.divf %421, %422 : vector<16x96xf32>
    %424 = vector.extract_strided_slice %414 {offsets = [0, 96], sizes = [16, 32], strides = [1, 1]} : vector<16x128xf32> to vector<16x32xf32>
    %425 = math.tanh %424 : vector<16x32xf32>
    %426 = vector.extract_strided_slice %423 {offsets = [0, 0], sizes = [16, 32], strides = [1, 1]} : vector<16x96xf32> to vector<16x32xf32>
    %427 = vector.extract_strided_slice %423 {offsets = [0, 32], sizes = [16, 32], strides = [1, 1]} : vector<16x96xf32> to vector<16x32xf32>
    %428 = vector.extract_strided_slice %423 {offsets = [0, 64], sizes = [16, 32], strides = [1, 1]} : vector<16x96xf32> to vector<16x32xf32>
    %429 = arith.mulf %427, %388 : vector<16x32xf32>
    %430 = arith.mulf %426, %425 : vector<16x32xf32>
    %431 = arith.addf %429, %430 : vector<16x32xf32>
    %432 = math.tanh %431 : vector<16x32xf32>
    %433 = arith.mulf %428, %432 : vector<16x32xf32>
    %434 = vector.extract_strided_slice %417 {offsets = [0, 0], sizes = [16, 96], strides = [1, 1]} : vector<16x128xf32> to vector<16x96xf32>
    %435 = arith.negf %434 : vector<16x96xf32>
    %436 = math.exp %435 : vector<16x96xf32>
    %cst_74 = arith.constant 1.000000e+00 : f32
    %437 = vector.broadcast %cst_74 : f32 to vector<16x96xf32>
    %438 = arith.addf %437, %436 : vector<16x96xf32>
    %439 = arith.divf %437, %438 : vector<16x96xf32>
    %440 = vector.extract_strided_slice %417 {offsets = [0, 96], sizes = [16, 32], strides = [1, 1]} : vector<16x128xf32> to vector<16x32xf32>
    %441 = math.tanh %440 : vector<16x32xf32>
    %442 = vector.extract_strided_slice %439 {offsets = [0, 0], sizes = [16, 32], strides = [1, 1]} : vector<16x96xf32> to vector<16x32xf32>
    %443 = vector.extract_strided_slice %439 {offsets = [0, 32], sizes = [16, 32], strides = [1, 1]} : vector<16x96xf32> to vector<16x32xf32>
    %444 = vector.extract_strided_slice %439 {offsets = [0, 64], sizes = [16, 32], strides = [1, 1]} : vector<16x96xf32> to vector<16x32xf32>
    %445 = arith.mulf %443, %404 : vector<16x32xf32>
    %446 = arith.mulf %442, %441 : vector<16x32xf32>
    %447 = arith.addf %445, %446 : vector<16x32xf32>
    %448 = math.tanh %447 : vector<16x32xf32>
    %449 = arith.mulf %444, %448 : vector<16x32xf32>
    %450 = tpu.concatenate %433, %449 in 1 : vector<16x32xf32>, vector<16x32xf32> -> vector<16x64xf32>
    %451 = arith.truncf %450 : vector<16x64xf32> to vector<16x64xbf16>
    %452 = arith.maximumf %409, %433 : vector<16x32xf32>
    %453 = arith.maximumf %410, %449 : vector<16x32xf32>
    %cst_75 = arith.constant dense<0.000000e+00> : vector<16x256xf32>
    %454 = tpu.matmul %451, %368, %cst_75 {dimension_numbers = #tpu.dot_dimension_numbers<[1], [0], [0], [1], [0, 0, 1, 1], [], []>} : vector<16x64xbf16>, vector<64x256xbf16>, vector<16x256xf32> -> vector<16x256xf32>
    %455 = vector.extract_strided_slice %454 {offsets = [0, 0], sizes = [16, 128], strides = [1, 1]} : vector<16x256xf32> to vector<16x128xf32>
    %456 = vector.extract_strided_slice %367 {offsets = [32, 0], sizes = [16, 128], strides = [1, 1]} : vector<128x256xf32> to vector<16x128xf32>
    %457 = arith.addf %455, %456 : vector<16x128xf32>
    %458 = vector.extract_strided_slice %454 {offsets = [0, 128], sizes = [16, 128], strides = [1, 1]} : vector<16x256xf32> to vector<16x128xf32>
    %459 = vector.extract_strided_slice %367 {offsets = [80, 128], sizes = [16, 128], strides = [1, 1]} : vector<128x256xf32> to vector<16x128xf32>
    %460 = arith.addf %458, %459 : vector<16x128xf32>
    %461 = vector.extract_strided_slice %457 {offsets = [0, 0], sizes = [16, 96], strides = [1, 1]} : vector<16x128xf32> to vector<16x96xf32>
    %462 = arith.negf %461 : vector<16x96xf32>
    %463 = math.exp %462 : vector<16x96xf32>
    %cst_76 = arith.constant 1.000000e+00 : f32
    %464 = vector.broadcast %cst_76 : f32 to vector<16x96xf32>
    %465 = arith.addf %464, %463 : vector<16x96xf32>
    %466 = arith.divf %464, %465 : vector<16x96xf32>
    %467 = vector.extract_strided_slice %457 {offsets = [0, 96], sizes = [16, 32], strides = [1, 1]} : vector<16x128xf32> to vector<16x32xf32>
    %468 = math.tanh %467 : vector<16x32xf32>
    %469 = vector.extract_strided_slice %466 {offsets = [0, 0], sizes = [16, 32], strides = [1, 1]} : vector<16x96xf32> to vector<16x32xf32>
    %470 = vector.extract_strided_slice %466 {offsets = [0, 32], sizes = [16, 32], strides = [1, 1]} : vector<16x96xf32> to vector<16x32xf32>
    %471 = vector.extract_strided_slice %466 {offsets = [0, 64], sizes = [16, 32], strides = [1, 1]} : vector<16x96xf32> to vector<16x32xf32>
    %472 = arith.mulf %470, %431 : vector<16x32xf32>
    %473 = arith.mulf %469, %468 : vector<16x32xf32>
    %474 = arith.addf %472, %473 : vector<16x32xf32>
    %475 = math.tanh %474 : vector<16x32xf32>
    %476 = arith.mulf %471, %475 : vector<16x32xf32>
    %477 = vector.extract_strided_slice %460 {offsets = [0, 0], sizes = [16, 96], strides = [1, 1]} : vector<16x128xf32> to vector<16x96xf32>
    %478 = arith.negf %477 : vector<16x96xf32>
    %479 = math.exp %478 : vector<16x96xf32>
    %cst_77 = arith.constant 1.000000e+00 : f32
    %480 = vector.broadcast %cst_77 : f32 to vector<16x96xf32>
    %481 = arith.addf %480, %479 : vector<16x96xf32>
    %482 = arith.divf %480, %481 : vector<16x96xf32>
    %483 = vector.extract_strided_slice %460 {offsets = [0, 96], sizes = [16, 32], strides = [1, 1]} : vector<16x128xf32> to vector<16x32xf32>
    %484 = math.tanh %483 : vector<16x32xf32>
    %485 = vector.extract_strided_slice %482 {offsets = [0, 0], sizes = [16, 32], strides = [1, 1]} : vector<16x96xf32> to vector<16x32xf32>
    %486 = vector.extract_strided_slice %482 {offsets = [0, 32], sizes = [16, 32], strides = [1, 1]} : vector<16x96xf32> to vector<16x32xf32>
    %487 = vector.extract_strided_slice %482 {offsets = [0, 64], sizes = [16, 32], strides = [1, 1]} : vector<16x96xf32> to vector<16x32xf32>
    %488 = arith.mulf %486, %447 : vector<16x32xf32>
    %489 = arith.mulf %485, %484 : vector<16x32xf32>
    %490 = arith.addf %488, %489 : vector<16x32xf32>
    %491 = math.tanh %490 : vector<16x32xf32>
    %492 = arith.mulf %487, %491 : vector<16x32xf32>
    %493 = tpu.concatenate %476, %492 in 1 : vector<16x32xf32>, vector<16x32xf32> -> vector<16x64xf32>
    %494 = arith.truncf %493 : vector<16x64xf32> to vector<16x64xbf16>
    %495 = arith.maximumf %452, %476 : vector<16x32xf32>
    %496 = arith.maximumf %453, %492 : vector<16x32xf32>
    %cst_78 = arith.constant dense<0.000000e+00> : vector<16x256xf32>
    %497 = tpu.matmul %494, %368, %cst_78 {dimension_numbers = #tpu.dot_dimension_numbers<[1], [0], [0], [1], [0, 0, 1, 1], [], []>} : vector<16x64xbf16>, vector<64x256xbf16>, vector<16x256xf32> -> vector<16x256xf32>
    %498 = vector.extract_strided_slice %497 {offsets = [0, 0], sizes = [16, 128], strides = [1, 1]} : vector<16x256xf32> to vector<16x128xf32>
    %499 = vector.extract_strided_slice %367 {offsets = [48, 0], sizes = [16, 128], strides = [1, 1]} : vector<128x256xf32> to vector<16x128xf32>
    %500 = arith.addf %498, %499 : vector<16x128xf32>
    %501 = vector.extract_strided_slice %497 {offsets = [0, 128], sizes = [16, 128], strides = [1, 1]} : vector<16x256xf32> to vector<16x128xf32>
    %502 = vector.extract_strided_slice %367 {offsets = [64, 128], sizes = [16, 128], strides = [1, 1]} : vector<128x256xf32> to vector<16x128xf32>
    %503 = arith.addf %501, %502 : vector<16x128xf32>
    %504 = vector.extract_strided_slice %500 {offsets = [0, 0], sizes = [16, 96], strides = [1, 1]} : vector<16x128xf32> to vector<16x96xf32>
    %505 = arith.negf %504 : vector<16x96xf32>
    %506 = math.exp %505 : vector<16x96xf32>
    %cst_79 = arith.constant 1.000000e+00 : f32
    %507 = vector.broadcast %cst_79 : f32 to vector<16x96xf32>
    %508 = arith.addf %507, %506 : vector<16x96xf32>
    %509 = arith.divf %507, %508 : vector<16x96xf32>
    %510 = vector.extract_strided_slice %500 {offsets = [0, 96], sizes = [16, 32], strides = [1, 1]} : vector<16x128xf32> to vector<16x32xf32>
    %511 = math.tanh %510 : vector<16x32xf32>
    %512 = vector.extract_strided_slice %509 {offsets = [0, 0], sizes = [16, 32], strides = [1, 1]} : vector<16x96xf32> to vector<16x32xf32>
    %513 = vector.extract_strided_slice %509 {offsets = [0, 32], sizes = [16, 32], strides = [1, 1]} : vector<16x96xf32> to vector<16x32xf32>
    %514 = vector.extract_strided_slice %509 {offsets = [0, 64], sizes = [16, 32], strides = [1, 1]} : vector<16x96xf32> to vector<16x32xf32>
    %515 = arith.mulf %513, %474 : vector<16x32xf32>
    %516 = arith.mulf %512, %511 : vector<16x32xf32>
    %517 = arith.addf %515, %516 : vector<16x32xf32>
    %518 = math.tanh %517 : vector<16x32xf32>
    %519 = arith.mulf %514, %518 : vector<16x32xf32>
    %520 = vector.extract_strided_slice %503 {offsets = [0, 0], sizes = [16, 96], strides = [1, 1]} : vector<16x128xf32> to vector<16x96xf32>
    %521 = arith.negf %520 : vector<16x96xf32>
    %522 = math.exp %521 : vector<16x96xf32>
    %cst_80 = arith.constant 1.000000e+00 : f32
    %523 = vector.broadcast %cst_80 : f32 to vector<16x96xf32>
    %524 = arith.addf %523, %522 : vector<16x96xf32>
    %525 = arith.divf %523, %524 : vector<16x96xf32>
    %526 = vector.extract_strided_slice %503 {offsets = [0, 96], sizes = [16, 32], strides = [1, 1]} : vector<16x128xf32> to vector<16x32xf32>
    %527 = math.tanh %526 : vector<16x32xf32>
    %528 = vector.extract_strided_slice %525 {offsets = [0, 0], sizes = [16, 32], strides = [1, 1]} : vector<16x96xf32> to vector<16x32xf32>
    %529 = vector.extract_strided_slice %525 {offsets = [0, 32], sizes = [16, 32], strides = [1, 1]} : vector<16x96xf32> to vector<16x32xf32>
    %530 = vector.extract_strided_slice %525 {offsets = [0, 64], sizes = [16, 32], strides = [1, 1]} : vector<16x96xf32> to vector<16x32xf32>
    %531 = arith.mulf %529, %490 : vector<16x32xf32>
    %532 = arith.mulf %528, %527 : vector<16x32xf32>
    %533 = arith.addf %531, %532 : vector<16x32xf32>
    %534 = math.tanh %533 : vector<16x32xf32>
    %535 = arith.mulf %530, %534 : vector<16x32xf32>
    %536 = tpu.concatenate %519, %535 in 1 : vector<16x32xf32>, vector<16x32xf32> -> vector<16x64xf32>
    %537 = arith.truncf %536 : vector<16x64xf32> to vector<16x64xbf16>
    %538 = arith.maximumf %495, %519 : vector<16x32xf32>
    %539 = arith.maximumf %496, %535 : vector<16x32xf32>
    %cst_81 = arith.constant dense<0.000000e+00> : vector<16x256xf32>
    %540 = tpu.matmul %537, %368, %cst_81 {dimension_numbers = #tpu.dot_dimension_numbers<[1], [0], [0], [1], [0, 0, 1, 1], [], []>} : vector<16x64xbf16>, vector<64x256xbf16>, vector<16x256xf32> -> vector<16x256xf32>
    %541 = vector.extract_strided_slice %540 {offsets = [0, 0], sizes = [16, 128], strides = [1, 1]} : vector<16x256xf32> to vector<16x128xf32>
    %542 = vector.extract_strided_slice %367 {offsets = [64, 0], sizes = [16, 128], strides = [1, 1]} : vector<128x256xf32> to vector<16x128xf32>
    %543 = arith.addf %541, %542 : vector<16x128xf32>
    %544 = vector.extract_strided_slice %540 {offsets = [0, 128], sizes = [16, 128], strides = [1, 1]} : vector<16x256xf32> to vector<16x128xf32>
    %545 = vector.extract_strided_slice %367 {offsets = [48, 128], sizes = [16, 128], strides = [1, 1]} : vector<128x256xf32> to vector<16x128xf32>
    %546 = arith.addf %544, %545 : vector<16x128xf32>
    %547 = vector.extract_strided_slice %543 {offsets = [0, 0], sizes = [16, 96], strides = [1, 1]} : vector<16x128xf32> to vector<16x96xf32>
    %548 = arith.negf %547 : vector<16x96xf32>
    %549 = math.exp %548 : vector<16x96xf32>
    %cst_82 = arith.constant 1.000000e+00 : f32
    %550 = vector.broadcast %cst_82 : f32 to vector<16x96xf32>
    %551 = arith.addf %550, %549 : vector<16x96xf32>
    %552 = arith.divf %550, %551 : vector<16x96xf32>
    %553 = vector.extract_strided_slice %543 {offsets = [0, 96], sizes = [16, 32], strides = [1, 1]} : vector<16x128xf32> to vector<16x32xf32>
    %554 = math.tanh %553 : vector<16x32xf32>
    %555 = vector.extract_strided_slice %552 {offsets = [0, 0], sizes = [16, 32], strides = [1, 1]} : vector<16x96xf32> to vector<16x32xf32>
    %556 = vector.extract_strided_slice %552 {offsets = [0, 32], sizes = [16, 32], strides = [1, 1]} : vector<16x96xf32> to vector<16x32xf32>
    %557 = vector.extract_strided_slice %552 {offsets = [0, 64], sizes = [16, 32], strides = [1, 1]} : vector<16x96xf32> to vector<16x32xf32>
    %558 = arith.mulf %556, %517 : vector<16x32xf32>
    %559 = arith.mulf %555, %554 : vector<16x32xf32>
    %560 = arith.addf %558, %559 : vector<16x32xf32>
    %561 = math.tanh %560 : vector<16x32xf32>
    %562 = arith.mulf %557, %561 : vector<16x32xf32>
    %563 = vector.extract_strided_slice %546 {offsets = [0, 0], sizes = [16, 96], strides = [1, 1]} : vector<16x128xf32> to vector<16x96xf32>
    %564 = arith.negf %563 : vector<16x96xf32>
    %565 = math.exp %564 : vector<16x96xf32>
    %cst_83 = arith.constant 1.000000e+00 : f32
    %566 = vector.broadcast %cst_83 : f32 to vector<16x96xf32>
    %567 = arith.addf %566, %565 : vector<16x96xf32>
    %568 = arith.divf %566, %567 : vector<16x96xf32>
    %569 = vector.extract_strided_slice %546 {offsets = [0, 96], sizes = [16, 32], strides = [1, 1]} : vector<16x128xf32> to vector<16x32xf32>
    %570 = math.tanh %569 : vector<16x32xf32>
    %571 = vector.extract_strided_slice %568 {offsets = [0, 0], sizes = [16, 32], strides = [1, 1]} : vector<16x96xf32> to vector<16x32xf32>
    %572 = vector.extract_strided_slice %568 {offsets = [0, 32], sizes = [16, 32], strides = [1, 1]} : vector<16x96xf32> to vector<16x32xf32>
    %573 = vector.extract_strided_slice %568 {offsets = [0, 64], sizes = [16, 32], strides = [1, 1]} : vector<16x96xf32> to vector<16x32xf32>
    %574 = arith.mulf %572, %533 : vector<16x32xf32>
    %575 = arith.mulf %571, %570 : vector<16x32xf32>
    %576 = arith.addf %574, %575 : vector<16x32xf32>
    %577 = math.tanh %576 : vector<16x32xf32>
    %578 = arith.mulf %573, %577 : vector<16x32xf32>
    %579 = tpu.concatenate %562, %578 in 1 : vector<16x32xf32>, vector<16x32xf32> -> vector<16x64xf32>
    %580 = arith.truncf %579 : vector<16x64xf32> to vector<16x64xbf16>
    %581 = arith.maximumf %538, %562 : vector<16x32xf32>
    %582 = arith.maximumf %539, %578 : vector<16x32xf32>
    %cst_84 = arith.constant dense<0.000000e+00> : vector<16x256xf32>
    %583 = tpu.matmul %580, %368, %cst_84 {dimension_numbers = #tpu.dot_dimension_numbers<[1], [0], [0], [1], [0, 0, 1, 1], [], []>} : vector<16x64xbf16>, vector<64x256xbf16>, vector<16x256xf32> -> vector<16x256xf32>
    %584 = vector.extract_strided_slice %583 {offsets = [0, 0], sizes = [16, 128], strides = [1, 1]} : vector<16x256xf32> to vector<16x128xf32>
    %585 = vector.extract_strided_slice %367 {offsets = [80, 0], sizes = [16, 128], strides = [1, 1]} : vector<128x256xf32> to vector<16x128xf32>
    %586 = arith.addf %584, %585 : vector<16x128xf32>
    %587 = vector.extract_strided_slice %583 {offsets = [0, 128], sizes = [16, 128], strides = [1, 1]} : vector<16x256xf32> to vector<16x128xf32>
    %588 = vector.extract_strided_slice %367 {offsets = [32, 128], sizes = [16, 128], strides = [1, 1]} : vector<128x256xf32> to vector<16x128xf32>
    %589 = arith.addf %587, %588 : vector<16x128xf32>
    %590 = vector.extract_strided_slice %586 {offsets = [0, 0], sizes = [16, 96], strides = [1, 1]} : vector<16x128xf32> to vector<16x96xf32>
    %591 = arith.negf %590 : vector<16x96xf32>
    %592 = math.exp %591 : vector<16x96xf32>
    %cst_85 = arith.constant 1.000000e+00 : f32
    %593 = vector.broadcast %cst_85 : f32 to vector<16x96xf32>
    %594 = arith.addf %593, %592 : vector<16x96xf32>
    %595 = arith.divf %593, %594 : vector<16x96xf32>
    %596 = vector.extract_strided_slice %586 {offsets = [0, 96], sizes = [16, 32], strides = [1, 1]} : vector<16x128xf32> to vector<16x32xf32>
    %597 = math.tanh %596 : vector<16x32xf32>
    %598 = vector.extract_strided_slice %595 {offsets = [0, 0], sizes = [16, 32], strides = [1, 1]} : vector<16x96xf32> to vector<16x32xf32>
    %599 = vector.extract_strided_slice %595 {offsets = [0, 32], sizes = [16, 32], strides = [1, 1]} : vector<16x96xf32> to vector<16x32xf32>
    %600 = vector.extract_strided_slice %595 {offsets = [0, 64], sizes = [16, 32], strides = [1, 1]} : vector<16x96xf32> to vector<16x32xf32>
    %601 = arith.mulf %599, %560 : vector<16x32xf32>
    %602 = arith.mulf %598, %597 : vector<16x32xf32>
    %603 = arith.addf %601, %602 : vector<16x32xf32>
    %604 = math.tanh %603 : vector<16x32xf32>
    %605 = arith.mulf %600, %604 : vector<16x32xf32>
    %606 = vector.extract_strided_slice %589 {offsets = [0, 0], sizes = [16, 96], strides = [1, 1]} : vector<16x128xf32> to vector<16x96xf32>
    %607 = arith.negf %606 : vector<16x96xf32>
    %608 = math.exp %607 : vector<16x96xf32>
    %cst_86 = arith.constant 1.000000e+00 : f32
    %609 = vector.broadcast %cst_86 : f32 to vector<16x96xf32>
    %610 = arith.addf %609, %608 : vector<16x96xf32>
    %611 = arith.divf %609, %610 : vector<16x96xf32>
    %612 = vector.extract_strided_slice %589 {offsets = [0, 96], sizes = [16, 32], strides = [1, 1]} : vector<16x128xf32> to vector<16x32xf32>
    %613 = math.tanh %612 : vector<16x32xf32>
    %614 = vector.extract_strided_slice %611 {offsets = [0, 0], sizes = [16, 32], strides = [1, 1]} : vector<16x96xf32> to vector<16x32xf32>
    %615 = vector.extract_strided_slice %611 {offsets = [0, 32], sizes = [16, 32], strides = [1, 1]} : vector<16x96xf32> to vector<16x32xf32>
    %616 = vector.extract_strided_slice %611 {offsets = [0, 64], sizes = [16, 32], strides = [1, 1]} : vector<16x96xf32> to vector<16x32xf32>
    %617 = arith.mulf %615, %576 : vector<16x32xf32>
    %618 = arith.mulf %614, %613 : vector<16x32xf32>
    %619 = arith.addf %617, %618 : vector<16x32xf32>
    %620 = math.tanh %619 : vector<16x32xf32>
    %621 = arith.mulf %616, %620 : vector<16x32xf32>
    %622 = tpu.concatenate %605, %621 in 1 : vector<16x32xf32>, vector<16x32xf32> -> vector<16x64xf32>
    %623 = arith.truncf %622 : vector<16x64xf32> to vector<16x64xbf16>
    %624 = arith.maximumf %581, %605 : vector<16x32xf32>
    %625 = arith.maximumf %582, %621 : vector<16x32xf32>
    %cst_87 = arith.constant dense<0.000000e+00> : vector<16x256xf32>
    %626 = tpu.matmul %623, %368, %cst_87 {dimension_numbers = #tpu.dot_dimension_numbers<[1], [0], [0], [1], [0, 0, 1, 1], [], []>} : vector<16x64xbf16>, vector<64x256xbf16>, vector<16x256xf32> -> vector<16x256xf32>
    %627 = vector.extract_strided_slice %626 {offsets = [0, 0], sizes = [16, 128], strides = [1, 1]} : vector<16x256xf32> to vector<16x128xf32>
    %628 = vector.extract_strided_slice %367 {offsets = [96, 0], sizes = [16, 128], strides = [1, 1]} : vector<128x256xf32> to vector<16x128xf32>
    %629 = arith.addf %627, %628 : vector<16x128xf32>
    %630 = vector.extract_strided_slice %626 {offsets = [0, 128], sizes = [16, 128], strides = [1, 1]} : vector<16x256xf32> to vector<16x128xf32>
    %631 = vector.extract_strided_slice %367 {offsets = [16, 128], sizes = [16, 128], strides = [1, 1]} : vector<128x256xf32> to vector<16x128xf32>
    %632 = arith.addf %630, %631 : vector<16x128xf32>
    %633 = vector.extract_strided_slice %629 {offsets = [0, 0], sizes = [16, 96], strides = [1, 1]} : vector<16x128xf32> to vector<16x96xf32>
    %634 = arith.negf %633 : vector<16x96xf32>
    %635 = math.exp %634 : vector<16x96xf32>
    %cst_88 = arith.constant 1.000000e+00 : f32
    %636 = vector.broadcast %cst_88 : f32 to vector<16x96xf32>
    %637 = arith.addf %636, %635 : vector<16x96xf32>
    %638 = arith.divf %636, %637 : vector<16x96xf32>
    %639 = vector.extract_strided_slice %629 {offsets = [0, 96], sizes = [16, 32], strides = [1, 1]} : vector<16x128xf32> to vector<16x32xf32>
    %640 = math.tanh %639 : vector<16x32xf32>
    %641 = vector.extract_strided_slice %638 {offsets = [0, 0], sizes = [16, 32], strides = [1, 1]} : vector<16x96xf32> to vector<16x32xf32>
    %642 = vector.extract_strided_slice %638 {offsets = [0, 32], sizes = [16, 32], strides = [1, 1]} : vector<16x96xf32> to vector<16x32xf32>
    %643 = vector.extract_strided_slice %638 {offsets = [0, 64], sizes = [16, 32], strides = [1, 1]} : vector<16x96xf32> to vector<16x32xf32>
    %644 = arith.mulf %642, %603 : vector<16x32xf32>
    %645 = arith.mulf %641, %640 : vector<16x32xf32>
    %646 = arith.addf %644, %645 : vector<16x32xf32>
    %647 = math.tanh %646 : vector<16x32xf32>
    %648 = arith.mulf %643, %647 : vector<16x32xf32>
    %649 = vector.extract_strided_slice %632 {offsets = [0, 0], sizes = [16, 96], strides = [1, 1]} : vector<16x128xf32> to vector<16x96xf32>
    %650 = arith.negf %649 : vector<16x96xf32>
    %651 = math.exp %650 : vector<16x96xf32>
    %cst_89 = arith.constant 1.000000e+00 : f32
    %652 = vector.broadcast %cst_89 : f32 to vector<16x96xf32>
    %653 = arith.addf %652, %651 : vector<16x96xf32>
    %654 = arith.divf %652, %653 : vector<16x96xf32>
    %655 = vector.extract_strided_slice %632 {offsets = [0, 96], sizes = [16, 32], strides = [1, 1]} : vector<16x128xf32> to vector<16x32xf32>
    %656 = math.tanh %655 : vector<16x32xf32>
    %657 = vector.extract_strided_slice %654 {offsets = [0, 0], sizes = [16, 32], strides = [1, 1]} : vector<16x96xf32> to vector<16x32xf32>
    %658 = vector.extract_strided_slice %654 {offsets = [0, 32], sizes = [16, 32], strides = [1, 1]} : vector<16x96xf32> to vector<16x32xf32>
    %659 = vector.extract_strided_slice %654 {offsets = [0, 64], sizes = [16, 32], strides = [1, 1]} : vector<16x96xf32> to vector<16x32xf32>
    %660 = arith.mulf %658, %619 : vector<16x32xf32>
    %661 = arith.mulf %657, %656 : vector<16x32xf32>
    %662 = arith.addf %660, %661 : vector<16x32xf32>
    %663 = math.tanh %662 : vector<16x32xf32>
    %664 = arith.mulf %659, %663 : vector<16x32xf32>
    %665 = tpu.concatenate %648, %664 in 1 : vector<16x32xf32>, vector<16x32xf32> -> vector<16x64xf32>
    %666 = arith.truncf %665 : vector<16x64xf32> to vector<16x64xbf16>
    %667 = arith.maximumf %624, %648 : vector<16x32xf32>
    %668 = arith.maximumf %625, %664 : vector<16x32xf32>
    %cst_90 = arith.constant dense<0.000000e+00> : vector<16x256xf32>
    %669 = tpu.matmul %666, %368, %cst_90 {dimension_numbers = #tpu.dot_dimension_numbers<[1], [0], [0], [1], [0, 0, 1, 1], [], []>} : vector<16x64xbf16>, vector<64x256xbf16>, vector<16x256xf32> -> vector<16x256xf32>
    %670 = vector.extract_strided_slice %669 {offsets = [0, 0], sizes = [16, 128], strides = [1, 1]} : vector<16x256xf32> to vector<16x128xf32>
    %671 = vector.extract_strided_slice %367 {offsets = [112, 0], sizes = [16, 128], strides = [1, 1]} : vector<128x256xf32> to vector<16x128xf32>
    %672 = arith.addf %670, %671 : vector<16x128xf32>
    %673 = vector.extract_strided_slice %669 {offsets = [0, 128], sizes = [16, 128], strides = [1, 1]} : vector<16x256xf32> to vector<16x128xf32>
    %674 = vector.extract_strided_slice %367 {offsets = [0, 128], sizes = [16, 128], strides = [1, 1]} : vector<128x256xf32> to vector<16x128xf32>
    %675 = arith.addf %673, %674 : vector<16x128xf32>
    %676 = vector.extract_strided_slice %672 {offsets = [0, 0], sizes = [16, 96], strides = [1, 1]} : vector<16x128xf32> to vector<16x96xf32>
    %677 = arith.negf %676 : vector<16x96xf32>
    %678 = math.exp %677 : vector<16x96xf32>
    %cst_91 = arith.constant 1.000000e+00 : f32
    %679 = vector.broadcast %cst_91 : f32 to vector<16x96xf32>
    %680 = arith.addf %679, %678 : vector<16x96xf32>
    %681 = arith.divf %679, %680 : vector<16x96xf32>
    %682 = vector.extract_strided_slice %672 {offsets = [0, 96], sizes = [16, 32], strides = [1, 1]} : vector<16x128xf32> to vector<16x32xf32>
    %683 = math.tanh %682 : vector<16x32xf32>
    %684 = vector.extract_strided_slice %681 {offsets = [0, 0], sizes = [16, 32], strides = [1, 1]} : vector<16x96xf32> to vector<16x32xf32>
    %685 = vector.extract_strided_slice %681 {offsets = [0, 32], sizes = [16, 32], strides = [1, 1]} : vector<16x96xf32> to vector<16x32xf32>
    %686 = vector.extract_strided_slice %681 {offsets = [0, 64], sizes = [16, 32], strides = [1, 1]} : vector<16x96xf32> to vector<16x32xf32>
    %687 = arith.mulf %685, %646 : vector<16x32xf32>
    %688 = arith.mulf %684, %683 : vector<16x32xf32>
    %689 = arith.addf %687, %688 : vector<16x32xf32>
    %690 = math.tanh %689 : vector<16x32xf32>
    %691 = arith.mulf %686, %690 : vector<16x32xf32>
    %692 = vector.extract_strided_slice %675 {offsets = [0, 0], sizes = [16, 96], strides = [1, 1]} : vector<16x128xf32> to vector<16x96xf32>
    %693 = arith.negf %692 : vector<16x96xf32>
    %694 = math.exp %693 : vector<16x96xf32>
    %cst_92 = arith.constant 1.000000e+00 : f32
    %695 = vector.broadcast %cst_92 : f32 to vector<16x96xf32>
    %696 = arith.addf %695, %694 : vector<16x96xf32>
    %697 = arith.divf %695, %696 : vector<16x96xf32>
    %698 = vector.extract_strided_slice %675 {offsets = [0, 96], sizes = [16, 32], strides = [1, 1]} : vector<16x128xf32> to vector<16x32xf32>
    %699 = math.tanh %698 : vector<16x32xf32>
    %700 = vector.extract_strided_slice %697 {offsets = [0, 0], sizes = [16, 32], strides = [1, 1]} : vector<16x96xf32> to vector<16x32xf32>
    %701 = vector.extract_strided_slice %697 {offsets = [0, 32], sizes = [16, 32], strides = [1, 1]} : vector<16x96xf32> to vector<16x32xf32>
    %702 = vector.extract_strided_slice %697 {offsets = [0, 64], sizes = [16, 32], strides = [1, 1]} : vector<16x96xf32> to vector<16x32xf32>
    %703 = arith.mulf %701, %662 : vector<16x32xf32>
    %704 = arith.mulf %700, %699 : vector<16x32xf32>
    %705 = arith.addf %703, %704 : vector<16x32xf32>
    %706 = math.tanh %705 : vector<16x32xf32>
    %707 = arith.mulf %702, %706 : vector<16x32xf32>
    %708 = arith.maximumf %667, %691 : vector<16x32xf32>
    %709 = arith.maximumf %668, %707 : vector<16x32xf32>
    %c0_93 = arith.constant 0 : index
    %c0_94 = arith.constant 0 : index
    %710 = vector.load %arg7[%c0_93, %c0_94] : memref<1x32xf32, #tpu.memory_space<vmem>>, vector<1x32xf32>
    %711 = vector.broadcast %710 : vector<1x32xf32> to vector<16x32xf32>
    %712 = arith.mulf %708, %711 : vector<16x32xf32>
    %cst_95 = arith.constant dense<0.000000e+00> : vector<16xf32>
    %713 = vector.multi_reduction <add>, %712, %cst_95 [1] : vector<16x32xf32> to vector<16xf32>
    %714 = vector.shape_cast %713 : vector<16xf32> to vector<16x1xf32>
    %c0_96 = arith.constant 0 : index
    %c0_97 = arith.constant 0 : index
    %715 = vector.load %arg8[%c0_96, %c0_97] : memref<1x32xf32, #tpu.memory_space<vmem>>, vector<1x32xf32>
    %716 = vector.broadcast %715 : vector<1x32xf32> to vector<16x32xf32>
    %717 = arith.mulf %709, %716 : vector<16x32xf32>
    %cst_98 = arith.constant dense<0.000000e+00> : vector<16xf32>
    %718 = vector.multi_reduction <add>, %717, %cst_98 [1] : vector<16x32xf32> to vector<16xf32>
    %719 = vector.shape_cast %718 : vector<16xf32> to vector<16x1xf32>
    %720 = arith.addf %714, %719 : vector<16x1xf32>
    %c0_99 = arith.constant 0 : index
    %c0_100 = arith.constant 0 : index
    %721 = vector.load %arg9[%c0_99, %c0_100] : memref<1x1xf32, #tpu.memory_space<vmem>>, vector<1x1xf32>
    %722 = vector.broadcast %721 : vector<1x1xf32> to vector<16x1xf32>
    %723 = arith.addf %720, %722 : vector<16x1xf32>
    %c0_101 = arith.constant 0 : index
    %c0_102 = arith.constant 0 : index
    %724 = vector.load %arg10[%c0_101, %c0_102] : memref<16x1xf32, #tpu.memory_space<vmem>>, vector<16x1xf32>
    tpu.vector_store %arg10[%c0_101, %c0_102], %723 {strides = array<i32>} : memref<16x1xf32, #tpu.memory_space<vmem>>, vector<16x1xf32>,
    return
  }
}

</mosaic_0001>

<bundles_post_ra>
// kernel: birnn_classifier_forward.1
= control target key start
LH: loop header
LB: loop body
LE: loop exit
PB: predicated region body
PF: predicated region fallthrough
CT: control target
= control target key end

     0   :  { %v4105_v1 = vmov 0   ;;  %vm130_vm0 = vcmask 261120   ;;  %v60_v13 = vlaneseq  ;;  %s4107_s28 = smov 64   ;;  %vm444_vm1 = vcmask 523264   ;;  %s5614_s1 = inlined_call_operand.vmem [shape: bf16[32,256], index: 1, kind: input, shape index: {}]   ;;  %s5615_s0 = inlined_call_operand.vmem [shape: bf16[128,32], index: 0, kind: input, shape index: {}]   ;;  %s5616_s3 = inlined_call_operand.vmem [shape: f32[1,256], index: 3, kind: input, shape index: {}]   ;;  %s5617_s2 = inlined_call_operand.vmem [shape: bf16[64,256], index: 2, kind: input, shape index: {}]   ;;  %s5618_s4 = inlined_call_operand.vmem [shape: bf16[64,256], index: 4, kind: input, shape index: {}]   ;;  %s5619_s6 = inlined_call_operand.vmem [shape: f32[1,256], index: 6, kind: input, shape index: {}]   ;;  %s5620_s5 = inlined_call_operand.vmem [shape: bf16[64,256], index: 5, kind: input, shape index: {}]   ;;  %s5621_s7 = inlined_call_operand.vmem [shape: f32[1,32], index: 7, kind: input, shape index: {}]   ;;  %s5622_s8 = inlined_call_operand.vmem [shape: f32[1,32], index: 8, kind: input, shape index: {}]   ;;  %s5623_s9 = inlined_call_operand.<no memory space> [shape: f32[1,1], index: 9, kind: input, shape index: {}]   ;;  %s5624_s10 = inlined_call_operand.vmem [shape: f32[16,1], index: 10, kind: output, shape index: {}]  }
   0x1   :  { %v3542_v0 = vld [vmem:[%s5614_s1 + $0x4] ss:$8 sps:$4 sm:$0xff]   ;;  %187 = vmatprep.mubr.bf16.mxu0 %v4105_v1  ;;  %480 = vmatprep.mubr.bf16.mxu1 %v4105_v1  ;;  %v3544_v2 = vld [vmem:[%s5614_s1] ss:$8 sps:$4 sm:$0xff]   ;;  %v3545_v3 = vld [vmem:[%s5614_s1 + $0x14] ss:$8 sps:$4 sm:$0xff]  }
   0x2   :  { %155 = vmatprep.subr.bf16.mxu0 %v3542_v0  ;;  %v3547_v4 = vld [vmem:[%s5614_s1 + $0x10] ss:$8 sps:$4 sm:$0xff]   ;;  %v3548_v5 = vld [vmem:[%s5615_s0] sm:$0xff]   ;;  %v3549_v6 = vld [vmem:[%s5615_s0 + $0x8] sm:$0xff]   ;;  %v4218_v14 = vshrl.u32 %v60_v13, 7  ;;  %vm402_vm2 = vcmask 523520  }
   0x3   :  { %156 = vmatpush1.bf16.msra.mxu0 %v3544_v2  ;;  %v3550_v7 = vld [vmem:[%s5615_s0 + $0x10] sm:$0xff]   ;;  %v3551_v8 = vld [vmem:[%s5615_s0 + $0x18] sm:$0xff]   ;;  %v3552_v9 = vld [vmem:[%s5615_s0 + $0x20] sm:$0xff]   ;;  %vm3258_vm3 = vcmask 7168  }
   0x4   :  { %157 = vmatprep.subr.bf16.mxu0 %v3545_v3  ;;  %v3553_v10 = vld [vmem:[%s5615_s0 + $0x28] sm:$0xff]   ;;  %v3554_v11 = vld [vmem:[%s5615_s0 + $0x30] sm:$0xff]   ;;  %v3555_v12 = vld [vmem:[%s5615_s0 + $0x38] sm:$0xff]   ;;  %v5626_v15 = vsub.s32 0, %v4218_v14  ;;  %v5625_v17 = vsub.s32 1, %v4218_v14  ;;  %s4106_s0 = smov 32  }
   0x5   :  { %v58_v16 = vld [vmem:[%s5616_s3] sm:$0x3] }
   0x6   :  { %v4227_v18 = vrot.slane %v58_v16, %v5626_v15  ;;  %v4231_v19 = vrot.slane %v58_v16, %v5625_v17 }
   0x7   :  { %158 = vmatpush1.bf16.msra.mxu0 %v3547_v4 }
   0xa   :  { %3277 = vmatmul.mubr.msk.bf16.vlgmr.msra.gmra.mrb[0].mxu0 %vm130_vm0, %v3548_v5 }
   0xb   :  { %197 = vmatprep.mubr.bf16.mxu0 %v4105_v1 }
  0x12   :  { %3278 = vmatmul.mubr.msk.bf16.gmra.mrb[4].mxu0 %vm130_vm0, %v3549_v6 }
  0x13   :  { %207 = vmatprep.mubr.bf16.mxu0 %v4105_v1 }
  0x1a   :  { %3279 = vmatmul.mubr.msk.bf16.gmra.mrb[8].mxu0 %vm130_vm0, %v3550_v7 }
  0x1b   :  { %217 = vmatprep.mubr.bf16.mxu0 %v4105_v1 }
  0x22   :  { %3280 = vmatmul.mubr.msk.bf16.gmra.mrb[12].mxu0 %vm130_vm0, %v3551_v8 }
  0x23   :  { %227 = vmatprep.mubr.bf16.mxu0 %v4105_v1 }
  0x2a   :  { %3281 = vmatmul.mubr.msk.bf16.gmra.mrb[16].mxu0 %vm130_vm0, %v3552_v9 }
  0x2b   :  { %237 = vmatprep.mubr.bf16.mxu0 %v4105_v1 }
  0x32   :  { %3282 = vmatmul.mubr.msk.bf16.gmra.mrb[20].mxu0 %vm130_vm0, %v3553_v10 }
  0x33   :  { %247 = vmatprep.mubr.bf16.mxu0 %v4105_v1 }
  0x3a   :  { %3283 = vmatmul.mubr.msk.bf16.gmra.mrb[24].mxu0 %vm130_vm0, %v3554_v11 }
  0x3b   :  { %257 = vmatprep.mubr.bf16.mxu0 %v4105_v1 }
  0x42   :  { %3284 = vmatmul.mubr.msk.bf16.gmra.mrb[28].mxu0 %vm130_vm0, %v3555_v12 }
  0x43   :  { %1188 = vmatprep.mubr.bf16.mxu0 %v4105_v1 }
  0xdd   :  { %v189_v20 = vpop.f32.mrb[0].mxu0 }
  0xde   :  { %v4234_v21 = vadd.f32 %v189_v20, %v4227_v18  ;;  %v191_v22 = vpop.f32.mrb[1].mxu0 }
  0xdf   :  { %v4237_v23 = vadd.f32 %v191_v22, %v4231_v19  ;;  %v193_v24 = vpop.f32.mrb[2].mxu0 }
  0xe0   :  { %3592 = vtanh.f32 %v4234_v21  ;;  %v4241_v25 = vadd.f32 %v193_v24, %v4227_v18  ;;  %v195_v26 = vpop.f32.mrb[3].mxu0 }
  0xe1   :  { %v4244_v27 = vadd.f32 %v195_v26, %v4231_v19 }
  0xe2   :  { %3594 = vtanh.f32 %v4241_v25 }
  0xe5   :  { %v199_v28 = vpop.f32.mrb[4].mxu0 }
  0xe6   :  { %v4248_v29 = vadd.f32 %v199_v28, %v4227_v18  ;;  %v201_v30 = vpop.f32.mrb[5].mxu0 }
  0xe7   :  { %v4251_v31 = vadd.f32 %v201_v30, %v4231_v19  ;;  %v203_v32 = vpop.f32.mrb[6].mxu0 }
  0xe8   :  { %v4254_v33 = vadd.f32 %v203_v32, %v4227_v18  ;;  %v205_v34 = vpop.f32.mrb[7].mxu0 }
  0xe9   :  { %v4257_v35 = vadd.f32 %v205_v34, %v4231_v19 }
  0xea   :  { %v3593_v36 = vpop.eup %3592 }
  0xeb   :  { %294 = vrot.lane.b32.xlu0 %v3593_v36, %s4106_s0 }
  0xec   :  { %v3595_v38 = vpop.eup %3594 }
  0xed   :  { %v209_v37 = vpop.f32.mrb[8].mxu0 }
  0xee   :  { %v4261_v39 = vadd.f32 %v209_v37, %v4227_v18  ;;  %v211_v40 = vpop.f32.mrb[9].mxu0 }
  0xef   :  { %v4264_v41 = vadd.f32 %v211_v40, %v4231_v19  ;;  %v213_v42 = vpop.f32.mrb[10].mxu0  ;;  %296 = vrot.lane.b32.xlu0 %v3595_v38, %s4106_s0  ;;  %v3285_v38 = vmul.f32 -1.442695, %v4234_v21  ;;  %v3286_v40 = vmul.f32 -1.442695, %v4241_v25 }
  0xf0   :  { %v4268_v43 = vadd.f32 %v213_v42, %v4227_v18  ;;  %v215_v44 = vpop.f32.mrb[11].mxu0 }
  0xf1   :  { %v4271_v45 = vadd.f32 %v215_v44, %v4231_v19 }
  0xf5   :  { %v219_v46 = vpop.f32.mrb[12].mxu0 }
  0xf6   :  { %v4274_v47 = vadd.f32 %v219_v46, %v4227_v18  ;;  %v221_v48 = vpop.f32.mrb[13].mxu0 }
  0xf7   :  { %v4277_v49 = vadd.f32 %v221_v48, %v4231_v19  ;;  %v223_v50 = vpop.f32.mrb[14].mxu0 }
  0xf8   :  { %v4280_v51 = vadd.f32 %v223_v50, %v4227_v18  ;;  %v225_v52 = vpop.f32.mrb[15].mxu0 }
  0xf9   :  { %v4283_v53 = vadd.f32 %v225_v52, %v4231_v19 }
  0xfd   :  { %v229_v54 = vpop.f32.mrb[16].mxu0 }
  0xfe   :  { %v4286_v55 = vadd.f32 %v229_v54, %v4227_v18  ;;  %v231_v56 = vpop.f32.mrb[17].mxu0 }
  0xff   :  { %v4289_v57 = vadd.f32 %v231_v56, %v4231_v19  ;;  %v233_v58 = vpop.f32.mrb[18].mxu0 }
 0x100   :  { %v4292_v59 = vadd.f32 %v233_v58, %v4227_v18  ;;  %v235_v60 = vpop.f32.mrb[19].mxu0 }
 0x101   :  { %v4295_v61 = vadd.f32 %v235_v60, %v4231_v19 }
 0x105   :  { %v239_v62 = vpop.f32.mrb[20].mxu0 }
 0x106   :  { %v4298_v63 = vadd.f32 %v239_v62, %v4227_v18  ;;  %v241_v0 = vpop.f32.mrb[21].mxu0 }
 0x107   :  { %v4301_v2 = vadd.f32 %v241_v0, %v4231_v19  ;;  %v243_v3 = vpop.f32.mrb[22].mxu0 }
 0x108   :  { %v4304_v4 = vadd.f32 %v243_v3, %v4227_v18  ;;  %v245_v5 = vpop.f32.mrb[23].mxu0 }
 0x109   :  { %v4307_v6 = vadd.f32 %v245_v5, %v4231_v19 }
 0x10d   :  { %v249_v7 = vpop.f32.mrb[24].mxu0 }
 0x10e   :  { %v4310_v8 = vadd.f32 %v249_v7, %v4227_v18  ;;  %v251_v9 = vpop.f32.mrb[25].mxu0 }
 0x10f   :  { %v4313_v10 = vadd.f32 %v251_v9, %v4231_v19  ;;  %v253_v11 = vpop.f32.mrb[26].mxu0 }
 0x110   :  { %v4316_v12 = vadd.f32 %v253_v11, %v4227_v18  ;;  %v255_v13 = vpop.f32.mrb[27].mxu0 }
 0x111   :  { %v4319_v16 = vadd.f32 %v255_v13, %v4231_v19 }
 0x115   :  { %v259_v20 = vpop.f32.mrb[28].mxu0 }
 0x116   :  { %v4322_v22 = vadd.f32 %v259_v20, %v4227_v18  ;;  %v261_v24 = vpop.f32.mrb[29].mxu0 }
 0x117   :  { %v262_v26 = vadd.f32 %v261_v24, %v4231_v19  ;;  %v263_v28 = vpop.f32.mrb[30].mxu0 }
 0x118   :  { %v4326_v30 = vadd.f32 %v263_v28, %v4227_v18  ;;  %v265_v32 = vpop.f32.mrb[31].mxu0 }
 0x119   :  { %3596 = vtanh.f32 %v262_v26  ;;  %v266_v34 = vadd.f32 %v265_v32, %v4231_v19  ;;  %v3287_v25 = vmul.f32 -1.442695, %v262_v26 }
 0x11b   :  { %3598 = vtanh.f32 %v266_v34  ;;  %v3288_v56 = vmul.f32 -1.442695, %v266_v34 }
 0x11c   :  { %3600 = vpow2.f32 %v3285_v38 }
 0x11d   :  { %3602 = vpow2.f32 %v3286_v40 }
 0x123   :  { %v3597_v36 = vpop.eup %3596 }
 0x124   :  { %342 = vrot.lane.b32.xlu1 %v3597_v36, %s4106_s0 }
 0x125   :  { %v3599_v37 = vpop.eup %3598 }
 0x126   :  { %v3601_v42 = vpop.eup %3600 }
 0x127   :  { %v282_v18 = vadd.f32 1.0, %v3601_v42  ;;  %v3603_v44 = vpop.eup %3602 }
 0x128   :  { %344 = vrot.lane.b32.xlu1 %v3599_v37, %s4106_s0  ;;  %v283_v46 = vadd.f32 1.0, %v3603_v44 }
 0x129   :  { %3604 = vrcp.f32 %v282_v18 }
 0x12a   :  { %3606 = vrcp.f32 %v283_v46 }
 0x12b   :  { %3608 = vpow2.f32 %v3287_v25  ;;  %v4383_v25 = vld [vmem:[%s5617_s2 + $0x14] ss:$8 sps:$4 sm:$0xff]  }
 0x12c   :  { %3610 = vpow2.f32 %v3288_v56  ;;  %v4390_v56 = vld [vmem:[%s5617_s2 + $0x10] ss:$8 sps:$4 sm:$0xff]  }
 0x133   :  { %v4333_v19 = vpop.eup %3604 }
 0x134   :  { %v4337_v52 = vpop.eup %3606  ;;  %v290_v20 = vmul.f32 0.0, %v4333_v19 }
 0x135   :  { %v3609_v58 = vpop.eup %3608  ;;  %v291_v28 = vmul.f32 0.0, %v4337_v52 }
 0x136   :  { %v330_v60 = vadd.f32 1.0, %v3609_v58  ;;  %v3611_v62 = vpop.eup %3610  ;;  %v4397_v58 = vld [vmem:[%s5617_s2 + $0x24] ss:$8 sps:$4 sm:$0xff]  }
 0x137   :  { %v331_v0 = vadd.f32 1.0, %v3611_v62 }
 0x138   :  { %3612 = vrcp.f32 %v330_v60 }
 0x139   :  { %3614 = vrcp.f32 %v331_v0  ;;  %v4404_v0 = vld [vmem:[%s5617_s2 + $0x20] ss:$8 sps:$4 sm:$0xff]  }
 0x142   :  { %v4341_v3 = vpop.eup %3612 }
 0x143   :  { %v4345_v9 = vpop.eup %3614  ;;  %v338_v38 = vmul.f32 0.0, %v4341_v3 }
 0x144   :  { %v339_v18 = vmul.f32 0.0, %v4345_v9 }
 0x15d   :  { %v295_v48 = vpop.permute.xlu0 %294 }
 0x15e   :  { %v300_v50 = vmul.f32 %v4333_v19, %v295_v48 }
 0x160   :  { %304 = vrot.lane.b32.xlu0 %v300_v50, %s4106_s0 }
 0x161   :  { %v297_v21 = vpop.permute.xlu0 %296 }
 0x162   :  { %v301_v54 = vmul.f32 %v4337_v52, %v297_v21  ;;  %v4372_v21 = vld [vmem:[%s5617_s2 + $0x4] ss:$8 sps:$4 sm:$0xff]  }
 0x163   :  { %448 = vmatprep.subr.bf16.mxu1 %v4372_v21  ;;  %1156 = vmatprep.subr.bf16.mxu0 %v4372_v21 }
 0x164   :  { %306 = vrot.lane.b32.xlu1 %v301_v54, %s4106_s0  ;;  %v4377_v54 = vld [vmem:[%s5617_s2] ss:$8 sps:$4 sm:$0xff]  }
 0x165   :  { %449 = vmatpush1.bf16.msra.mxu1 %v4377_v54  ;;  %1157 = vmatpush1.bf16.msra.mxu0 %v4377_v54 }
 0x166   :  { %450 = vmatprep.subr.bf16.mxu1 %v4383_v25  ;;  %1158 = vmatprep.subr.bf16.mxu0 %v4383_v25 }
 0x169   :  { %451 = vmatpush1.bf16.msra.mxu1 %v4390_v56  ;;  %1159 = vmatpush1.bf16.msra.mxu0 %v4390_v56 }
 0x16a   :  { %452 = vmatprep.subr.bf16.mxu1 %v4397_v58  ;;  %1160 = vmatprep.subr.bf16.mxu0 %v4397_v58 }
 0x16d   :  { %453 = vmatpush1.bf16.msra.mxu1 %v4404_v0  ;;  %1161 = vmatpush1.bf16.msra.mxu0 %v4404_v0 }
 0x196   :  { %v343_v5 = vpop.permute.xlu1 %342 }
 0x197   :  { %v348_v7 = vmul.f32 %v4341_v3, %v343_v5 }
 0x199   :  { %352 = vrot.lane.b32.xlu0 %v348_v7, %s4106_s0 }
 0x19a   :  { %v345_v11 = vpop.permute.xlu1 %344 }
 0x19b   :  { %v349_v13 = vmul.f32 %v4345_v9, %v345_v11 }
 0x19d   :  { %354 = vrot.lane.b32.xlu1 %v349_v13, %s4106_s0 }
 0x1d2   :  { %v305_v24 = vpop.permute.xlu0 %304 }
 0x1d3   :  { %v4350_v26 = vadd.f32 %v305_v24, %v290_v20 }
 0x1d5   :  { %3616 = vtanh.f32 %v4350_v26 }
 0x1d6   :  { %v307_v32 = vpop.permute.xlu1 %306 }
 0x1d7   :  { %v4354_v34 = vadd.f32 %v307_v32, %v291_v28 }
 0x1d9   :  { %3618 = vtanh.f32 %v4354_v34 }
 0x1df   :  { %v3617_v36 = vpop.eup %3616 }
 0x1e0   :  { %316 = vrot.lane.b32.xlu0 %v3617_v36, %s4106_s0 }
 0x1e3   :  { %v3619_v37 = vpop.eup %3618 }
 0x1e4   :  { %318 = vrot.lane.b32.xlu1 %v3619_v37, %s4106_s0 }
 0x20b   :  { %v353_v40 = vpop.permute.xlu0 %352 }
 0x20c   :  { %v4360_v42 = vadd.f32 %v353_v40, %v338_v38 }
 0x20e   :  { %3620 = vtanh.f32 %v4360_v42 }
 0x20f   :  { %v355_v44 = vpop.permute.xlu1 %354 }
 0x210   :  { %v4364_v46 = vadd.f32 %v355_v44, %v339_v18 }
 0x212   :  { %3622 = vtanh.f32 %v4364_v46 }
 0x218   :  { %v3621_v48 = vpop.eup %3620 }
 0x219   :  { %364 = vrot.lane.b32.xlu0 %v3621_v48, %s4106_s0 }
 0x21c   :  { %v3623_v50 = vpop.eup %3622 }
 0x21d   :  { %366 = vrot.lane.b32.xlu1 %v3623_v50, %s4106_s0 }
 0x252   :  { %v317_v60 = vpop.permute.xlu0 %316 }
 0x253   :  { %v4408_v5 = vmul.f32 %v4333_v19, %v317_v60  ;;  %v4425_v19 = vld [vmem:[%s5617_s2 + $0x34] ss:$8 sps:$4 sm:$0xff]  }
 0x254   :  { %454 = vmatprep.subr.bf16.mxu1 %v4425_v19  ;;  %1162 = vmatprep.subr.bf16.mxu0 %v4425_v19 }
 0x256   :  { %v319_v62 = vpop.permute.xlu1 %318 }
 0x257   :  { %v4411_v7 = vmul.f32 %v4337_v52, %v319_v62  ;;  %v4430_v52 = vld [vmem:[%s5617_s2 + $0x30] ss:$8 sps:$4 sm:$0xff]   ;;  %s4108_s2 = smov 96  }
 0x258   :  { %455 = vmatpush1.bf16.msra.mxu1 %v4430_v52  ;;  %1163 = vmatpush1.bf16.msra.mxu0 %v4430_v52 }
 0x259   :  { %v3402_v11 = vpack.i.bf16 %v4411_v7, %v4408_v5  ;;  %v391_v13 = vpack.c.bf16 %v4411_v7, %v4408_v5  ;;  %625 = vmatprep.subr.bf16.mxu1 %v4372_v21  ;;  %1510 = vmatprep.subr.bf16.mxu0 %v4372_v21  ;;  %v3568_v5 = vld [vmem:[%s5618_s4] ss:$8 sps:$4 sm:$0xff]   ;;  %v3570_v7 = vld [vmem:[%s5618_s4 + $0x4] ss:$8 sps:$4 sm:$0xff]  }
 0x25b   :  { %3403 = vrot.lane.b32.xlu0 %v3402_v11, %s4107_s28 }
 0x28b   :  { %v365_v20 = vpop.permute.xlu0 %364 }
 0x28c   :  { %v4439_v28 = vmul.f32 %v4341_v3, %v365_v20 }
 0x28f   :  { %v367_v24 = vpop.permute.xlu1 %366 }
 0x290   :  { %v4442_v32 = vmul.f32 %v4345_v9, %v367_v24 }
 0x292   :  { %v3407_v36 = vpack.i.bf16 %v4442_v32, %v4439_v28 }
 0x294   :  { %3408 = vrot.lane.b32.xlu1 %v3407_v36, %s4108_s2 }
 0x2cd   :  { %v3404_v38 = vpop.permute.xlu0 %3403 }
 0x2ce   :  { %v3406_v18 = vunpack.i.h.bf16 %v3404_v38  ;;  %v3405_v44 = vunpack.i.l.bf16 %v3404_v38 }
 0x306   :  { %v3409_v40 = vpop.permute.xlu1 %3408 }
 0x307   :  { %v3411_v48 = vunpack.i.h.bf16 %v3409_v40  ;;  %v3410_v50 = vunpack.i.l.bf16 %v3409_v40 }
 0x309   :  { %v388_v3 = vsel %vm130_vm0, %v3405_v44, %v3410_v50  ;;  %v389_v9 = vsel %vm130_vm0, %v3406_v18, %v3411_v48 }
 0x30a   :  { %v390_v60 = vpack.c.bf16 %v389_v9, %v388_v3 }
 0x30c   :  { %3297 = vmatmul.mubr.msk.bf16.vlgmr.msra.gmra.mrb[0].mxu1 %vm444_vm1, %v390_v60 }
 0x30d   :  { %626 = vmatpush1.bf16.msra.mxu1 %v4377_v54  ;;  %657 = vmatprep.mubr.bf16.mxu1 %v4105_v1 }
 0x30e   :  { %627 = vmatprep.subr.bf16.mxu1 %v4383_v25 }
 0x311   :  { %628 = vmatpush1.bf16.msra.mxu1 %v4390_v56 }
 0x312   :  { %629 = vmatprep.subr.bf16.mxu1 %v4397_v58 }
 0x315   :  { %630 = vmatpush1.bf16.msra.mxu1 %v4404_v0 }
 0x316   :  { %631 = vmatprep.subr.bf16.mxu1 %v4425_v19 }
 0x319   :  { %632 = vmatpush1.bf16.msra.mxu1 %v4430_v52 }
 0x31a   :  { %802 = vmatprep.subr.bf16.mxu1 %v4372_v21 }
 0x3df   :  { %v482_v62 = vpop.f32.mrb[0].mxu1 }
 0x3e0   :  { %v491_v11 = vadd.f32 %v482_v62, %v4248_v29  ;;  %v484_v20 = vpop.f32.mrb[1].mxu1 }
 0x3e1   :  { %v493_v24 = vadd.f32 %v484_v20, %v4313_v10  ;;  %v486_v36 = vpop.f32.mrb[2].mxu1 }
 0x3e2   :  { %3624 = vtanh.f32 %v491_v11  ;;  %v492_v38 = vadd.f32 %v486_v36, %v4254_v33  ;;  %v488_v40 = vpop.f32.mrb[3].mxu1  ;;  %v3298_v10 = vmul.f32 -1.442695, %v491_v11 }
 0x3e3   :  { %v494_v18 = vadd.f32 %v488_v40, %v4319_v16  ;;  %3626 = vtanh.f32 %v493_v24  ;;  %v3300_v33 = vmul.f32 -1.442695, %v493_v24 }
 0x3e4   :  { %3628 = vtanh.f32 %v492_v38  ;;  %v3299_v3 = vmul.f32 -1.442695, %v492_v38 }
 0x3e5   :  { %3630 = vtanh.f32 %v494_v18  ;;  %v3301_v16 = vmul.f32 -1.442695, %v494_v18 }
 0x3e6   :  { %3632 = vpow2.f32 %v3298_v10 }
 0x3e7   :  { %3634 = vpow2.f32 %v3300_v33 }
 0x3e8   :  { %3636 = vpow2.f32 %v3299_v3 }
 0x3e9   :  { %3638 = vpow2.f32 %v3301_v16 }
 0x3ec   :  { %v3625_v44 = vpop.eup %3624 }
 0x3ed   :  { %513 = vrot.lane.b32.xlu0 %v3625_v44, %s4106_s0  ;;  %v3627_v48 = vpop.eup %3626 }
 0x3ee   :  { %v3629_v50 = vpop.eup %3628 }
 0x3ef   :  { %515 = vrot.lane.b32.xlu1 %v3629_v50, %s4106_s0  ;;  %v3631_v29 = vpop.eup %3630 }
 0x3f0   :  { %v3633_v9 = vpop.eup %3632 }
 0x3f1   :  { %561 = vrot.lane.b32.xlu0 %v3627_v48, %s4106_s0  ;;  %v501_v60 = vadd.f32 1.0, %v3633_v9  ;;  %v3635_v62 = vpop.eup %3634 }
 0x3f2   :  { %v3637_v20 = vpop.eup %3636  ;;  %v549_v36 = vadd.f32 1.0, %v3635_v62 }
 0x3f3   :  { %563 = vrot.lane.b32.xlu1 %v3631_v29, %s4106_s0  ;;  %3640 = vrcp.f32 %v501_v60  ;;  %v502_v40 = vadd.f32 1.0, %v3637_v20  ;;  %v3639_v44 = vpop.eup %3638 }
 0x3f4   :  { %3642 = vrcp.f32 %v549_v36  ;;  %v550_v48 = vadd.f32 1.0, %v3639_v44 }
 0x3f5   :  { %3644 = vrcp.f32 %v502_v40 }
 0x3f6   :  { %3646 = vrcp.f32 %v550_v48 }
 0x3fd   :  { %v3641_v11 = vpop.eup %3640 }
 0x3fe   :  { %v3643_v38 = vpop.eup %3642  ;;  %v509_v62 = vmul.f32 %v3641_v11, %v4350_v26 }
 0x3ff   :  { %v3645_v29 = vpop.eup %3644  ;;  %v557_v40 = vmul.f32 %v3643_v38, %v4360_v42 }
 0x400   :  { %v3647_v16 = vpop.eup %3646  ;;  %v510_v44 = vmul.f32 %v3645_v29, %v4354_v34 }
 0x401   :  { %v558_v26 = vmul.f32 %v3647_v16, %v4364_v46 }
 0x45f   :  { %v514_v50 = vpop.permute.xlu0 %513 }
 0x460   :  { %v519_v24 = vmul.f32 %v3641_v11, %v514_v50 }
 0x461   :  { %v516_v10 = vpop.permute.xlu1 %515 }
 0x462   :  { %523 = vrot.lane.b32.xlu0 %v519_v24, %s4106_s0  ;;  %v520_v3 = vmul.f32 %v3645_v29, %v516_v10 }
 0x463   :  { %v562_v18 = vpop.permute.xlu0 %561 }
 0x464   :  { %v567_v33 = vmul.f32 %v3643_v38, %v562_v18  ;;  %525 = vrot.lane.b32.xlu1 %v520_v3, %s4106_s0 }
 0x465   :  { %v564_v9 = vpop.permute.xlu1 %563 }
 0x466   :  { %571 = vrot.lane.b32.xlu0 %v567_v33, %s4106_s0  ;;  %v568_v60 = vmul.f32 %v3647_v16, %v564_v9 }
 0x468   :  { %573 = vrot.lane.b32.xlu1 %v568_v60, %s4106_s0 }
 0x4d4   :  { %v524_v20 = vpop.permute.xlu0 %523 }
 0x4d5   :  { %v4474_v36 = vadd.f32 %v524_v20, %v509_v62 }
 0x4d6   :  { %v526_v50 = vpop.permute.xlu1 %525 }
 0x4d7   :  { %3648 = vtanh.f32 %v4474_v36  ;;  %v4481_v18 = vadd.f32 %v526_v50, %v510_v44 }
 0x4d8   :  { %v572_v48 = vpop.permute.xlu0 %571 }
 0x4d9   :  { %v4479_v24 = vadd.f32 %v572_v48, %v557_v40 }
 0x4da   :  { %v574_v10 = vpop.permute.xlu1 %573 }
 0x4db   :  { %3650 = vtanh.f32 %v4479_v24  ;;  %v4486_v33 = vadd.f32 %v574_v10, %v558_v26 }
 0x4dc   :  { %3652 = vtanh.f32 %v4481_v18 }
 0x4dd   :  { %3654 = vtanh.f32 %v4486_v33 }
 0x4e1   :  { %v3649_v42 = vpop.eup %3648 }
 0x4e2   :  { %535 = vrot.lane.b32.xlu0 %v3649_v42, %s4106_s0 }
 0x4e5   :  { %v3651_v34 = vpop.eup %3650 }
 0x4e6   :  { %v3653_v3 = vpop.eup %3652  ;;  %583 = vrot.lane.b32.xlu0 %v3651_v34, %s4106_s0 }
 0x4e7   :  { %537 = vrot.lane.b32.xlu1 %v3653_v3, %s4106_s0  ;;  %v3655_v9 = vpop.eup %3654 }
 0x4eb   :  { %585 = vrot.lane.b32.xlu1 %v3655_v9, %s4106_s0 }
 0x554   :  { %v536_v60 = vpop.permute.xlu0 %535 }
 0x555   :  { %v4493_v46 = vmul.f32 %v3641_v11, %v536_v60 }
 0x558   :  { %v584_v40 = vpop.permute.xlu0 %583 }
 0x559   :  { %v538_v62 = vpop.permute.xlu1 %537  ;;  %v4501_v26 = vmul.f32 %v3643_v38, %v584_v40 }
 0x55a   :  { %v4495_v20 = vmul.f32 %v3645_v29, %v538_v62 }
 0x55c   :  { %v3412_v44 = vpack.i.bf16 %v4495_v20, %v4493_v46  ;;  %v610_v48 = vpack.c.bf16 %v4495_v20, %v4493_v46  ;;  %v3571_v46 = vld [vmem:[%s5618_s4 + $0x10] ss:$8 sps:$4 sm:$0xff]  }
 0x55d   :  { %v586_v50 = vpop.permute.xlu1 %585 }
 0x55e   :  { %v4503_v10 = vmul.f32 %v3647_v16, %v586_v50  ;;  %3413 = vrot.lane.b32.xlu0 %v3412_v44, %s4107_s28 }
 0x560   :  { %v3417_v11 = vpack.i.bf16 %v4503_v10, %v4501_v26  ;;  %v5627_v20 = vpack.c.bf16 %v4503_v10, %v4501_v26  ;;  %v3579_v26 = vld [vmem:[%s5618_s4 + $0x34] ss:$8 sps:$4 sm:$0xff]  }
 0x562   :  { %3418 = vrot.lane.b32.xlu1 %v3417_v11, %s4108_s2 }
 0x5d0   :  { %v3414_v42 = vpop.permute.xlu0 %3413 }
 0x5d1   :  { %v3416_v3 = vunpack.i.h.bf16 %v3414_v42  ;;  %v3415_v9 = vunpack.i.l.bf16 %v3414_v42 }
 0x5d4   :  { %v3419_v34 = vpop.permute.xlu1 %3418 }
 0x5d5   :  { %v3421_v60 = vunpack.i.h.bf16 %v3419_v34  ;;  %v3420_v62 = vunpack.i.l.bf16 %v3419_v34 }
 0x5d7   :  { %v608_v38 = vsel %vm130_vm0, %v3416_v3, %v3421_v60  ;;  %v607_v16 = vsel %vm130_vm0, %v3415_v9, %v3420_v62 }
 0x5d8   :  { %v609_v40 = vpack.c.bf16 %v608_v38, %v607_v16 }
 0x5da   :  { %3302 = vmatmul.mubr.msk.bf16.vlgmr.msra.gmra.mrb[4].mxu1 %vm444_vm1, %v609_v40 }
 0x5db   :  { %803 = vmatpush1.bf16.msra.mxu1 %v4377_v54  ;;  %834 = vmatprep.mubr.bf16.mxu1 %v4105_v1 }
 0x5dc   :  { %804 = vmatprep.subr.bf16.mxu1 %v4383_v25 }
 0x5df   :  { %805 = vmatpush1.bf16.msra.mxu1 %v4390_v56 }
 0x5e0   :  { %806 = vmatprep.subr.bf16.mxu1 %v4397_v58 }
 0x5e3   :  { %807 = vmatpush1.bf16.msra.mxu1 %v4404_v0 }
 0x5e4   :  { %808 = vmatprep.subr.bf16.mxu1 %v4425_v19 }
 0x5e7   :  { %809 = vmatpush1.bf16.msra.mxu1 %v4430_v52 }
 0x5e8   :  { %979 = vmatprep.subr.bf16.mxu1 %v4372_v21 }
 0x6ad   :  { %v659_v44 = vpop.f32.mrb[4].mxu1 }
 0x6ae   :  { %v668_v50 = vadd.f32 %v659_v44, %v4261_v39  ;;  %v661_v11 = vpop.f32.mrb[5].mxu1 }
 0x6af   :  { %v670_v42 = vadd.f32 %v661_v11, %v4301_v2  ;;  %v663_v34 = vpop.f32.mrb[6].mxu1 }
 0x6b0   :  { %3656 = vtanh.f32 %v668_v50  ;;  %v669_v3 = vadd.f32 %v663_v34, %v4268_v43  ;;  %v665_v9 = vpop.f32.mrb[7].mxu1  ;;  %v3303_v2 = vmul.f32 -1.442695, %v668_v50 }
 0x6b1   :  { %v671_v60 = vadd.f32 %v665_v9, %v4307_v6  ;;  %3658 = vtanh.f32 %v670_v42  ;;  %v3305_v43 = vmul.f32 -1.442695, %v670_v42 }
 0x6b2   :  { %3660 = vtanh.f32 %v669_v3  ;;  %v3304_v40 = vmul.f32 -1.442695, %v669_v3 }
 0x6b3   :  { %3662 = vtanh.f32 %v671_v60  ;;  %v3306_v6 = vmul.f32 -1.442695, %v671_v60 }
 0x6b4   :  { %3664 = vpow2.f32 %v3303_v2 }
 0x6b5   :  { %3666 = vpow2.f32 %v3305_v43 }
 0x6b6   :  { %3668 = vpow2.f32 %v3304_v40 }
 0x6b7   :  { %3670 = vpow2.f32 %v3306_v6 }
 0x6ba   :  { %v3657_v62 = vpop.eup %3656 }
 0x6bb   :  { %690 = vrot.lane.b32.xlu0 %v3657_v62, %s4106_s0  ;;  %v3659_v38 = vpop.eup %3658 }
 0x6bc   :  { %v3661_v16 = vpop.eup %3660 }
 0x6bd   :  { %692 = vrot.lane.b32.xlu1 %v3661_v16, %s4106_s0  ;;  %v3663_v39 = vpop.eup %3662 }
 0x6be   :  { %v3665_v44 = vpop.eup %3664 }
 0x6bf   :  { %738 = vrot.lane.b32.xlu0 %v3659_v38, %s4106_s0  ;;  %v678_v11 = vadd.f32 1.0, %v3665_v44  ;;  %v3667_v34 = vpop.eup %3666 }
 0x6c0   :  { %v3669_v9 = vpop.eup %3668  ;;  %v726_v62 = vadd.f32 1.0, %v3667_v34 }
 0x6c1   :  { %740 = vrot.lane.b32.xlu1 %v3663_v39, %s4106_s0  ;;  %3672 = vrcp.f32 %v678_v11  ;;  %v679_v38 = vadd.f32 1.0, %v3669_v9  ;;  %v3671_v17 = vpop.eup %3670 }
 0x6c2   :  { %3674 = vrcp.f32 %v726_v62  ;;  %v727_v16 = vadd.f32 1.0, %v3671_v17 }
 0x6c3   :  { %3676 = vrcp.f32 %v679_v38 }
 0x6c4   :  { %3678 = vrcp.f32 %v727_v16 }
 0x6cb   :  { %v3673_v50 = vpop.eup %3672 }
 0x6cc   :  { %v3675_v3 = vpop.eup %3674  ;;  %v686_v17 = vmul.f32 %v3673_v50, %v4474_v36 }
 0x6cd   :  { %v3677_v2 = vpop.eup %3676  ;;  %v734_v38 = vmul.f32 %v3675_v3, %v4479_v24 }
 0x6ce   :  { %v3679_v44 = vpop.eup %3678  ;;  %v687_v16 = vmul.f32 %v3677_v2, %v4481_v18 }
 0x6cf   :  { %v735_v36 = vmul.f32 %v3679_v44, %v4486_v33 }
 0x72d   :  { %v691_v39 = vpop.permute.xlu0 %690 }
 0x72e   :  { %v696_v42 = vmul.f32 %v3673_v50, %v691_v39 }
 0x72f   :  { %v693_v43 = vpop.permute.xlu1 %692 }
 0x730   :  { %700 = vrot.lane.b32.xlu0 %v696_v42, %s4106_s0  ;;  %v697_v6 = vmul.f32 %v3677_v2, %v693_v43 }
 0x731   :  { %v739_v60 = vpop.permute.xlu0 %738 }
 0x732   :  { %v744_v40 = vmul.f32 %v3675_v3, %v739_v60  ;;  %702 = vrot.lane.b32.xlu1 %v697_v6, %s4106_s0 }
 0x733   :  { %v741_v11 = vpop.permute.xlu1 %740 }
 0x734   :  { %748 = vrot.lane.b32.xlu0 %v744_v40, %s4106_s0  ;;  %v745_v34 = vmul.f32 %v3679_v44, %v741_v11 }
 0x736   :  { %750 = vrot.lane.b32.xlu1 %v745_v34, %s4106_s0 }
 0x7a2   :  { %v701_v9 = vpop.permute.xlu0 %700 }
 0x7a3   :  { %v4536_v62 = vadd.f32 %v701_v9, %v686_v17 }
 0x7a4   :  { %v703_v42 = vpop.permute.xlu1 %702 }
 0x7a5   :  { %3680 = vtanh.f32 %v4536_v62  ;;  %v4543_v43 = vadd.f32 %v703_v42, %v687_v16 }
 0x7a6   :  { %v749_v39 = vpop.permute.xlu0 %748 }
 0x7a7   :  { %v4541_v60 = vadd.f32 %v749_v39, %v734_v38 }
 0x7a8   :  { %v751_v40 = vpop.permute.xlu1 %750 }
 0x7a9   :  { %3682 = vtanh.f32 %v4541_v60  ;;  %v4548_v6 = vadd.f32 %v751_v40, %v735_v36 }
 0x7aa   :  { %3684 = vtanh.f32 %v4543_v43 }
 0x7ab   :  { %3686 = vtanh.f32 %v4548_v6 }
 0x7af   :  { %v3681_v24 = vpop.eup %3680 }
 0x7b0   :  { %712 = vrot.lane.b32.xlu0 %v3681_v24, %s4106_s0 }
 0x7b3   :  { %v3683_v18 = vpop.eup %3682 }
 0x7b4   :  { %v3685_v11 = vpop.eup %3684  ;;  %760 = vrot.lane.b32.xlu0 %v3683_v18, %s4106_s0 }
 0x7b5   :  { %714 = vrot.lane.b32.xlu1 %v3685_v11, %s4106_s0  ;;  %v3687_v34 = vpop.eup %3686 }
 0x7b9   :  { %762 = vrot.lane.b32.xlu1 %v3687_v34, %s4106_s0 }
 0x822   :  { %v713_v17 = vpop.permute.xlu0 %712 }
 0x823   :  { %v4555_v33 = vmul.f32 %v3673_v50, %v713_v17 }
 0x826   :  { %v761_v16 = vpop.permute.xlu0 %760 }
 0x827   :  { %v715_v9 = vpop.permute.xlu1 %714  ;;  %v4563_v40 = vmul.f32 %v3675_v3, %v761_v16 }
 0x828   :  { %v4557_v38 = vmul.f32 %v3677_v2, %v715_v9 }
 0x82a   :  { %v3422_v39 = vpack.i.bf16 %v4557_v38, %v4555_v33  ;;  %v787_v42 = vpack.c.bf16 %v4557_v38, %v4555_v33  ;;  %v3576_v33 = vld [vmem:[%s5618_s4 + $0x24] ss:$8 sps:$4 sm:$0xff]   ;;  %v3574_v38 = vld [vmem:[%s5618_s4 + $0x20] ss:$8 sps:$4 sm:$0xff]  }
 0x82b   :  { %v763_v36 = vpop.permute.xlu1 %762 }
 0x82c   :  { %v4565_v24 = vmul.f32 %v3679_v44, %v763_v36  ;;  %3423 = vrot.lane.b32.xlu0 %v3422_v39, %s4107_s28 }
 0x82e   :  { %v3427_v50 = vpack.i.bf16 %v4565_v24, %v4563_v40  ;;  %v793_v2 = vpack.c.bf16 %v4565_v24, %v4563_v40 }
 0x830   :  { %3428 = vrot.lane.b32.xlu1 %v3427_v50, %s4108_s2 }
 0x89e   :  { %v3424_v18 = vpop.permute.xlu0 %3423 }
 0x89f   :  { %v3426_v34 = vunpack.i.h.bf16 %v3424_v18  ;;  %v3425_v17 = vunpack.i.l.bf16 %v3424_v18 }
 0x8a2   :  { %v3429_v11 = vpop.permute.xlu1 %3428 }
 0x8a3   :  { %v3431_v9 = vunpack.i.h.bf16 %v3429_v11  ;;  %v3430_v15 = vunpack.i.l.bf16 %v3429_v11 }
 0x8a5   :  { %v785_v3 = vsel %vm130_vm0, %v3426_v34, %v3431_v9  ;;  %v784_v44 = vsel %vm130_vm0, %v3425_v17, %v3430_v15 }
 0x8a6   :  { %v786_v16 = vpack.c.bf16 %v785_v3, %v784_v44 }
 0x8a8   :  { %3307 = vmatmul.mubr.msk.bf16.vlgmr.msra.gmra.mrb[8].mxu1 %vm444_vm1, %v786_v16 }
 0x8a9   :  { %980 = vmatpush1.bf16.msra.mxu1 %v4377_v54  ;;  %1011 = vmatprep.mubr.bf16.mxu1 %v4105_v1 }
 0x8aa   :  { %981 = vmatprep.subr.bf16.mxu1 %v4383_v25 }
 0x8ad   :  { %982 = vmatpush1.bf16.msra.mxu1 %v4390_v56 }
 0x8ae   :  { %983 = vmatprep.subr.bf16.mxu1 %v4397_v58 }
 0x8b1   :  { %984 = vmatpush1.bf16.msra.mxu1 %v4404_v0 }
 0x8b2   :  { %985 = vmatprep.subr.bf16.mxu1 %v4425_v19 }
 0x8b5   :  { %986 = vmatpush1.bf16.msra.mxu1 %v4430_v52 }
 0x8b6   :  { %1333 = vmatprep.subr.bf16.mxu1 %v4372_v21 }
 0x97b   :  { %v836_v15 = vpop.f32.mrb[8].mxu1 }
 0x97c   :  { %v845_v39 = vadd.f32 %v836_v15, %v4274_v47  ;;  %v838_v36 = vpop.f32.mrb[9].mxu1 }
 0x97d   :  { %v847_v50 = vadd.f32 %v838_v36, %v4289_v57  ;;  %v840_v18 = vpop.f32.mrb[10].mxu1 }
 0x97e   :  { %3688 = vtanh.f32 %v845_v39  ;;  %v846_v11 = vadd.f32 %v840_v18, %v4280_v51  ;;  %v842_v34 = vpop.f32.mrb[11].mxu1  ;;  %v3308_v57 = vmul.f32 -1.442695, %v845_v39 }
 0x97f   :  { %v848_v17 = vadd.f32 %v842_v34, %v4295_v61  ;;  %3690 = vtanh.f32 %v847_v50  ;;  %v3310_v51 = vmul.f32 -1.442695, %v847_v50 }
 0x980   :  { %3692 = vtanh.f32 %v846_v11  ;;  %v3309_v44 = vmul.f32 -1.442695, %v846_v11 }
 0x981   :  { %3694 = vtanh.f32 %v848_v17  ;;  %v3311_v61 = vmul.f32 -1.442695, %v848_v17 }
 0x982   :  { %3696 = vpow2.f32 %v3308_v57 }
 0x983   :  { %3698 = vpow2.f32 %v3310_v51 }
 0x984   :  { %3700 = vpow2.f32 %v3309_v44 }
 0x985   :  { %3702 = vpow2.f32 %v3311_v61 }
 0x988   :  { %v3689_v9 = vpop.eup %3688 }
 0x989   :  { %867 = vrot.lane.b32.xlu0 %v3689_v9, %s4106_s0  ;;  %v3691_v21 = vpop.eup %3690 }
 0x98a   :  { %v3693_v3 = vpop.eup %3692 }
 0x98b   :  { %869 = vrot.lane.b32.xlu1 %v3693_v3, %s4106_s0  ;;  %v3695_v47 = vpop.eup %3694 }
 0x98c   :  { %v3697_v16 = vpop.eup %3696 }
 0x98d   :  { %915 = vrot.lane.b32.xlu0 %v3691_v21, %s4106_s0  ;;  %v855_v15 = vadd.f32 1.0, %v3697_v16  ;;  %v3699_v36 = vpop.eup %3698 }
 0x98e   :  { %v3701_v18 = vpop.eup %3700  ;;  %v903_v34 = vadd.f32 1.0, %v3699_v36 }
 0x98f   :  { %917 = vrot.lane.b32.xlu1 %v3695_v47, %s4106_s0  ;;  %3704 = vrcp.f32 %v855_v15  ;;  %v856_v9 = vadd.f32 1.0, %v3701_v18  ;;  %v3703_v21 = vpop.eup %3702 }
 0x990   :  { %3706 = vrcp.f32 %v903_v34  ;;  %v904_v3 = vadd.f32 1.0, %v3703_v21 }
 0x991   :  { %3708 = vrcp.f32 %v856_v9 }
 0x992   :  { %3710 = vrcp.f32 %v904_v3 }
 0x999   :  { %v3705_v39 = vpop.eup %3704 }
 0x99a   :  { %v3707_v11 = vpop.eup %3706  ;;  %v863_v18 = vmul.f32 %v3705_v39, %v4536_v62 }
 0x99b   :  { %v3709_v57 = vpop.eup %3708  ;;  %v911_v21 = vmul.f32 %v3707_v11, %v4541_v60 }
 0x99c   :  { %v3711_v16 = vpop.eup %3710  ;;  %v864_v3 = vmul.f32 %v3709_v57, %v4543_v43 }
 0x99d   :  { %v912_v62 = vmul.f32 %v3711_v16, %v4548_v6 }
 0x9fb   :  { %v868_v47 = vpop.permute.xlu0 %867 }
 0x9fc   :  { %v873_v50 = vmul.f32 %v3705_v39, %v868_v47 }
 0x9fd   :  { %v870_v51 = vpop.permute.xlu1 %869 }
 0x9fe   :  { %877 = vrot.lane.b32.xlu0 %v873_v50, %s4106_s0  ;;  %v874_v61 = vmul.f32 %v3709_v57, %v870_v51 }
 0x9ff   :  { %v916_v17 = vpop.permute.xlu0 %915 }
 0xa00   :  { %v921_v44 = vmul.f32 %v3707_v11, %v916_v17  ;;  %879 = vrot.lane.b32.xlu1 %v874_v61, %s4106_s0 }
 0xa01   :  { %v918_v15 = vpop.permute.xlu1 %917 }
 0xa02   :  { %925 = vrot.lane.b32.xlu0 %v921_v44, %s4106_s0  ;;  %v922_v36 = vmul.f32 %v3711_v16, %v918_v15 }
 0xa04   :  { %927 = vrot.lane.b32.xlu1 %v922_v36, %s4106_s0 }
 0xa70   :  { %v878_v34 = vpop.permute.xlu0 %877 }
 0xa71   :  { %v4598_v9 = vadd.f32 %v878_v34, %v863_v18 }
 0xa72   :  { %v880_v50 = vpop.permute.xlu1 %879 }
 0xa73   :  { %3712 = vtanh.f32 %v4598_v9  ;;  %v4605_v51 = vadd.f32 %v880_v50, %v864_v3 }
 0xa74   :  { %v926_v47 = vpop.permute.xlu0 %925 }
 0xa75   :  { %v4603_v17 = vadd.f32 %v926_v47, %v911_v21 }
 0xa76   :  { %v928_v44 = vpop.permute.xlu1 %927 }
 0xa77   :  { %3714 = vtanh.f32 %v4603_v17  ;;  %v4610_v61 = vadd.f32 %v928_v44, %v912_v62 }
 0xa78   :  { %3716 = vtanh.f32 %v4605_v51 }
 0xa79   :  { %3718 = vtanh.f32 %v4610_v61 }
 0xa7d   :  { %v3713_v60 = vpop.eup %3712 }
 0xa7e   :  { %889 = vrot.lane.b32.xlu0 %v3713_v60, %s4106_s0 }
 0xa81   :  { %v3715_v43 = vpop.eup %3714 }
 0xa82   :  { %v3717_v15 = vpop.eup %3716  ;;  %937 = vrot.lane.b32.xlu0 %v3715_v43, %s4106_s0 }
 0xa83   :  { %891 = vrot.lane.b32.xlu1 %v3717_v15, %s4106_s0  ;;  %v3719_v36 = vpop.eup %3718 }
 0xa87   :  { %939 = vrot.lane.b32.xlu1 %v3719_v36, %s4106_s0 }
 0xaf0   :  { %v890_v18 = vpop.permute.xlu0 %889 }
 0xaf1   :  { %v4617_v6 = vmul.f32 %v3705_v39, %v890_v18 }
 0xaf4   :  { %v938_v3 = vpop.permute.xlu0 %937 }
 0xaf5   :  { %v892_v34 = vpop.permute.xlu1 %891  ;;  %v4625_v44 = vmul.f32 %v3707_v11, %v938_v3 }
 0xaf6   :  { %v4619_v21 = vmul.f32 %v3709_v57, %v892_v34 }
 0xaf8   :  { %v3432_v47 = vpack.i.bf16 %v4619_v21, %v4617_v6  ;;  %v964_v50 = vpack.c.bf16 %v4619_v21, %v4617_v6 }
 0xaf9   :  { %v940_v62 = vpop.permute.xlu1 %939 }
 0xafa   :  { %v4627_v60 = vmul.f32 %v3711_v16, %v940_v62  ;;  %3433 = vrot.lane.b32.xlu0 %v3432_v47, %s4107_s28 }
 0xafc   :  { %v3437_v39 = vpack.i.bf16 %v4627_v60, %v4625_v44  ;;  %v970_v57 = vpack.c.bf16 %v4627_v60, %v4625_v44 }
 0xafe   :  { %3438 = vrot.lane.b32.xlu1 %v3437_v39, %s4108_s2 }
 0xb6c   :  { %v3434_v43 = vpop.permute.xlu0 %3433 }
 0xb6d   :  { %v3436_v36 = vunpack.i.h.bf16 %v3434_v43  ;;  %v3435_v18 = vunpack.i.l.bf16 %v3434_v43 }
 0xb70   :  { %v3439_v15 = vpop.permute.xlu1 %3438 }
 0xb71   :  { %v3441_v34 = vunpack.i.h.bf16 %v3439_v15  ;;  %v3440_v37 = vunpack.i.l.bf16 %v3439_v15 }
 0xb73   :  { %v962_v11 = vsel %vm130_vm0, %v3436_v36, %v3441_v34  ;;  %v961_v16 = vsel %vm130_vm0, %v3435_v18, %v3440_v37 }
 0xb74   :  { %v963_v3 = vpack.c.bf16 %v962_v11, %v961_v16 }
 0xb76   :  { %3312 = vmatmul.mubr.msk.bf16.vlgmr.msra.gmra.mrb[12].mxu1 %vm444_vm1, %v963_v3 }
 0xb77   :  { %1334 = vmatpush1.bf16.msra.mxu1 %v4377_v54  ;;  %1365 = vmatprep.mubr.bf16.mxu1 %v4105_v1 }
 0xb78   :  { %1335 = vmatprep.subr.bf16.mxu1 %v4383_v25 }
 0xb7b   :  { %1336 = vmatpush1.bf16.msra.mxu1 %v4390_v56 }
 0xb7c   :  { %1337 = vmatprep.subr.bf16.mxu1 %v4397_v58 }
 0xb7f   :  { %1338 = vmatpush1.bf16.msra.mxu1 %v4404_v0 }
 0xb80   :  { %1339 = vmatprep.subr.bf16.mxu1 %v4425_v19 }
 0xb83   :  { %1340 = vmatpush1.bf16.msra.mxu1 %v4430_v52 }
 0xb84   :  { %1757 = vmatprep.subr.bf16.mxu1 %v3570_v7 }
 0xc49   :  { %v1013_v37 = vpop.f32.mrb[12].mxu1 }
 0xc4a   :  { %v1022_v47 = vadd.f32 %v1013_v37, %v4286_v55  ;;  %v1015_v62 = vpop.f32.mrb[13].mxu1 }
 0xc4b   :  { %v1024_v39 = vadd.f32 %v1015_v62, %v4277_v49  ;;  %v1017_v43 = vpop.f32.mrb[14].mxu1 }
 0xc4c   :  { %3720 = vtanh.f32 %v1022_v47  ;;  %v1023_v15 = vadd.f32 %v1017_v43, %v4292_v59  ;;  %v1019_v36 = vpop.f32.mrb[15].mxu1  ;;  %v3313_v55 = vmul.f32 -1.442695, %v1022_v47 }
 0xc4d   :  { %v1025_v18 = vadd.f32 %v1019_v36, %v4283_v53  ;;  %3722 = vtanh.f32 %v1024_v39  ;;  %v3315_v59 = vmul.f32 -1.442695, %v1024_v39 }
 0xc4e   :  { %3724 = vtanh.f32 %v1023_v15  ;;  %v3314_v3 = vmul.f32 -1.442695, %v1023_v15 }
 0xc4f   :  { %3726 = vtanh.f32 %v1025_v18  ;;  %v3316_v53 = vmul.f32 -1.442695, %v1025_v18 }
 0xc50   :  { %3728 = vpow2.f32 %v3313_v55 }
 0xc51   :  { %3730 = vpow2.f32 %v3315_v59 }
 0xc52   :  { %3732 = vpow2.f32 %v3314_v3 }
 0xc53   :  { %3734 = vpow2.f32 %v3316_v53 }
 0xc56   :  { %v3721_v34 = vpop.eup %3720 }
 0xc57   :  { %1044 = vrot.lane.b32.xlu0 %v3721_v34, %s4106_s0  ;;  %v3723_v11 = vpop.eup %3722 }
 0xc58   :  { %v3725_v16 = vpop.eup %3724 }
 0xc59   :  { %1046 = vrot.lane.b32.xlu1 %v3725_v16, %s4106_s0  ;;  %v3727_v49 = vpop.eup %3726 }
 0xc5a   :  { %v3729_v37 = vpop.eup %3728 }
 0xc5b   :  { %1092 = vrot.lane.b32.xlu0 %v3723_v11, %s4106_s0  ;;  %v1032_v62 = vadd.f32 1.0, %v3729_v37  ;;  %v3731_v43 = vpop.eup %3730 }
 0xc5c   :  { %v3733_v36 = vpop.eup %3732  ;;  %v1080_v34 = vadd.f32 1.0, %v3731_v43 }
 0xc5d   :  { %1094 = vrot.lane.b32.xlu1 %v3727_v49, %s4106_s0  ;;  %3736 = vrcp.f32 %v1032_v62  ;;  %v1033_v11 = vadd.f32 1.0, %v3733_v36  ;;  %v3735_v29 = vpop.eup %3734 }
 0xc5e   :  { %3738 = vrcp.f32 %v1080_v34  ;;  %v1081_v16 = vadd.f32 1.0, %v3735_v29 }
 0xc5f   :  { %3740 = vrcp.f32 %v1033_v11 }
 0xc60   :  { %3742 = vrcp.f32 %v1081_v16 }
 0xc67   :  { %v3737_v47 = vpop.eup %3736 }
 0xc68   :  { %v3739_v15 = vpop.eup %3738  ;;  %v1040_v29 = vmul.f32 %v3737_v47, %v4598_v9 }
 0xc69   :  { %v3741_v55 = vpop.eup %3740  ;;  %v1088_v11 = vmul.f32 %v3739_v15, %v4603_v17 }
 0xc6a   :  { %v3743_v37 = vpop.eup %3742  ;;  %v1041_v16 = vmul.f32 %v3741_v55, %v4605_v51 }
 0xc6b   :  { %v1089_v9 = vmul.f32 %v3743_v37, %v4610_v61 }
 0xcc9   :  { %v1045_v49 = vpop.permute.xlu0 %1044 }
 0xcca   :  { %v1050_v39 = vmul.f32 %v3737_v47, %v1045_v49 }
 0xccb   :  { %v1047_v59 = vpop.permute.xlu1 %1046 }
 0xccc   :  { %1054 = vrot.lane.b32.xlu0 %v1050_v39, %s4106_s0  ;;  %v1051_v53 = vmul.f32 %v3741_v55, %v1047_v59 }
 0xccd   :  { %v1093_v18 = vpop.permute.xlu0 %1092 }
 0xcce   :  { %v1098_v3 = vmul.f32 %v3739_v15, %v1093_v18  ;;  %1056 = vrot.lane.b32.xlu1 %v1051_v53, %s4106_s0 }
 0xccf   :  { %v1095_v62 = vpop.permute.xlu1 %1094 }
 0xcd0   :  { %1102 = vrot.lane.b32.xlu0 %v1098_v3, %s4106_s0  ;;  %v1099_v43 = vmul.f32 %v3743_v37, %v1095_v62 }
 0xcd2   :  { %1104 = vrot.lane.b32.xlu1 %v1099_v43, %s4106_s0 }
 0xd3e   :  { %v1055_v36 = vpop.permute.xlu0 %1054 }
 0xd3f   :  { %v4659_v34 = vadd.f32 %v1055_v36, %v1040_v29 }
 0xd40   :  { %v1057_v39 = vpop.permute.xlu1 %1056 }
 0xd41   :  { %3744 = vtanh.f32 %v4659_v34  ;;  %v4666_v59 = vadd.f32 %v1057_v39, %v1041_v16 }
 0xd42   :  { %v1103_v49 = vpop.permute.xlu0 %1102 }
 0xd43   :  { %v4664_v18 = vadd.f32 %v1103_v49, %v1088_v11 }
 0xd44   :  { %v1105_v3 = vpop.permute.xlu1 %1104 }
 0xd45   :  { %3746 = vtanh.f32 %v4664_v18  ;;  %v4671_v53 = vadd.f32 %v1105_v3, %v1089_v9 }
 0xd46   :  { %3748 = vtanh.f32 %v4666_v59 }
 0xd47   :  { %3750 = vtanh.f32 %v4671_v53 }
 0xd4b   :  { %v3745_v17 = vpop.eup %3744 }
 0xd4c   :  { %1066 = vrot.lane.b32.xlu0 %v3745_v17, %s4106_s0 }
 0xd4f   :  { %v3747_v51 = vpop.eup %3746 }
 0xd50   :  { %v3749_v62 = vpop.eup %3748  ;;  %1114 = vrot.lane.b32.xlu0 %v3747_v51, %s4106_s0 }
 0xd51   :  { %1068 = vrot.lane.b32.xlu1 %v3749_v62, %s4106_s0  ;;  %v3751_v43 = vpop.eup %3750 }
 0xd55   :  { %1116 = vrot.lane.b32.xlu1 %v3751_v43, %s4106_s0 }
 0xdbe   :  { %v1067_v29 = vpop.permute.xlu0 %1066 }
 0xdbf   :  { %v4678_v61 = vmul.f32 %v3737_v47, %v1067_v29 }
 0xdc2   :  { %v1115_v16 = vpop.permute.xlu0 %1114 }
 0xdc3   :  { %v1069_v36 = vpop.permute.xlu1 %1068  ;;  %v4686_v3 = vmul.f32 %v3739_v15, %v1115_v16 }
 0xdc4   :  { %v4680_v11 = vmul.f32 %v3741_v55, %v1069_v36 }
 0xdc6   :  { %v3442_v49 = vpack.i.bf16 %v4680_v11, %v4678_v61 }
 0xdc7   :  { %v1117_v9 = vpop.permute.xlu1 %1116 }
 0xdc8   :  { %v4688_v17 = vmul.f32 %v3743_v37, %v1117_v9  ;;  %3443 = vrot.lane.b32.xlu0 %v3442_v49, %s4107_s28 }
 0xdca   :  { %v3447_v47 = vpack.i.bf16 %v4688_v17, %v4686_v3  ;;  %v1147_v55 = vpack.c.bf16 %v4688_v17, %v4686_v3 }
 0xdcc   :  { %3448 = vrot.lane.b32.xlu1 %v3447_v47, %s4108_s2 }
 0xe3a   :  { %v3444_v51 = vpop.permute.xlu0 %3443 }
 0xe3b   :  { %v3446_v43 = vunpack.i.h.bf16 %v3444_v51  ;;  %v3445_v29 = vunpack.i.l.bf16 %v3444_v51 }
 0xe3e   :  { %v3449_v62 = vpop.permute.xlu1 %3448 }
 0xe3f   :  { %v3451_v36 = vunpack.i.h.bf16 %v3449_v62  ;;  %v3450_v39 = vunpack.i.l.bf16 %v3449_v62 }
 0xe41   :  { %v1139_v15 = vsel %vm130_vm0, %v3446_v43, %v3451_v36  ;;  %v1138_v37 = vsel %vm130_vm0, %v3445_v29, %v3450_v39 }
 0xe42   :  { %v1140_v16 = vpack.c.bf16 %v1139_v15, %v1138_v37 }
 0xe44   :  { %3317 = vmatmul.mubr.msk.bf16.vlgmr.msra.gmra.mrb[32].mxu0 %vm444_vm1, %v1140_v16 }
 0xe45   :  { %1511 = vmatpush1.bf16.msra.mxu0 %v4377_v54  ;;  %1542 = vmatprep.mubr.bf16.mxu0 %v4105_v1 }
 0xe46   :  { %1512 = vmatprep.subr.bf16.mxu0 %v4383_v25 }
 0xe49   :  { %1513 = vmatpush1.bf16.msra.mxu0 %v4390_v56 }
 0xe4a   :  { %1514 = vmatprep.subr.bf16.mxu0 %v4397_v58 }
 0xe4d   :  { %1515 = vmatpush1.bf16.msra.mxu0 %v4404_v0 }
 0xe4e   :  { %1516 = vmatprep.subr.bf16.mxu0 %v4425_v19 }
 0xe51   :  { %1517 = vmatpush1.bf16.msra.mxu0 %v4430_v52 }
 0xf17   :  { %v1190_v49 = vpop.f32.mrb[32].mxu0 }
 0xf18   :  { %v1199_v39 = vadd.f32 %v1190_v49, %v4298_v63  ;;  %v1192_v9 = vpop.f32.mrb[33].mxu0 }
 0xf19   :  { %v1201_v54 = vadd.f32 %v1192_v9, %v4264_v41  ;;  %v1194_v47 = vpop.f32.mrb[34].mxu0 }
 0xf1a   :  { %3752 = vtanh.f32 %v1199_v39  ;;  %v1200_v25 = vadd.f32 %v1194_v47, %v4304_v4  ;;  %v1196_v51 = vpop.f32.mrb[35].mxu0  ;;  %v3318_v63 = vmul.f32 -1.442695, %v1199_v39 }
 0xf1b   :  { %v1202_v56 = vadd.f32 %v1196_v51, %v4271_v45  ;;  %3754 = vtanh.f32 %v1201_v54  ;;  %v3320_v4 = vmul.f32 -1.442695, %v1201_v54 }
 0xf1c   :  { %3756 = vtanh.f32 %v1200_v25  ;;  %v3319_v52 = vmul.f32 -1.442695, %v1200_v25 }
 0xf1d   :  { %3758 = vtanh.f32 %v1202_v56  ;;  %v3321_v45 = vmul.f32 -1.442695, %v1202_v56 }
 0xf1e   :  { %3760 = vpow2.f32 %v3318_v63 }
 0xf1f   :  { %3762 = vpow2.f32 %v3320_v4 }
 0xf20   :  { %3764 = vpow2.f32 %v3319_v52 }
 0xf21   :  { %3766 = vpow2.f32 %v3321_v45 }
 0xf24   :  { %v3753_v58 = vpop.eup %3752 }
 0xf25   :  { %1221 = vrot.lane.b32.xlu0 %v3753_v58, %s4106_s0  ;;  %v3755_v0 = vpop.eup %3754 }
 0xf26   :  { %v3757_v19 = vpop.eup %3756 }
 0xf27   :  { %1223 = vrot.lane.b32.xlu1 %v3757_v19, %s4106_s0  ;;  %v3759_v41 = vpop.eup %3758 }
 0xf28   :  { %v3761_v62 = vpop.eup %3760 }
 0xf29   :  { %1269 = vrot.lane.b32.xlu0 %v3755_v0, %s4106_s0  ;;  %v1209_v43 = vadd.f32 1.0, %v3761_v62  ;;  %v3763_v29 = vpop.eup %3762 }
 0xf2a   :  { %v3765_v36 = vpop.eup %3764  ;;  %v1257_v15 = vadd.f32 1.0, %v3763_v29 }
 0xf2b   :  { %1271 = vrot.lane.b32.xlu1 %v3759_v41, %s4106_s0  ;;  %3768 = vrcp.f32 %v1209_v43  ;;  %v1210_v37 = vadd.f32 1.0, %v3765_v36  ;;  %v3767_v16 = vpop.eup %3766 }
 0xf2c   :  { %3770 = vrcp.f32 %v1257_v15  ;;  %v1258_v49 = vadd.f32 1.0, %v3767_v16 }
 0xf2d   :  { %3772 = vrcp.f32 %v1210_v37 }
 0xf2e   :  { %3774 = vrcp.f32 %v1258_v49 }
 0xf35   :  { %v3769_v39 = vpop.eup %3768 }
 0xf36   :  { %v3771_v47 = vpop.eup %3770  ;;  %v1217_v4 = vmul.f32 %v3769_v39, %v4659_v34 }
 0xf37   :  { %v3773_v51 = vpop.eup %3772  ;;  %v1265_v62 = vmul.f32 %v3771_v47, %v4664_v18 }
 0xf38   :  { %v3775_v19 = vpop.eup %3774  ;;  %v1218_v43 = vmul.f32 %v3773_v51, %v4666_v59 }
 0xf39   :  { %v1266_v34 = vmul.f32 %v3775_v19, %v4671_v53 }
 0xf97   :  { %v1222_v9 = vpop.permute.xlu0 %1221 }
 0xf98   :  { %v1227_v54 = vmul.f32 %v3769_v39, %v1222_v9 }
 0xf99   :  { %v1224_v56 = vpop.permute.xlu1 %1223 }
 0xf9a   :  { %1231 = vrot.lane.b32.xlu0 %v1227_v54, %s4106_s0  ;;  %v1228_v0 = vmul.f32 %v3773_v51, %v1224_v56 }
 0xf9b   :  { %v1270_v25 = vpop.permute.xlu0 %1269 }
 0xf9c   :  { %v1275_v58 = vmul.f32 %v3771_v47, %v1270_v25  ;;  %1233 = vrot.lane.b32.xlu1 %v1228_v0, %s4106_s0 }
 0xf9d   :  { %v1272_v41 = vpop.permute.xlu1 %1271 }
 0xf9e   :  { %1279 = vrot.lane.b32.xlu0 %v1275_v58, %s4106_s0  ;;  %v1276_v63 = vmul.f32 %v3775_v19, %v1272_v41 }
 0xfa0   :  { %1281 = vrot.lane.b32.xlu1 %v1276_v63, %s4106_s0 }
0x100c   :  { %v1232_v52 = vpop.permute.xlu0 %1231 }
0x100d   :  { %v4720_v45 = vadd.f32 %v1232_v52, %v1217_v4 }
0x100e   :  { %v1234_v36 = vpop.permute.xlu1 %1233 }
0x100f   :  { %3776 = vtanh.f32 %v4720_v45  ;;  %v4727_v37 = vadd.f32 %v1234_v36, %v1218_v43 }
0x1010   :  { %v1280_v29 = vpop.permute.xlu0 %1279 }
0x1011   :  { %v4725_v15 = vadd.f32 %v1280_v29, %v1265_v62 }
0x1012   :  { %v1282_v16 = vpop.permute.xlu1 %1281 }
0x1013   :  { %3778 = vtanh.f32 %v4725_v15  ;;  %v4732_v49 = vadd.f32 %v1282_v16, %v1266_v34 }
0x1014   :  { %3780 = vtanh.f32 %v4727_v37 }
0x1015   :  { %3782 = vtanh.f32 %v4732_v49 }
0x1019   :  { %v3777_v18 = vpop.eup %3776 }
0x101a   :  { %1243 = vrot.lane.b32.xlu0 %v3777_v18, %s4106_s0 }
0x101d   :  { %v3779_v59 = vpop.eup %3778 }
0x101e   :  { %v3781_v9 = vpop.eup %3780  ;;  %1291 = vrot.lane.b32.xlu0 %v3779_v59, %s4106_s0 }
0x101f   :  { %1245 = vrot.lane.b32.xlu1 %v3781_v9, %s4106_s0  ;;  %v3783_v54 = vpop.eup %3782 }
0x1023   :  { %1293 = vrot.lane.b32.xlu1 %v3783_v54, %s4106_s0 }
0x108c   :  { %v1244_v25 = vpop.permute.xlu0 %1243 }
0x108d   :  { %v4739_v53 = vmul.f32 %v3769_v39, %v1244_v25 }
0x1090   :  { %v1292_v0 = vpop.permute.xlu0 %1291 }
0x1091   :  { %v1246_v56 = vpop.permute.xlu1 %1245  ;;  %v4747_v52 = vmul.f32 %v3771_v47, %v1292_v0 }
0x1092   :  { %v4741_v58 = vmul.f32 %v3773_v51, %v1246_v56 }
0x1094   :  { %v3452_v41 = vpack.i.bf16 %v4741_v58, %v4739_v53  ;;  %v1318_v63 = vpack.c.bf16 %v4741_v58, %v4739_v53 }
0x1095   :  { %v1294_v4 = vpop.permute.xlu1 %1293 }
0x1096   :  { %v4749_v62 = vmul.f32 %v3775_v19, %v1294_v4  ;;  %3453 = vrot.lane.b32.xlu0 %v3452_v41, %s4107_s28 }
0x1098   :  { %v3457_v39 = vpack.i.bf16 %v4749_v62, %v4747_v52  ;;  %v1324_v51 = vpack.c.bf16 %v4749_v62, %v4747_v52 }
0x109a   :  { %3458 = vrot.lane.b32.xlu1 %v3457_v39, %s4108_s2 }
0x1108   :  { %v3454_v43 = vpop.permute.xlu0 %3453 }
0x1109   :  { %v3456_v36 = vunpack.i.h.bf16 %v3454_v43  ;;  %v3455_v34 = vunpack.i.l.bf16 %v3454_v43 }
0x110c   :  { %v3459_v29 = vpop.permute.xlu1 %3458 }
0x110d   :  { %v3461_v16 = vunpack.i.h.bf16 %v3459_v29  ;;  %v3460_v18 = vunpack.i.l.bf16 %v3459_v29 }
0x110f   :  { %v1316_v47 = vsel %vm130_vm0, %v3456_v36, %v3461_v16  ;;  %v1315_v19 = vsel %vm130_vm0, %v3455_v34, %v3460_v18 }
0x1110   :  { %v1317_v59 = vpack.c.bf16 %v1316_v47, %v1315_v19 }
0x1112   :  { %3322 = vmatmul.mubr.msk.bf16.vlgmr.msra.gmra.mrb[16].mxu1 %vm444_vm1, %v1317_v59 }
0x1113   :  { %1789 = vmatprep.mubr.bf16.mxu1 %v4105_v1  ;;  %1758 = vmatpush1.bf16.msra.mxu1 %v3568_v5 }
0x11e5   :  { %v1367_v9 = vpop.f32.mrb[16].mxu1 }
0x11e6   :  { %v1376_v54 = vadd.f32 %v1367_v9, %v4310_v8  ;;  %v1369_v25 = vpop.f32.mrb[17].mxu1 }
0x11e7   :  { %v1378_v56 = vadd.f32 %v1369_v25, %v4251_v31  ;;  %v1371_v0 = vpop.f32.mrb[18].mxu1 }
0x11e8   :  { %3784 = vtanh.f32 %v1376_v54  ;;  %v1377_v41 = vadd.f32 %v1371_v0, %v4316_v12  ;;  %v1373_v4 = vpop.f32.mrb[19].mxu1  ;;  %v3323_v8 = vmul.f32 -1.442695, %v1376_v54 }
0x11e9   :  { %v1379_v39 = vadd.f32 %v1373_v4, %v4257_v35  ;;  %3786 = vtanh.f32 %v1378_v56  ;;  %v3325_v12 = vmul.f32 -1.442695, %v1378_v56 }
0x11ea   :  { %3788 = vtanh.f32 %v1377_v41  ;;  %v3324_v34 = vmul.f32 -1.442695, %v1377_v41 }
0x11eb   :  { %3790 = vtanh.f32 %v1379_v39  ;;  %v3326_v35 = vmul.f32 -1.442695, %v1379_v39 }
0x11ec   :  { %3792 = vpow2.f32 %v3323_v8 }
0x11ed   :  { %3794 = vpow2.f32 %v3325_v12 }
0x11ee   :  { %3796 = vpow2.f32 %v3324_v34 }
0x11ef   :  { %3798 = vpow2.f32 %v3326_v35 }
0x11f2   :  { %v3785_v43 = vpop.eup %3784 }
0x11f3   :  { %1398 = vrot.lane.b32.xlu0 %v3785_v43, %s4106_s0  ;;  %v3787_v29 = vpop.eup %3786 }
0x11f4   :  { %v3789_v36 = vpop.eup %3788 }
0x11f5   :  { %1400 = vrot.lane.b32.xlu1 %v3789_v36, %s4106_s0  ;;  %v3791_v31 = vpop.eup %3790 }
0x11f6   :  { %v3793_v16 = vpop.eup %3792 }
0x11f7   :  { %1446 = vrot.lane.b32.xlu0 %v3787_v29, %s4106_s0  ;;  %v1386_v18 = vadd.f32 1.0, %v3793_v16  ;;  %v3795_v47 = vpop.eup %3794 }
0x11f8   :  { %v3797_v19 = vpop.eup %3796  ;;  %v1434_v59 = vadd.f32 1.0, %v3795_v47 }
0x11f9   :  { %1448 = vrot.lane.b32.xlu1 %v3791_v31, %s4106_s0  ;;  %3800 = vrcp.f32 %v1386_v18  ;;  %v1387_v9 = vadd.f32 1.0, %v3797_v19  ;;  %v3799_v25 = vpop.eup %3798 }
0x11fa   :  { %3802 = vrcp.f32 %v1434_v59  ;;  %v1435_v0 = vadd.f32 1.0, %v3799_v25 }
0x11fb   :  { %3804 = vrcp.f32 %v1387_v9 }
0x11fc   :  { %3806 = vrcp.f32 %v1435_v0 }
0x1203   :  { %v3801_v54 = vpop.eup %3800 }
0x1204   :  { %v3803_v41 = vpop.eup %3802  ;;  %v1394_v35 = vmul.f32 %v3801_v54, %v4720_v45 }
0x1205   :  { %v3805_v43 = vpop.eup %3804  ;;  %v1442_v47 = vmul.f32 %v3803_v41, %v4725_v15 }
0x1206   :  { %v3807_v8 = vpop.eup %3806  ;;  %v1395_v19 = vmul.f32 %v3805_v43, %v4727_v37 }
0x1207   :  { %v1443_v45 = vmul.f32 %v3807_v8, %v4732_v49 }
0x1265   :  { %v1399_v4 = vpop.permute.xlu0 %1398 }
0x1266   :  { %v1404_v56 = vmul.f32 %v3801_v54, %v1399_v4 }
0x1267   :  { %v1401_v29 = vpop.permute.xlu1 %1400 }
0x1268   :  { %1408 = vrot.lane.b32.xlu0 %v1404_v56, %s4106_s0  ;;  %v1405_v31 = vmul.f32 %v3805_v43, %v1401_v29 }
0x1269   :  { %v1447_v39 = vpop.permute.xlu0 %1446 }
0x126a   :  { %v1452_v36 = vmul.f32 %v3803_v41, %v1447_v39  ;;  %1410 = vrot.lane.b32.xlu1 %v1405_v31, %s4106_s0 }
0x126b   :  { %v1449_v12 = vpop.permute.xlu1 %1448 }
0x126c   :  { %1456 = vrot.lane.b32.xlu0 %v1452_v36, %s4106_s0  ;;  %v1453_v34 = vmul.f32 %v3807_v8, %v1449_v12 }
0x126e   :  { %1458 = vrot.lane.b32.xlu1 %v1453_v34, %s4106_s0 }
0x12da   :  { %v1409_v16 = vpop.permute.xlu0 %1408 }
0x12db   :  { %v4774_v18 = vadd.f32 %v1409_v16, %v1394_v35 }
0x12dc   :  { %v1411_v9 = vpop.permute.xlu1 %1410 }
0x12dd   :  { %3808 = vtanh.f32 %v4774_v18  ;;  %v4781_v0 = vadd.f32 %v1411_v9, %v1395_v19 }
0x12de   :  { %v1457_v59 = vpop.permute.xlu0 %1456 }
0x12df   :  { %v4779_v25 = vadd.f32 %v1457_v59, %v1442_v47 }
0x12e0   :  { %v1459_v4 = vpop.permute.xlu1 %1458 }
0x12e1   :  { %3810 = vtanh.f32 %v4779_v25  ;;  %v4786_v56 = vadd.f32 %v1459_v4, %v1443_v45 }
0x12e2   :  { %3812 = vtanh.f32 %v4781_v0 }
0x12e3   :  { %3814 = vtanh.f32 %v4786_v56 }
0x12e7   :  { %v3809_v15 = vpop.eup %3808 }
0x12e8   :  { %1420 = vrot.lane.b32.xlu0 %v3809_v15, %s4106_s0 }
0x12eb   :  { %v3811_v37 = vpop.eup %3810 }
0x12ec   :  { %v3813_v39 = vpop.eup %3812  ;;  %1468 = vrot.lane.b32.xlu0 %v3811_v37, %s4106_s0 }
0x12ed   :  { %1422 = vrot.lane.b32.xlu1 %v3813_v39, %s4106_s0  ;;  %v3815_v29 = vpop.eup %3814 }
0x12f1   :  { %1470 = vrot.lane.b32.xlu1 %v3815_v29, %s4106_s0 }
0x135a   :  { %v1421_v36 = vpop.permute.xlu0 %1420 }
0x135b   :  { %v4793_v49 = vmul.f32 %v3801_v54, %v1421_v36 }
0x135e   :  { %v1469_v34 = vpop.permute.xlu0 %1468 }
0x135f   :  { %v1423_v31 = vpop.permute.xlu1 %1422  ;;  %v4801_v19 = vmul.f32 %v3803_v41, %v1469_v34 }
0x1360   :  { %v4795_v12 = vmul.f32 %v3805_v43, %v1423_v31 }
0x1362   :  { %v3462_v35 = vpack.i.bf16 %v4795_v12, %v4793_v49  ;;  %v1495_v16 = vpack.c.bf16 %v4795_v12, %v4793_v49 }
0x1363   :  { %v1471_v47 = vpop.permute.xlu1 %1470 }
0x1364   :  { %v4803_v59 = vmul.f32 %v3807_v8, %v1471_v47  ;;  %3463 = vrot.lane.b32.xlu0 %v3462_v35, %s4107_s28 }
0x1366   :  { %v3467_v54 = vpack.i.bf16 %v4803_v59, %v4801_v19  ;;  %v1501_v43 = vpack.c.bf16 %v4803_v59, %v4801_v19 }
0x1368   :  { %3468 = vrot.lane.b32.xlu1 %v3467_v54, %s4108_s2 }
0x13d6   :  { %v3464_v9 = vpop.permute.xlu0 %3463 }
0x13d7   :  { %v3466_v4 = vunpack.i.h.bf16 %v3464_v9  ;;  %v3465_v15 = vunpack.i.l.bf16 %v3464_v9 }
0x13da   :  { %v3469_v45 = vpop.permute.xlu1 %3468 }
0x13db   :  { %v3471_v37 = vunpack.i.h.bf16 %v3469_v45  ;;  %v3470_v39 = vunpack.i.l.bf16 %v3469_v45 }
0x13dd   :  { %v1493_v41 = vsel %vm130_vm0, %v3466_v4, %v3471_v37  ;;  %v1492_v8 = vsel %vm130_vm0, %v3465_v15, %v3470_v39 }
0x13de   :  { %v1494_v29 = vpack.c.bf16 %v1493_v41, %v1492_v8 }
0x13e0   :  { %3327 = vmatmul.mubr.msk.bf16.vlgmr.msra.gmra.mrb[36].mxu0 %vm444_vm1, %v1494_v29 }
0x13e1   :  { %2068 = vmatprep.mubr.bf16.mxu0 %v4105_v1 }
0x14b3   :  { %v1544_v36 = vpop.f32.mrb[36].mxu0 }
0x14b4   :  { %v1553_v31 = vadd.f32 %v1544_v36, %v4322_v22  ;;  %v1546_v34 = vpop.f32.mrb[37].mxu0 }
0x14b5   :  { %v1555_v35 = vadd.f32 %v1546_v34, %v4237_v23  ;;  %v1548_v47 = vpop.f32.mrb[38].mxu0 }
0x14b6   :  { %v1554_v54 = vadd.f32 %v1548_v47, %v4326_v30  ;;  %v1550_v9 = vpop.f32.mrb[39].mxu0  ;;  %v3328_v37 = vmul.f32 -1.442695, %v1553_v31 }
0x14b7   :  { %3816 = vtanh.f32 %v1555_v35  ;;  %v1556_v45 = vadd.f32 %v1550_v9, %v4244_v27  ;;  %v3330_v30 = vmul.f32 -1.442695, %v1555_v35 }
0x14b8   :  { %3818 = vtanh.f32 %v1553_v31  ;;  %v3329_v27 = vmul.f32 -1.442695, %v1554_v54 }
0x14b9   :  { %3820 = vtanh.f32 %v1556_v45  ;;  %v3331_v39 = vmul.f32 -1.442695, %v1556_v45 }
0x14ba   :  { %3822 = vtanh.f32 %v1554_v54 }
0x14bb   :  { %3824 = vpow2.f32 %v3330_v30 }
0x14bc   :  { %3826 = vpow2.f32 %v3328_v37 }
0x14bd   :  { %3828 = vpow2.f32 %v3331_v39 }
0x14be   :  { %3830 = vpow2.f32 %v3329_v27 }
0x14c1   :  { %v3817_v4 = vpop.eup %3816 }
0x14c2   :  { %1623 = vrot.lane.b32.xlu0 %v3817_v4, %s4106_s0  ;;  %v3819_v15 = vpop.eup %3818 }
0x14c3   :  { %v3821_v22 = vpop.eup %3820 }
0x14c4   :  { %1625 = vrot.lane.b32.xlu1 %v3821_v22, %s4106_s0  ;;  %v3823_v23 = vpop.eup %3822 }
0x14c5   :  { %v3825_v41 = vpop.eup %3824 }
0x14c6   :  { %1575 = vrot.lane.b32.xlu0 %v3819_v15, %s4106_s0  ;;  %v1611_v8 = vadd.f32 1.0, %v3825_v41  ;;  %v3827_v29 = vpop.eup %3826 }
0x14c7   :  { %v3829_v36 = vpop.eup %3828  ;;  %v1563_v34 = vadd.f32 1.0, %v3827_v29 }
0x14c8   :  { %1577 = vrot.lane.b32.xlu1 %v3823_v23, %s4106_s0  ;;  %3832 = vrcp.f32 %v1611_v8  ;;  %v1612_v47 = vadd.f32 1.0, %v3829_v36  ;;  %v3831_v9 = vpop.eup %3830 }
0x14c9   :  { %3834 = vrcp.f32 %v1563_v34  ;;  %v1564_v4 = vadd.f32 1.0, %v3831_v9 }
0x14ca   :  { %3836 = vrcp.f32 %v1612_v47 }
0x14cb   :  { %3838 = vrcp.f32 %v1564_v4 }
0x14d2   :  { %v4823_v15 = vpop.eup %3832 }
0x14d3   :  { %v4827_v54 = vpop.eup %3834  ;;  %v1619_v8 = vmul.f32 %v4823_v15, %v4779_v25 }
0x14d4   :  { %v3837_v23 = vpop.eup %3836  ;;  %v1571_v34 = vmul.f32 %v4827_v54, %v4774_v18 }
0x14d5   :  { %v4832_v39 = vpop.eup %3838  ;;  %v1620_v9 = vmul.f32 %v3837_v23, %v4786_v56 }
0x1534   :  { %v1624_v31 = vpop.permute.xlu0 %1623 }
0x1535   :  { %v1629_v35 = vmul.f32 %v4823_v15, %v1624_v31 }
0x1536   :  { %v1626_v30 = vpop.permute.xlu1 %1625 }
0x1537   :  { %1633 = vrot.lane.b32.xlu0 %v1629_v35, %s4106_s0  ;;  %v1630_v37 = vmul.f32 %v3837_v23, %v1626_v30 }
0x1538   :  { %v1576_v45 = vpop.permute.xlu0 %1575 }
0x1539   :  { %v1581_v22 = vmul.f32 %v4827_v54, %v1576_v45  ;;  %1635 = vrot.lane.b32.xlu1 %v1630_v37, %s4106_s0  ;;  %v1572_v45 = vmul.f32 %v4832_v39, %v4781_v0 }
0x153a   :  { %v1578_v27 = vpop.permute.xlu1 %1577 }
0x153b   :  { %1585 = vrot.lane.b32.xlu0 %v1581_v22, %s4106_s0  ;;  %v1582_v41 = vmul.f32 %v4832_v39, %v1578_v27 }
0x153d   :  { %1587 = vrot.lane.b32.xlu1 %v1582_v41, %s4106_s0  ;;  %v1681_v41 = vld [vmem:[%s5619_s6] sm:$0x3] }
0x15a9   :  { %v1634_v29 = vpop.permute.xlu0 %1633 }
0x15aa   :  { %v1639_v36 = vadd.f32 %v1634_v29, %v1619_v8  ;;  %v5630_v8 = vsub.s32 0, %v4218_v14 }
0x15ab   :  { %v1636_v31 = vpop.permute.xlu1 %1635 }
0x15ac   :  { %3840 = vtanh.f32 %v1639_v36  ;;  %v1640_v35 = vadd.f32 %v1636_v31, %v1620_v9  ;;  %v4969_v29 = vrot.slane %v1681_v41, %v5630_v8  ;;  %v5631_v36 = vsub.s32 1, %v4218_v14 }
0x15ad   :  { %v1586_v47 = vpop.permute.xlu0 %1585 }
0x15ae   :  { %v1591_v4 = vadd.f32 %v1586_v47, %v1571_v34  ;;  %v4973_v34 = vrot.slane %v1681_v41, %v5631_v36 }
0x15af   :  { %v1588_v22 = vpop.permute.xlu1 %1587 }
0x15b0   :  { %3842 = vtanh.f32 %v1591_v4  ;;  %v1592_v30 = vadd.f32 %v1588_v22, %v1572_v45 }
0x15b1   :  { %3844 = vtanh.f32 %v1640_v35 }
0x15b2   :  { %3846 = vtanh.f32 %v1592_v30 }
0x15b6   :  { %v3841_v25 = vpop.eup %3840 }
0x15b7   :  { %1645 = vrot.lane.b32.xlu0 %v3841_v25, %s4106_s0 }
0x15ba   :  { %v3843_v37 = vpop.eup %3842 }
0x15bb   :  { %1597 = vrot.lane.b32.xlu0 %v3843_v37, %s4106_s0  ;;  %v3845_v18 = vpop.eup %3844 }
0x15bc   :  { %1647 = vrot.lane.b32.xlu1 %v3845_v18, %s4106_s0  ;;  %v3847_v56 = vpop.eup %3846 }
0x15bf   :  { %393 = vrot.lane.b32.xlu0 %v391_v13, %s4107_s28  ;;  %v3573_v13 = vld [vmem:[%s5618_s4 + $0x14] ss:$8 sps:$4 sm:$0xff]  }
0x15c0   :  { %1599 = vrot.lane.b32.xlu1 %v3847_v56, %s4106_s0  ;;  %1759 = vmatprep.subr.bf16.mxu1 %v3573_v13 }
0x15c1   :  { %1760 = vmatpush1.bf16.msra.mxu1 %v3571_v46 }
0x15c2   :  { %1761 = vmatprep.subr.bf16.mxu1 %v3576_v33 }
0x15c3   :  { %612 = vrot.lane.b32.xlu0 %v610_v48, %s4107_s28  ;;  %v5628_v48 = vpack.c.bf16 %v4442_v32, %v4439_v28  ;;  %v3577_v28 = vld [vmem:[%s5618_s4 + $0x30] ss:$8 sps:$4 sm:$0xff]  }
0x15c5   :  { %1762 = vmatpush1.bf16.msra.mxu1 %v3574_v38 }
0x15c6   :  { %1763 = vmatprep.subr.bf16.mxu1 %v3579_v26 }
0x15c7   :  { %789 = vrot.lane.b32.xlu0 %v787_v42, %s4107_s28 }
0x15c9   :  { %1764 = vmatpush1.bf16.msra.mxu1 %v3577_v28 }
0x15cb   :  { %966 = vrot.lane.b32.xlu0 %v964_v50, %s4107_s28 }
0x15cf   :  { %972 = vrot.lane.b32.xlu0 %v970_v57, %s4108_s2  ;;  %v5629_v57 = vpack.c.bf16 %v4680_v11, %v4678_v61 }
0x15d3   :  { %795 = vrot.lane.b32.xlu0 %v793_v2, %s4108_s2 }
0x15d7   :  { %618 = vrot.lane.b32.xlu0 %v5627_v20, %s4108_s2 }
0x15db   :  { %399 = vrot.lane.b32.xlu0 %v5628_v48, %s4108_s2 }
0x1629   :  { %v1646_v42 = vpop.permute.xlu0 %1645 }
0x162a   :  { %v1651_v40 = vmul.f32 %v4823_v15, %v1646_v42 }
0x162d   :  { %v1598_v32 = vpop.permute.xlu0 %1597 }
0x162e   :  { %v1648_v10 = vpop.permute.xlu1 %1647  ;;  %v1603_v17 = vmul.f32 %v4827_v54, %v1598_v32 }
0x162f   :  { %v1652_v24 = vmul.f32 %v3837_v23, %v1648_v10 }
0x1631   :  { %v394_v2 = vpop.permute.xlu0 %393  ;;  %v1659_v6 = vpack.c.bf16 %v1652_v24, %v1651_v40 }
0x1632   :  { %396 = vst.msk [vmem:[#allocation2] sm:$0xff] %vm130_vm0, %v394_v2  ;;  %v1600_v52 = vpop.permute.xlu1 %1599 }
0x1633   :  { %1661 = vrot.lane.b32.xlu1 %v1659_v6, %s4108_s2  ;;  %v1604_v3 = vmul.f32 %v4832_v39, %v1600_v52 }
0x1635   :  { %v613_v21 = vpop.permute.xlu0 %612  ;;  %v1653_v11 = vpack.c.bf16 %v1604_v3, %v1603_v17 }
0x1636   :  { %615 = vst.msk [vmem:[#allocation2 + $0x8] sm:$0xff] %vm130_vm0, %v613_v21 }
0x1637   :  { %1503 = vrot.lane.b32.xlu1 %v1501_v43, %s4108_s2 }
0x1639   :  { %v790_v50 = vpop.permute.xlu0 %789 }
0x163a   :  { %792 = vst.msk [vmem:[#allocation2 + $0x10] sm:$0xff] %vm130_vm0, %v790_v50 }
0x163b   :  { %1326 = vrot.lane.b32.xlu1 %v1324_v51, %s4108_s2 }
0x163d   :  { %v967_v44 = vpop.permute.xlu0 %966 }
0x163e   :  { %969 = vst.msk [vmem:[#allocation2 + $0x18] sm:$0xff] %vm130_vm0, %v967_v44 }
0x163f   :  { %1149 = vrot.lane.b32.xlu1 %v1147_v55, %s4108_s2 }
0x1641   :  { %v973_v60 = vpop.permute.xlu0 %972 }
0x1642   :  { %975 = vst.msk [vmem:[#allocation2 + $0x20] sm:$0xff] %vm402_vm2, %v973_v60 }
0x1643   :  { %1143 = vrot.lane.b32.xlu1 %v5629_v57, %s4107_s28 }
0x1645   :  { %v796_v0 = vpop.permute.xlu0 %795 }
0x1646   :  { %798 = vst.msk [vmem:[#allocation2 + $0x28] sm:$0xff] %vm402_vm2, %v796_v0 }
0x1647   :  { %1320 = vrot.lane.b32.xlu1 %v1318_v63, %s4107_s28 }
0x1649   :  { %v619_v62 = vpop.permute.xlu0 %618 }
0x164a   :  { %621 = vst.msk [vmem:[#allocation2 + $0x30] sm:$0xff] %vm402_vm2, %v619_v62 }
0x164b   :  { %1497 = vrot.lane.b32.xlu1 %v1495_v16, %s4107_s28 }
0x164d   :  { %v400_v61 = vpop.permute.xlu0 %399 }
0x164e   :  { %403 = vst.msk [vmem:[#allocation2 + $0x38] sm:$0xff] %vm402_vm2, %v400_v61 }
0x164f   :  { %1655 = vrot.lane.b32.xlu1 %v1653_v11, %s4107_s28 }
0x16a5   :  { %v1662_v55 = vpop.permute.xlu1 %1661 }
0x16a6   :  { %1664 = vst.msk [vmem:[#allocation2] sm:$0xff] %vm402_vm2, %v1662_v55 }
0x16a9   :  { %v1504_v53 = vpop.permute.xlu1 %1503 }
0x16aa   :  { %1506 = vst.msk [vmem:[#allocation2 + $0x8] sm:$0xff] %vm402_vm2, %v1504_v53 }
0x16ad   :  { %v1327_v58 = vpop.permute.xlu1 %1326  ;;  %v1665_v63 = vld [vmem:[#allocation2] sm:$0xff] }
0x16ae   :  { %1329 = vst.msk [vmem:[#allocation2 + $0x10] sm:$0xff] %vm402_vm2, %v1327_v58  ;;  %3340 = vmatmul.mubr.msk.bf16.vlgmr.msra.gmra.mrb[20].mxu1 %vm444_vm1, %v1665_v63 }
0x16af   :  { %1799 = vmatprep.mubr.bf16.mxu1 %v4105_v1 }
0x16b1   :  { %v1150_v51 = vpop.permute.xlu1 %1149  ;;  %v1666_v12 = vld [vmem:[#allocation2 + $0x8] sm:$0xff] }
0x16b2   :  { %1152 = vst.msk [vmem:[#allocation2 + $0x18] sm:$0xff] %vm402_vm2, %v1150_v51 }
0x16b5   :  { %v1144_v49 = vpop.permute.xlu1 %1143  ;;  %v1667_v59 = vld [vmem:[#allocation2 + $0x10] sm:$0xff] }
0x16b6   :  { %1146 = vst.msk [vmem:[#allocation2 + $0x20] sm:$0xff] %vm130_vm0, %v1144_v49  ;;  %3341 = vmatmul.mubr.msk.bf16.gmra.mrb[24].mxu1 %vm444_vm1, %v1666_v12 }
0x16b7   :  { %1809 = vmatprep.mubr.bf16.mxu1 %v4105_v1 }
0x16b9   :  { %v1321_v16 = vpop.permute.xlu1 %1320  ;;  %v1668_v15 = vld [vmem:[#allocation2 + $0x18] sm:$0xff] }
0x16ba   :  { %1323 = vst.msk [vmem:[#allocation2 + $0x28] sm:$0xff] %vm130_vm0, %v1321_v16 }
0x16bd   :  { %v1498_v19 = vpop.permute.xlu1 %1497  ;;  %v1669_v54 = vld [vmem:[#allocation2 + $0x20] sm:$0xff] }
0x16be   :  { %1500 = vst.msk [vmem:[#allocation2 + $0x30] sm:$0xff] %vm130_vm0, %v1498_v19  ;;  %3342 = vmatmul.mubr.msk.bf16.gmra.mrb[28].mxu1 %vm444_vm1, %v1667_v59 }
0x16bf   :  { %1819 = vmatprep.mubr.bf16.mxu1 %v4105_v1 }
0x16c1   :  { %v1656_v43 = vpop.permute.xlu1 %1655  ;;  %v1670_v23 = vld [vmem:[#allocation2 + $0x28] sm:$0xff] }
0x16c2   :  { %1658 = vst.msk [vmem:[#allocation2 + $0x38] sm:$0xff] %vm130_vm0, %v1656_v43 }
0x16c5   :  { %v1671_v39 = vld [vmem:[#allocation2 + $0x30] sm:$0xff] }
0x16c6   :  { %3343 = vmatmul.mubr.msk.bf16.gmra.mrb[32].mxu1 %vm444_vm1, %v1668_v15 }
0x16c7   :  { %1829 = vmatprep.mubr.bf16.mxu1 %v4105_v1 }
0x16c9   :  { %v1672_v27 = vld [vmem:[#allocation2 + $0x38] sm:$0xff] }
0x16ce   :  { %3344 = vmatmul.mubr.msk.bf16.gmra.mrb[36].mxu1 %vm444_vm1, %v1669_v54 }
0x16cf   :  { %1839 = vmatprep.mubr.bf16.mxu1 %v4105_v1 }
0x16d6   :  { %3345 = vmatmul.mubr.msk.bf16.gmra.mrb[40].mxu1 %vm444_vm1, %v1670_v23 }
0x16d7   :  { %1849 = vmatprep.mubr.bf16.mxu1 %v4105_v1 }
0x16de   :  { %3346 = vmatmul.mubr.msk.bf16.gmra.mrb[44].mxu1 %vm444_vm1, %v1671_v39 }
0x16df   :  { %1859 = vmatprep.mubr.bf16.mxu1 %v4105_v1 }
0x16e6   :  { %3347 = vmatmul.mubr.msk.bf16.gmra.mrb[48].mxu1 %vm444_vm1, %v1672_v27 }
0x16e7   :  { %2744 = vmatprep.mubr.bf16.mxu1 %v4105_v1 }
0x1781   :  { %v1791_v47 = vpop.f32.mrb[20].mxu1 }
0x1782   :  { %v4976_v9 = vadd.f32 %v1791_v47, %v4969_v29  ;;  %v1793_v4 = vpop.f32.mrb[21].mxu1 }
0x1783   :  { %v4979_v31 = vadd.f32 %v1793_v4, %v4973_v34  ;;  %v1795_v35 = vpop.f32.mrb[22].mxu1 }
0x1784   :  { %3848 = vtanh.f32 %v4976_v9  ;;  %v4983_v45 = vadd.f32 %v1795_v35, %v4969_v29  ;;  %v1797_v22 = vpop.f32.mrb[23].mxu1 }
0x1785   :  { %v4986_v30 = vadd.f32 %v1797_v22, %v4973_v34 }
0x1786   :  { %3850 = vtanh.f32 %v4983_v45 }
0x1789   :  { %v1801_v14 = vpop.f32.mrb[24].mxu1 }
0x178a   :  { %v4990_v25 = vadd.f32 %v1801_v14, %v4969_v29  ;;  %v1803_v37 = vpop.f32.mrb[25].mxu1 }
0x178b   :  { %v4993_v18 = vadd.f32 %v1803_v37, %v4973_v34  ;;  %v1805_v56 = vpop.f32.mrb[26].mxu1 }
0x178c   :  { %v4996_v5 = vadd.f32 %v1805_v56, %v4969_v29  ;;  %v1807_v7 = vpop.f32.mrb[27].mxu1 }
0x178d   :  { %v4999_v13 = vadd.f32 %v1807_v7, %v4973_v34  ;;  %v3348_v7 = vmul.f32 -1.442695, %v4976_v9 }
0x178e   :  { %v3849_v46 = vpop.eup %3848 }
0x178f   :  { %1896 = vrot.lane.b32.xlu0 %v3849_v46, %s4106_s0  ;;  %v3349_v46 = vmul.f32 -1.442695, %v4983_v45 }
0x1790   :  { %v3851_v20 = vpop.eup %3850 }
0x1791   :  { %v1811_v48 = vpop.f32.mrb[28].mxu1  ;;  %1898 = vrot.lane.b32.xlu1 %v3851_v20, %s4106_s0 }
0x1792   :  { %v5003_v33 = vadd.f32 %v1811_v48, %v4969_v29  ;;  %v1813_v38 = vpop.f32.mrb[29].mxu1 }
0x1793   :  { %v5007_v42 = vadd.f32 %v1813_v38, %v4973_v34  ;;  %v1815_v26 = vpop.f32.mrb[30].mxu1 }
0x1794   :  { %v5010_v28 = vadd.f32 %v1815_v26, %v4969_v29  ;;  %v1817_v32 = vpop.f32.mrb[31].mxu1 }
0x1795   :  { %v5013_v10 = vadd.f32 %v1817_v32, %v4973_v34 }
0x1799   :  { %v1821_v40 = vpop.f32.mrb[32].mxu1 }
0x179a   :  { %v5016_v24 = vadd.f32 %v1821_v40, %v4969_v29  ;;  %v1823_v2 = vpop.f32.mrb[33].mxu1 }
0x179b   :  { %v5019_v6 = vadd.f32 %v1823_v2, %v4973_v34  ;;  %v1825_v21 = vpop.f32.mrb[34].mxu1 }
0x179c   :  { %v5022_v50 = vadd.f32 %v1825_v21, %v4969_v29  ;;  %v1827_v44 = vpop.f32.mrb[35].mxu1 }
0x179d   :  { %v5025_v60 = vadd.f32 %v1827_v44, %v4973_v34 }
0x17a1   :  { %v1831_v57 = vpop.f32.mrb[36].mxu1 }
0x17a2   :  { %v5028_v0 = vadd.f32 %v1831_v57, %v4969_v29  ;;  %v1833_v52 = vpop.f32.mrb[37].mxu1 }
0x17a3   :  { %v5031_v62 = vadd.f32 %v1833_v52, %v4973_v34  ;;  %v1835_v3 = vpop.f32.mrb[38].mxu1 }
0x17a4   :  { %v5034_v17 = vadd.f32 %v1835_v3, %v4969_v29  ;;  %v1837_v61 = vpop.f32.mrb[39].mxu1 }
0x17a5   :  { %v5037_v11 = vadd.f32 %v1837_v61, %v4973_v34 }
0x17a9   :  { %v1841_v55 = vpop.f32.mrb[40].mxu1 }
0x17aa   :  { %v5040_v53 = vadd.f32 %v1841_v55, %v4969_v29  ;;  %v1843_v58 = vpop.f32.mrb[41].mxu1 }
0x17ab   :  { %v5043_v63 = vadd.f32 %v1843_v58, %v4973_v34  ;;  %v1845_v51 = vpop.f32.mrb[42].mxu1 }
0x17ac   :  { %v5046_v49 = vadd.f32 %v1845_v51, %v4969_v29  ;;  %v1847_v12 = vpop.f32.mrb[43].mxu1 }
0x17ad   :  { %v5049_v16 = vadd.f32 %v1847_v12, %v4973_v34 }
0x17b1   :  { %v1851_v19 = vpop.f32.mrb[44].mxu1 }
0x17b2   :  { %v5052_v59 = vadd.f32 %v1851_v19, %v4969_v29  ;;  %v1853_v43 = vpop.f32.mrb[45].mxu1 }
0x17b3   :  { %v5055_v15 = vadd.f32 %v1853_v43, %v4973_v34  ;;  %v1855_v54 = vpop.f32.mrb[46].mxu1 }
0x17b4   :  { %v5058_v23 = vadd.f32 %v1855_v54, %v4969_v29  ;;  %v1857_v39 = vpop.f32.mrb[47].mxu1 }
0x17b5   :  { %v5061_v27 = vadd.f32 %v1857_v39, %v4973_v34 }
0x17b9   :  { %v1861_v41 = vpop.f32.mrb[48].mxu1 }
0x17ba   :  { %v5064_v8 = vadd.f32 %v1861_v41, %v4969_v29  ;;  %v1863_v36 = vpop.f32.mrb[49].mxu1 }
0x17bb   :  { %v1864_v47 = vadd.f32 %v1863_v36, %v4973_v34  ;;  %v1865_v4 = vpop.f32.mrb[50].mxu1 }
0x17bc   :  { %v5068_v35 = vadd.f32 %v1865_v4, %v4969_v29  ;;  %v1867_v22 = vpop.f32.mrb[51].mxu1 }
0x17bd   :  { %3852 = vtanh.f32 %v1864_v47  ;;  %v1868_v14 = vadd.f32 %v1867_v22, %v4973_v34  ;;  %v3350_v45 = vmul.f32 -1.442695, %v1864_v47 }
0x17bf   :  { %3854 = vtanh.f32 %v1868_v14  ;;  %v3351_v21 = vmul.f32 -1.442695, %v1868_v14 }
0x17c0   :  { %3856 = vpow2.f32 %v3348_v7 }
0x17c1   :  { %3858 = vpow2.f32 %v3349_v46 }
0x17c7   :  { %v3853_v37 = vpop.eup %3852 }
0x17c8   :  { %1944 = vrot.lane.b32.xlu0 %v3853_v37, %s4106_s0 }
0x17c9   :  { %v3855_v56 = vpop.eup %3854 }
0x17ca   :  { %1946 = vrot.lane.b32.xlu1 %v3855_v56, %s4106_s0  ;;  %v3857_v20 = vpop.eup %3856 }
0x17cb   :  { %v3859_v29 = vpop.eup %3858  ;;  %v1884_v48 = vadd.f32 1.0, %v3857_v20 }
0x17cc   :  { %v1885_v38 = vadd.f32 1.0, %v3859_v29 }
0x17cd   :  { %3860 = vrcp.f32 %v1884_v48 }
0x17ce   :  { %3862 = vrcp.f32 %v1885_v38  ;;  %v5114_v38 = vld [vmem:[%s5620_s5 + $0x4] ss:$8 sps:$4 sm:$0xff]  }
0x17cf   :  { %3864 = vpow2.f32 %v3350_v45  ;;  %2036 = vmatprep.subr.bf16.mxu0 %v5114_v38  ;;  %2712 = vmatprep.subr.bf16.mxu1 %v5114_v38 }
0x17d0   :  { %3866 = vpow2.f32 %v3351_v21 }
0x17d7   :  { %v5075_v34 = vpop.eup %3860 }
0x17d8   :  { %v5078_v40 = vpop.eup %3862  ;;  %v1892_v43 = vmul.f32 0.0, %v5075_v34 }
0x17d9   :  { %v3865_v44 = vpop.eup %3864  ;;  %v1893_v41 = vmul.f32 0.0, %v5078_v40 }
0x17da   :  { %v3867_v57 = vpop.eup %3866  ;;  %v1932_v52 = vadd.f32 1.0, %v3865_v44  ;;  %v5146_v44 = vld [vmem:[%s5620_s5 + $0x20] ss:$8 sps:$4 sm:$0xff]  }
0x17db   :  { %v1933_v3 = vadd.f32 1.0, %v3867_v57 }
0x17dc   :  { %3868 = vrcp.f32 %v1932_v52 }
0x17dd   :  { %3870 = vrcp.f32 %v1933_v3 }
0x17e6   :  { %v5083_v61 = vpop.eup %3868 }
0x17e7   :  { %v5086_v51 = vpop.eup %3870  ;;  %v1940_v14 = vmul.f32 0.0, %v5083_v61 }
0x17e8   :  { %v1941_v7 = vmul.f32 0.0, %v5086_v51 }
0x1801   :  { %v1897_v26 = vpop.permute.xlu0 %1896 }
0x1802   :  { %v1902_v32 = vmul.f32 %v5075_v34, %v1897_v26  ;;  %v5119_v26 = vld [vmem:[%s5620_s5] ss:$8 sps:$4 sm:$0xff]  }
0x1803   :  { %v1899_v2 = vpop.permute.xlu1 %1898  ;;  %2037 = vmatpush1.bf16.msra.mxu0 %v5119_v26  ;;  %2713 = vmatpush1.bf16.msra.mxu1 %v5119_v26 }
0x1804   :  { %1906 = vrot.lane.b32.xlu0 %v1902_v32, %s4106_s0  ;;  %v1903_v9 = vmul.f32 %v5078_v40, %v1899_v2  ;;  %v5125_v32 = vld [vmem:[%s5620_s5 + $0x14] ss:$8 sps:$4 sm:$0xff]   ;;  %v5132_v2 = vld [vmem:[%s5620_s5 + $0x10] ss:$8 sps:$4 sm:$0xff]  }
0x1805   :  { %2038 = vmatprep.subr.bf16.mxu0 %v5125_v32  ;;  %2714 = vmatprep.subr.bf16.mxu1 %v5125_v32 }
0x1806   :  { %1908 = vrot.lane.b32.xlu1 %v1903_v9, %s4106_s0  ;;  %v5139_v9 = vld [vmem:[%s5620_s5 + $0x24] ss:$8 sps:$4 sm:$0xff]  }
0x1807   :  { %2039 = vmatpush1.bf16.msra.mxu0 %v5132_v2  ;;  %2715 = vmatpush1.bf16.msra.mxu1 %v5132_v2 }
0x1808   :  { %2040 = vmatprep.subr.bf16.mxu0 %v5139_v9  ;;  %2716 = vmatprep.subr.bf16.mxu1 %v5139_v9 }
0x180b   :  { %2041 = vmatpush1.bf16.msra.mxu0 %v5146_v44  ;;  %2717 = vmatpush1.bf16.msra.mxu1 %v5146_v44 }
0x183a   :  { %v1945_v55 = vpop.permute.xlu0 %1944 }
0x183b   :  { %v1950_v58 = vmul.f32 %v5083_v61, %v1945_v55 }
0x183c   :  { %v1947_v12 = vpop.permute.xlu1 %1946 }
0x183d   :  { %1954 = vrot.lane.b32.xlu0 %v1950_v58, %s4106_s0  ;;  %v1951_v19 = vmul.f32 %v5086_v51, %v1947_v12 }
0x183f   :  { %1956 = vrot.lane.b32.xlu1 %v1951_v19, %s4106_s0 }
0x1876   :  { %v1907_v54 = vpop.permute.xlu0 %1906 }
0x1877   :  { %v5092_v39 = vadd.f32 %v1907_v54, %v1892_v43 }
0x1878   :  { %v1909_v36 = vpop.permute.xlu1 %1908 }
0x1879   :  { %3872 = vtanh.f32 %v5092_v39  ;;  %v5096_v47 = vadd.f32 %v1909_v36, %v1893_v41 }
0x187b   :  { %3874 = vtanh.f32 %v5096_v47 }
0x1883   :  { %v3873_v4 = vpop.eup %3872 }
0x1884   :  { %1918 = vrot.lane.b32.xlu0 %v3873_v4, %s4106_s0 }
0x1885   :  { %v3875_v22 = vpop.eup %3874 }
0x1886   :  { %1920 = vrot.lane.b32.xlu1 %v3875_v22, %s4106_s0 }
0x18af   :  { %v1955_v37 = vpop.permute.xlu0 %1954 }
0x18b0   :  { %v5102_v56 = vadd.f32 %v1955_v37, %v1940_v14 }
0x18b1   :  { %v1957_v46 = vpop.permute.xlu1 %1956 }
0x18b2   :  { %3876 = vtanh.f32 %v5102_v56  ;;  %v5106_v20 = vadd.f32 %v1957_v46, %v1941_v7 }
0x18b4   :  { %3878 = vtanh.f32 %v5106_v20 }
0x18bc   :  { %v3877_v29 = vpop.eup %3876 }
0x18bd   :  { %1966 = vrot.lane.b32.xlu0 %v3877_v29, %s4106_s0 }
0x18be   :  { %v3879_v48 = vpop.eup %3878 }
0x18bf   :  { %1968 = vrot.lane.b32.xlu1 %v3879_v48, %s4106_s0 }
0x18f6   :  { %v1919_v45 = vpop.permute.xlu0 %1918 }
0x18f7   :  { %v5150_v57 = vmul.f32 %v5075_v34, %v1919_v45  ;;  %v5165_v34 = vld [vmem:[%s5620_s5 + $0x34] ss:$8 sps:$4 sm:$0xff]  }
0x18f8   :  { %v1921_v21 = vpop.permute.xlu1 %1920  ;;  %2042 = vmatprep.subr.bf16.mxu0 %v5165_v34  ;;  %2718 = vmatprep.subr.bf16.mxu1 %v5165_v34 }
0x18f9   :  { %v5153_v52 = vmul.f32 %v5078_v40, %v1921_v21  ;;  %v5170_v40 = vld [vmem:[%s5620_s5 + $0x30] ss:$8 sps:$4 sm:$0xff]  }
0x18fa   :  { %2043 = vmatpush1.bf16.msra.mxu0 %v5170_v40  ;;  %2719 = vmatpush1.bf16.msra.mxu1 %v5170_v40 }
0x18fb   :  { %v3472_v3 = vpack.i.bf16 %v5153_v52, %v5150_v57  ;;  %2205 = vmatprep.subr.bf16.mxu0 %v5114_v38  ;;  %3050 = vmatprep.subr.bf16.mxu1 %v5114_v38 }
0x18fd   :  { %3473 = vrot.lane.b32.xlu0 %v3472_v3, %s4107_s28 }
0x192f   :  { %v1967_v55 = vpop.permute.xlu0 %1966 }
0x1930   :  { %v5179_v12 = vmul.f32 %v5083_v61, %v1967_v55 }
0x1931   :  { %v1969_v58 = vpop.permute.xlu1 %1968 }
0x1932   :  { %v5182_v19 = vmul.f32 %v5086_v51, %v1969_v58 }
0x1934   :  { %v3477_v43 = vpack.i.bf16 %v5182_v19, %v5179_v12 }
0x1936   :  { %3478 = vrot.lane.b32.xlu1 %v3477_v43, %s4108_s2 }
0x196f   :  { %v3474_v54 = vpop.permute.xlu0 %3473 }
0x1970   :  { %v3476_v36 = vunpack.i.h.bf16 %v3474_v54  ;;  %v3475_v4 = vunpack.i.l.bf16 %v3474_v54 }
0x19a8   :  { %v3479_v41 = vpop.permute.xlu1 %3478 }
0x19a9   :  { %v3481_v22 = vunpack.i.h.bf16 %v3479_v41  ;;  %v3480_v14 = vunpack.i.l.bf16 %v3479_v41 }
0x19ab   :  { %v1990_v37 = vsel %vm130_vm0, %v3475_v4, %v3480_v14  ;;  %v1991_v7 = vsel %vm130_vm0, %v3476_v36, %v3481_v22 }
0x19ac   :  { %v1992_v61 = vpack.c.bf16 %v1991_v7, %v1990_v37 }
0x19ae   :  { %3360 = vmatmul.mubr.msk.bf16.vlgmr.msra.gmra.mrb[40].mxu0 %vm444_vm1, %v1992_v61 }
0x19af   :  { %2206 = vmatpush1.bf16.msra.mxu0 %v5119_v26  ;;  %2237 = vmatprep.mubr.bf16.mxu0 %v4105_v1 }
0x19b0   :  { %2207 = vmatprep.subr.bf16.mxu0 %v5125_v32 }
0x19b3   :  { %2208 = vmatpush1.bf16.msra.mxu0 %v5132_v2 }
0x19b4   :  { %2209 = vmatprep.subr.bf16.mxu0 %v5139_v9 }
0x19b7   :  { %2210 = vmatpush1.bf16.msra.mxu0 %v5146_v44 }
0x19b8   :  { %2211 = vmatprep.subr.bf16.mxu0 %v5165_v34 }
0x19bb   :  { %2212 = vmatpush1.bf16.msra.mxu0 %v5170_v40 }
0x19bc   :  { %2374 = vmatprep.subr.bf16.mxu0 %v5114_v38 }
0x1a81   :  { %v2070_v51 = vpop.f32.mrb[40].mxu0 }
0x1a82   :  { %v2079_v46 = vadd.f32 %v2070_v51, %v4990_v25  ;;  %v2072_v29 = vpop.f32.mrb[41].mxu0 }
0x1a83   :  { %v2081_v48 = vadd.f32 %v2072_v29, %v5055_v15  ;;  %v2074_v45 = vpop.f32.mrb[42].mxu0 }
0x1a84   :  { %3880 = vtanh.f32 %v2079_v46  ;;  %v2080_v21 = vadd.f32 %v2074_v45, %v4996_v5  ;;  %v2076_v3 = vpop.f32.mrb[43].mxu0  ;;  %v3361_v15 = vmul.f32 -1.442695, %v2079_v46 }
0x1a85   :  { %v2082_v55 = vadd.f32 %v2076_v3, %v5061_v27  ;;  %3882 = vtanh.f32 %v2081_v48  ;;  %v3363_v5 = vmul.f32 -1.442695, %v2081_v48 }
0x1a86   :  { %3884 = vtanh.f32 %v2080_v21  ;;  %v3362_v41 = vmul.f32 -1.442695, %v2080_v21 }
0x1a87   :  { %3886 = vtanh.f32 %v2082_v55  ;;  %v3364_v27 = vmul.f32 -1.442695, %v2082_v55 }
0x1a88   :  { %3888 = vpow2.f32 %v3361_v15 }
0x1a89   :  { %3890 = vpow2.f32 %v3363_v5 }
0x1a8a   :  { %3892 = vpow2.f32 %v3362_v41 }
0x1a8b   :  { %3894 = vpow2.f32 %v3364_v27 }
0x1a8e   :  { %v3881_v58 = vpop.eup %3880 }
0x1a8f   :  { %2101 = vrot.lane.b32.xlu0 %v3881_v58, %s4106_s0  ;;  %v3883_v43 = vpop.eup %3882 }
0x1a90   :  { %v3885_v54 = vpop.eup %3884 }
0x1a91   :  { %2103 = vrot.lane.b32.xlu1 %v3885_v54, %s4106_s0  ;;  %v3887_v25 = vpop.eup %3886 }
0x1a92   :  { %v3889_v36 = vpop.eup %3888 }
0x1a93   :  { %2149 = vrot.lane.b32.xlu0 %v3883_v43, %s4106_s0  ;;  %v2089_v4 = vadd.f32 1.0, %v3889_v36  ;;  %v3891_v22 = vpop.eup %3890 }
0x1a94   :  { %v3893_v14 = vpop.eup %3892  ;;  %v2137_v37 = vadd.f32 1.0, %v3891_v22 }
0x1a95   :  { %2151 = vrot.lane.b32.xlu1 %v3887_v25, %s4106_s0  ;;  %3896 = vrcp.f32 %v2089_v4  ;;  %v2090_v7 = vadd.f32 1.0, %v3893_v14  ;;  %v3895_v61 = vpop.eup %3894 }
0x1a96   :  { %3898 = vrcp.f32 %v2137_v37  ;;  %v2138_v51 = vadd.f32 1.0, %v3895_v61 }
0x1a97   :  { %3900 = vrcp.f32 %v2090_v7 }
0x1a98   :  { %3902 = vrcp.f32 %v2138_v51 }
0x1a9f   :  { %v3897_v46 = vpop.eup %3896 }
0x1aa0   :  { %v3899_v45 = vpop.eup %3898  ;;  %v2097_v5 = vmul.f32 %v3897_v46, %v5092_v39 }
0x1aa1   :  { %v3901_v3 = vpop.eup %3900  ;;  %v2145_v36 = vmul.f32 %v3899_v45, %v5102_v56 }
0x1aa2   :  { %v3903_v54 = vpop.eup %3902  ;;  %v2098_v4 = vmul.f32 %v3901_v3, %v5096_v47 }
0x1aa3   :  { %v2146_v39 = vmul.f32 %v3903_v54, %v5106_v20 }
0x1b01   :  { %v2102_v29 = vpop.permute.xlu0 %2101 }
0x1b02   :  { %v2107_v48 = vmul.f32 %v3897_v46, %v2102_v29 }
0x1b03   :  { %v2104_v55 = vpop.permute.xlu1 %2103 }
0x1b04   :  { %2111 = vrot.lane.b32.xlu0 %v2107_v48, %s4106_s0  ;;  %v2108_v43 = vmul.f32 %v3901_v3, %v2104_v55 }
0x1b05   :  { %v2150_v21 = vpop.permute.xlu0 %2149 }
0x1b06   :  { %v2155_v58 = vmul.f32 %v3899_v45, %v2150_v21  ;;  %2113 = vrot.lane.b32.xlu1 %v2108_v43, %s4106_s0 }
0x1b07   :  { %v2152_v25 = vpop.permute.xlu1 %2151 }
0x1b08   :  { %2159 = vrot.lane.b32.xlu0 %v2155_v58, %s4106_s0  ;;  %v2156_v15 = vmul.f32 %v3903_v54, %v2152_v25 }
0x1b0a   :  { %2161 = vrot.lane.b32.xlu1 %v2156_v15, %s4106_s0 }
0x1b76   :  { %v2112_v41 = vpop.permute.xlu0 %2111 }
0x1b77   :  { %v5212_v27 = vadd.f32 %v2112_v41, %v2097_v5 }
0x1b78   :  { %v2114_v14 = vpop.permute.xlu1 %2113 }
0x1b79   :  { %3904 = vtanh.f32 %v5212_v27  ;;  %v5219_v7 = vadd.f32 %v2114_v14, %v2098_v4 }
0x1b7a   :  { %v2160_v22 = vpop.permute.xlu0 %2159 }
0x1b7b   :  { %v5217_v37 = vadd.f32 %v2160_v22, %v2145_v36 }
0x1b7c   :  { %v2162_v61 = vpop.permute.xlu1 %2161 }
0x1b7d   :  { %3906 = vtanh.f32 %v5217_v37  ;;  %v5224_v51 = vadd.f32 %v2162_v61, %v2146_v39 }
0x1b7e   :  { %3908 = vtanh.f32 %v5219_v7 }
0x1b7f   :  { %3910 = vtanh.f32 %v5224_v51 }
0x1b83   :  { %v3905_v56 = vpop.eup %3904 }
0x1b84   :  { %2123 = vrot.lane.b32.xlu0 %v3905_v56, %s4106_s0 }
0x1b87   :  { %v3907_v47 = vpop.eup %3906 }
0x1b88   :  { %v3909_v29 = vpop.eup %3908  ;;  %2171 = vrot.lane.b32.xlu0 %v3907_v47, %s4106_s0 }
0x1b89   :  { %2125 = vrot.lane.b32.xlu1 %v3909_v29, %s4106_s0  ;;  %v3911_v48 = vpop.eup %3910 }
0x1b8d   :  { %2173 = vrot.lane.b32.xlu1 %v3911_v48, %s4106_s0 }
0x1bf6   :  { %v2124_v21 = vpop.permute.xlu0 %2123 }
0x1bf7   :  { %v5231_v20 = vmul.f32 %v3897_v46, %v2124_v21 }
0x1bfa   :  { %v2172_v43 = vpop.permute.xlu0 %2171 }
0x1bfb   :  { %v2126_v55 = vpop.permute.xlu1 %2125  ;;  %v5237_v5 = vmul.f32 %v3899_v45, %v2172_v43 }
0x1bfc   :  { %v5233_v58 = vmul.f32 %v3901_v3, %v2126_v55 }
0x1bfe   :  { %v3482_v25 = vpack.i.bf16 %v5233_v58, %v5231_v20 }
0x1bff   :  { %v2174_v15 = vpop.permute.xlu1 %2173 }
0x1c00   :  { %v5239_v41 = vmul.f32 %v3903_v54, %v2174_v15  ;;  %3483 = vrot.lane.b32.xlu0 %v3482_v25, %s4107_s28 }
0x1c02   :  { %v3487_v36 = vpack.i.bf16 %v5239_v41, %v5237_v5 }
0x1c04   :  { %3488 = vrot.lane.b32.xlu1 %v3487_v36, %s4108_s2 }
0x1c72   :  { %v3484_v46 = vpop.permute.xlu0 %3483 }
0x1c73   :  { %v3486_v3 = vunpack.i.h.bf16 %v3484_v46  ;;  %v3485_v22 = vunpack.i.l.bf16 %v3484_v46 }
0x1c76   :  { %v3489_v4 = vpop.permute.xlu1 %3488 }
0x1c77   :  { %v3491_v14 = vunpack.i.h.bf16 %v3489_v4  ;;  %v3490_v39 = vunpack.i.l.bf16 %v3489_v4 }
0x1c79   :  { %v2196_v61 = vsel %vm130_vm0, %v3486_v3, %v3491_v14  ;;  %v2195_v45 = vsel %vm130_vm0, %v3485_v22, %v3490_v39 }
0x1c7a   :  { %v2197_v56 = vpack.c.bf16 %v2196_v61, %v2195_v45 }
0x1c7c   :  { %3365 = vmatmul.mubr.msk.bf16.vlgmr.msra.gmra.mrb[44].mxu0 %vm444_vm1, %v2197_v56 }
0x1c7d   :  { %2375 = vmatpush1.bf16.msra.mxu0 %v5119_v26  ;;  %2406 = vmatprep.mubr.bf16.mxu0 %v4105_v1 }
0x1c7e   :  { %2376 = vmatprep.subr.bf16.mxu0 %v5125_v32 }
0x1c81   :  { %2377 = vmatpush1.bf16.msra.mxu0 %v5132_v2 }
0x1c82   :  { %2378 = vmatprep.subr.bf16.mxu0 %v5139_v9 }
0x1c85   :  { %2379 = vmatpush1.bf16.msra.mxu0 %v5146_v44 }
0x1c86   :  { %2380 = vmatprep.subr.bf16.mxu0 %v5165_v34 }
0x1c89   :  { %2381 = vmatpush1.bf16.msra.mxu0 %v5170_v40 }
0x1c8a   :  { %2543 = vmatprep.subr.bf16.mxu0 %v5114_v38 }
0x1d4f   :  { %v2239_v54 = vpop.f32.mrb[44].mxu0 }
0x1d50   :  { %v2248_v47 = vadd.f32 %v2239_v54, %v5003_v33  ;;  %v2241_v29 = vpop.f32.mrb[45].mxu0 }
0x1d51   :  { %v2250_v48 = vadd.f32 %v2241_v29, %v5043_v63  ;;  %v2243_v21 = vpop.f32.mrb[46].mxu0 }
0x1d52   :  { %3912 = vtanh.f32 %v2248_v47  ;;  %v2249_v55 = vadd.f32 %v2243_v21, %v5010_v28  ;;  %v2245_v43 = vpop.f32.mrb[47].mxu0  ;;  %v3366_v63 = vmul.f32 -1.442695, %v2248_v47 }
0x1d53   :  { %v2251_v25 = vadd.f32 %v2245_v43, %v5049_v16  ;;  %3914 = vtanh.f32 %v2250_v48  ;;  %v3368_v28 = vmul.f32 -1.442695, %v2250_v48 }
0x1d54   :  { %3916 = vtanh.f32 %v2249_v55  ;;  %v3367_v4 = vmul.f32 -1.442695, %v2249_v55 }
0x1d55   :  { %3918 = vtanh.f32 %v2251_v25  ;;  %v3369_v16 = vmul.f32 -1.442695, %v2251_v25 }
0x1d56   :  { %3920 = vpow2.f32 %v3366_v63 }
0x1d57   :  { %3922 = vpow2.f32 %v3368_v28 }
0x1d58   :  { %3924 = vpow2.f32 %v3367_v4 }
0x1d59   :  { %3926 = vpow2.f32 %v3369_v16 }
0x1d5c   :  { %v3913_v15 = vpop.eup %3912 }
0x1d5d   :  { %2270 = vrot.lane.b32.xlu0 %v3913_v15, %s4106_s0  ;;  %v3915_v36 = vpop.eup %3914 }
0x1d5e   :  { %v3917_v46 = vpop.eup %3916 }
0x1d5f   :  { %2272 = vrot.lane.b32.xlu1 %v3917_v46, %s4106_s0  ;;  %v3919_v33 = vpop.eup %3918 }
0x1d60   :  { %v3921_v3 = vpop.eup %3920 }
0x1d61   :  { %2318 = vrot.lane.b32.xlu0 %v3915_v36, %s4106_s0  ;;  %v2258_v22 = vadd.f32 1.0, %v3921_v3  ;;  %v3923_v14 = vpop.eup %3922 }
0x1d62   :  { %v3925_v39 = vpop.eup %3924  ;;  %v2306_v61 = vadd.f32 1.0, %v3923_v14 }
0x1d63   :  { %2320 = vrot.lane.b32.xlu1 %v3919_v33, %s4106_s0  ;;  %3928 = vrcp.f32 %v2258_v22  ;;  %v2259_v45 = vadd.f32 1.0, %v3925_v39  ;;  %v3927_v56 = vpop.eup %3926 }
0x1d64   :  { %3930 = vrcp.f32 %v2306_v61  ;;  %v2307_v54 = vadd.f32 1.0, %v3927_v56 }
0x1d65   :  { %3932 = vrcp.f32 %v2259_v45 }
0x1d66   :  { %3934 = vrcp.f32 %v2307_v54 }
0x1d6d   :  { %v3929_v47 = vpop.eup %3928 }
0x1d6e   :  { %v3931_v21 = vpop.eup %3930  ;;  %v2266_v28 = vmul.f32 %v3929_v47, %v5212_v27 }
0x1d6f   :  { %v3933_v43 = vpop.eup %3932  ;;  %v2314_v3 = vmul.f32 %v3931_v21, %v5217_v37 }
0x1d70   :  { %v3935_v46 = vpop.eup %3934  ;;  %v2267_v22 = vmul.f32 %v3933_v43, %v5219_v7 }
0x1d71   :  { %v2315_v27 = vmul.f32 %v3935_v46, %v5224_v51  ;;  %v2198_v51 = vmax.f32 %v5150_v57, %v5231_v20  ;;  %v2201_v57 = vmax.f32 %v5182_v19, %v5239_v41 }
0x1dcf   :  { %v2271_v29 = vpop.permute.xlu0 %2270 }
0x1dd0   :  { %v2276_v48 = vmul.f32 %v3929_v47, %v2271_v29 }
0x1dd1   :  { %v2273_v25 = vpop.permute.xlu1 %2272 }
0x1dd2   :  { %2280 = vrot.lane.b32.xlu0 %v2276_v48, %s4106_s0  ;;  %v2277_v36 = vmul.f32 %v3933_v43, %v2273_v25 }
0x1dd3   :  { %v2319_v55 = vpop.permute.xlu0 %2318 }
0x1dd4   :  { %v2324_v15 = vmul.f32 %v3931_v21, %v2319_v55  ;;  %2282 = vrot.lane.b32.xlu1 %v2277_v36, %s4106_s0 }
0x1dd5   :  { %v2321_v33 = vpop.permute.xlu1 %2320 }
0x1dd6   :  { %2328 = vrot.lane.b32.xlu0 %v2324_v15, %s4106_s0  ;;  %v2325_v63 = vmul.f32 %v3935_v46, %v2321_v33  ;;  %v2200_v33 = vmax.f32 %v5179_v12, %v5237_v5 }
0x1dd8   :  { %2330 = vrot.lane.b32.xlu1 %v2325_v63, %s4106_s0 }
0x1e44   :  { %v2281_v4 = vpop.permute.xlu0 %2280 }
0x1e45   :  { %v5270_v16 = vadd.f32 %v2281_v4, %v2266_v28  ;;  %v2199_v4 = vmax.f32 %v5153_v52, %v5233_v58 }
0x1e46   :  { %v2283_v39 = vpop.permute.xlu1 %2282 }
0x1e47   :  { %3936 = vtanh.f32 %v5270_v16  ;;  %v5277_v45 = vadd.f32 %v2283_v39, %v2267_v22 }
0x1e48   :  { %v2329_v14 = vpop.permute.xlu0 %2328 }
0x1e49   :  { %v5275_v61 = vadd.f32 %v2329_v14, %v2314_v3 }
0x1e4a   :  { %v2331_v56 = vpop.permute.xlu1 %2330 }
0x1e4b   :  { %3938 = vtanh.f32 %v5275_v61  ;;  %v5282_v54 = vadd.f32 %v2331_v56, %v2315_v27 }
0x1e4c   :  { %3940 = vtanh.f32 %v5277_v45 }
0x1e4d   :  { %3942 = vtanh.f32 %v5282_v54 }
0x1e51   :  { %v3937_v37 = vpop.eup %3936 }
0x1e52   :  { %2292 = vrot.lane.b32.xlu0 %v3937_v37, %s4106_s0 }
0x1e55   :  { %v3939_v7 = vpop.eup %3938 }
0x1e56   :  { %v3941_v29 = vpop.eup %3940  ;;  %2340 = vrot.lane.b32.xlu0 %v3939_v7, %s4106_s0 }
0x1e57   :  { %2294 = vrot.lane.b32.xlu1 %v3941_v29, %s4106_s0  ;;  %v3943_v48 = vpop.eup %3942 }
0x1e5b   :  { %2342 = vrot.lane.b32.xlu1 %v3943_v48, %s4106_s0 }
0x1ec4   :  { %v2293_v55 = vpop.permute.xlu0 %2292 }
0x1ec5   :  { %v2298_v25 = vmul.f32 %v3929_v47, %v2293_v55 }
0x1ec7   :  { %v5291_v15 = vmax.f32 %v2198_v51, %v2298_v25 }
0x1ec8   :  { %v2341_v36 = vpop.permute.xlu0 %2340 }
0x1ec9   :  { %v2295_v63 = vpop.permute.xlu1 %2294  ;;  %v2346_v28 = vmul.f32 %v3931_v21, %v2341_v36 }
0x1eca   :  { %v2299_v3 = vmul.f32 %v3933_v43, %v2295_v63 }
0x1ecb   :  { %v5297_v22 = vmax.f32 %v2200_v33, %v2346_v28 }
0x1ecc   :  { %v3492_v14 = vpack.i.bf16 %v2299_v3, %v2298_v25  ;;  %v5299_v39 = vmax.f32 %v2199_v4, %v2299_v3 }
0x1ecd   :  { %v2343_v27 = vpop.permute.xlu1 %2342 }
0x1ece   :  { %v2347_v20 = vmul.f32 %v3935_v46, %v2343_v27  ;;  %3493 = vrot.lane.b32.xlu0 %v3492_v14, %s4107_s28 }
0x1ed0   :  { %v3497_v47 = vpack.i.bf16 %v2347_v20, %v2346_v28  ;;  %v5304_v12 = vmax.f32 %v2201_v57, %v2347_v20 }
0x1ed2   :  { %3498 = vrot.lane.b32.xlu1 %v3497_v47, %s4108_s2 }
0x1f40   :  { %v3494_v5 = vpop.permute.xlu0 %3493 }
0x1f41   :  { %v3496_v58 = vunpack.i.h.bf16 %v3494_v5  ;;  %v3495_v21 = vunpack.i.l.bf16 %v3494_v5 }
0x1f44   :  { %v3499_v52 = vpop.permute.xlu1 %3498 }
0x1f45   :  { %v3501_v43 = vunpack.i.h.bf16 %v3499_v52  ;;  %v3500_v56 = vunpack.i.l.bf16 %v3499_v52 }
0x1f47   :  { %v2365_v37 = vsel %vm130_vm0, %v3496_v58, %v3501_v43  ;;  %v2364_v7 = vsel %vm130_vm0, %v3495_v21, %v3500_v56 }
0x1f48   :  { %v2366_v29 = vpack.c.bf16 %v2365_v37, %v2364_v7 }
0x1f4a   :  { %3370 = vmatmul.mubr.msk.bf16.vlgmr.msra.gmra.mrb[48].mxu0 %vm444_vm1, %v2366_v29 }
0x1f4b   :  { %2544 = vmatpush1.bf16.msra.mxu0 %v5119_v26  ;;  %2575 = vmatprep.mubr.bf16.mxu0 %v4105_v1 }
0x1f4c   :  { %2545 = vmatprep.subr.bf16.mxu0 %v5125_v32 }
0x1f4f   :  { %2546 = vmatpush1.bf16.msra.mxu0 %v5132_v2 }
0x1f50   :  { %2547 = vmatprep.subr.bf16.mxu0 %v5139_v9 }
0x1f53   :  { %2548 = vmatpush1.bf16.msra.mxu0 %v5146_v44 }
0x1f54   :  { %2549 = vmatprep.subr.bf16.mxu0 %v5165_v34 }
0x1f57   :  { %2550 = vmatpush1.bf16.msra.mxu0 %v5170_v40 }
0x1f58   :  { %2881 = vmatprep.subr.bf16.mxu0 %v5114_v38 }
0x201d   :  { %v2408_v19 = vpop.f32.mrb[48].mxu0 }
0x201e   :  { %v2417_v41 = vadd.f32 %v2408_v19, %v5016_v24  ;;  %v2410_v46 = vpop.f32.mrb[49].mxu0 }
0x201f   :  { %v2419_v48 = vadd.f32 %v2410_v46, %v5031_v62  ;;  %v2412_v55 = vpop.f32.mrb[50].mxu0 }
0x2020   :  { %3944 = vtanh.f32 %v2417_v41  ;;  %v2418_v51 = vadd.f32 %v2412_v55, %v5022_v50  ;;  %v2414_v25 = vpop.f32.mrb[51].mxu0  ;;  %v3371_v62 = vmul.f32 -1.442695, %v2417_v41 }
0x2021   :  { %v2420_v36 = vadd.f32 %v2414_v25, %v5037_v11  ;;  %3946 = vtanh.f32 %v2419_v48  ;;  %v3373_v50 = vmul.f32 -1.442695, %v2419_v48 }
0x2022   :  { %3948 = vtanh.f32 %v2418_v51  ;;  %v3372_v28 = vmul.f32 -1.442695, %v2418_v51 }
0x2023   :  { %3950 = vtanh.f32 %v2420_v36  ;;  %v3374_v11 = vmul.f32 -1.442695, %v2420_v36 }
0x2024   :  { %3952 = vpow2.f32 %v3371_v62 }
0x2025   :  { %3954 = vpow2.f32 %v3373_v50 }
0x2026   :  { %3956 = vpow2.f32 %v3372_v28 }
0x2027   :  { %3958 = vpow2.f32 %v3374_v11 }
0x202a   :  { %v3945_v33 = vpop.eup %3944 }
0x202b   :  { %2439 = vrot.lane.b32.xlu0 %v3945_v33, %s4106_s0  ;;  %v3947_v38 = vpop.eup %3946 }
0x202c   :  { %v3949_v63 = vpop.eup %3948 }
0x202d   :  { %2441 = vrot.lane.b32.xlu1 %v3949_v63, %s4106_s0  ;;  %v3951_v24 = vpop.eup %3950 }
0x202e   :  { %v3953_v4 = vpop.eup %3952 }
0x202f   :  { %2487 = vrot.lane.b32.xlu0 %v3947_v38, %s4106_s0  ;;  %v2427_v3 = vadd.f32 1.0, %v3953_v4  ;;  %v3955_v14 = vpop.eup %3954 }
0x2030   :  { %v3957_v27 = vpop.eup %3956  ;;  %v2475_v57 = vadd.f32 1.0, %v3955_v14 }
0x2031   :  { %2489 = vrot.lane.b32.xlu1 %v3951_v24, %s4106_s0  ;;  %3960 = vrcp.f32 %v2427_v3  ;;  %v2428_v20 = vadd.f32 1.0, %v3957_v27  ;;  %v3959_v47 = vpop.eup %3958 }
0x2032   :  { %3962 = vrcp.f32 %v2475_v57  ;;  %v2476_v5 = vadd.f32 1.0, %v3959_v47 }
0x2033   :  { %3964 = vrcp.f32 %v2428_v20 }
0x2034   :  { %3966 = vrcp.f32 %v2476_v5 }
0x203b   :  { %v3961_v52 = vpop.eup %3960 }
0x203c   :  { %v3963_v43 = vpop.eup %3962  ;;  %v2435_v55 = vmul.f32 %v3961_v52, %v5270_v16 }
0x203d   :  { %v3965_v37 = vpop.eup %3964  ;;  %v2483_v36 = vmul.f32 %v3963_v43, %v5275_v61 }
0x203e   :  { %v3967_v41 = vpop.eup %3966  ;;  %v2436_v33 = vmul.f32 %v3965_v37, %v5277_v45 }
0x203f   :  { %v2484_v16 = vmul.f32 %v3967_v41, %v5282_v54 }
0x209d   :  { %v2440_v58 = vpop.permute.xlu0 %2439 }
0x209e   :  { %v2445_v21 = vmul.f32 %v3961_v52, %v2440_v58 }
0x209f   :  { %v2442_v7 = vpop.permute.xlu1 %2441 }
0x20a0   :  { %2449 = vrot.lane.b32.xlu0 %v2445_v21, %s4106_s0  ;;  %v2446_v19 = vmul.f32 %v3965_v37, %v2442_v7 }
0x20a1   :  { %v2488_v56 = vpop.permute.xlu0 %2487 }
0x20a2   :  { %v2493_v29 = vmul.f32 %v3963_v43, %v2488_v56  ;;  %2451 = vrot.lane.b32.xlu1 %v2446_v19, %s4106_s0 }
0x20a3   :  { %v2490_v46 = vpop.permute.xlu1 %2489 }
0x20a4   :  { %2497 = vrot.lane.b32.xlu0 %v2493_v29, %s4106_s0  ;;  %v2494_v48 = vmul.f32 %v3967_v41, %v2490_v46 }
0x20a6   :  { %2499 = vrot.lane.b32.xlu1 %v2494_v48, %s4106_s0 }
0x2112   :  { %v2450_v51 = vpop.permute.xlu0 %2449 }
0x2113   :  { %v5332_v25 = vadd.f32 %v2450_v51, %v2435_v55 }
0x2114   :  { %v2452_v63 = vpop.permute.xlu1 %2451 }
0x2115   :  { %3968 = vtanh.f32 %v5332_v25  ;;  %v5339_v62 = vadd.f32 %v2452_v63, %v2436_v33 }
0x2116   :  { %v2498_v38 = vpop.permute.xlu0 %2497 }
0x2117   :  { %v5337_v24 = vadd.f32 %v2498_v38, %v2483_v36 }
0x2118   :  { %v2500_v50 = vpop.permute.xlu1 %2499 }
0x2119   :  { %3970 = vtanh.f32 %v5337_v24  ;;  %v5344_v28 = vadd.f32 %v2500_v50, %v2484_v16 }
0x211a   :  { %3972 = vtanh.f32 %v5339_v62 }
0x211b   :  { %3974 = vtanh.f32 %v5344_v28 }
0x211f   :  { %v3969_v61 = vpop.eup %3968 }
0x2120   :  { %2461 = vrot.lane.b32.xlu0 %v3969_v61, %s4106_s0 }
0x2123   :  { %v3971_v45 = vpop.eup %3970 }
0x2124   :  { %v3973_v11 = vpop.eup %3972  ;;  %2509 = vrot.lane.b32.xlu0 %v3971_v45, %s4106_s0 }
0x2125   :  { %2463 = vrot.lane.b32.xlu1 %v3973_v11, %s4106_s0  ;;  %v3975_v4 = vpop.eup %3974 }
0x2129   :  { %2511 = vrot.lane.b32.xlu1 %v3975_v4, %s4106_s0 }
0x2192   :  { %v2462_v3 = vpop.permute.xlu0 %2461 }
0x2193   :  { %v5351_v14 = vmul.f32 %v3961_v52, %v2462_v3 }
0x2195   :  { %v2536_v54 = vmax.f32 %v5291_v15, %v5351_v14 }
0x2196   :  { %v2510_v27 = vpop.permute.xlu0 %2509 }
0x2197   :  { %v2464_v57 = vpop.permute.xlu1 %2463  ;;  %v5355_v20 = vmul.f32 %v3963_v43, %v2510_v27 }
0x2198   :  { %v5357_v47 = vmul.f32 %v3965_v37, %v2464_v57 }
0x2199   :  { %v2538_v5 = vmax.f32 %v5297_v22, %v5355_v20 }
0x219a   :  { %v3502_v58 = vpack.i.bf16 %v5357_v47, %v5351_v14  ;;  %v2537_v21 = vmax.f32 %v5299_v39, %v5357_v47 }
0x219b   :  { %v2512_v52 = vpop.permute.xlu1 %2511 }
0x219c   :  { %v5365_v56 = vmul.f32 %v3967_v41, %v2512_v52  ;;  %3503 = vrot.lane.b32.xlu0 %v3502_v58, %s4107_s28 }
0x219e   :  { %v3507_v43 = vpack.i.bf16 %v5365_v56, %v5355_v20  ;;  %v2539_v37 = vmax.f32 %v5304_v12, %v5365_v56  ;;  %v4104_v12 = vld [vmem:[%s5620_s5] ss:$8 sps:$4 sm:$0xff]  }
0x21a0   :  { %3508 = vrot.lane.b32.xlu1 %v3507_v43, %s4108_s2 }
0x220e   :  { %v3504_v7 = vpop.permute.xlu0 %3503 }
0x220f   :  { %v3506_v19 = vunpack.i.h.bf16 %v3504_v7  ;;  %v3505_v46 = vunpack.i.l.bf16 %v3504_v7 }
0x2212   :  { %v3509_v29 = vpop.permute.xlu1 %3508 }
0x2213   :  { %v3511_v48 = vunpack.i.h.bf16 %v3509_v29  ;;  %v3510_v55 = vunpack.i.l.bf16 %v3509_v29 }
0x2215   :  { %v2534_v51 = vsel %vm130_vm0, %v3506_v19, %v3511_v48  ;;  %v2533_v41 = vsel %vm130_vm0, %v3505_v46, %v3510_v55 }
0x2216   :  { %v2535_v36 = vpack.c.bf16 %v2534_v51, %v2533_v41 }
0x2218   :  { %3375 = vmatmul.mubr.msk.bf16.vlgmr.msra.gmra.mrb[52].mxu0 %vm444_vm1, %v2535_v36 }
0x2219   :  { %2882 = vmatpush1.bf16.msra.mxu0 %v5119_v26  ;;  %2913 = vmatprep.mubr.bf16.mxu0 %v4105_v1 }
0x221a   :  { %2883 = vmatprep.subr.bf16.mxu0 %v5125_v32 }
0x221d   :  { %2884 = vmatpush1.bf16.msra.mxu0 %v5132_v2 }
0x221e   :  { %2885 = vmatprep.subr.bf16.mxu0 %v5139_v9 }
0x2221   :  { %2886 = vmatpush1.bf16.msra.mxu0 %v5146_v44 }
0x2222   :  { %2887 = vmatprep.subr.bf16.mxu0 %v5165_v34 }
0x2225   :  { %2888 = vmatpush1.bf16.msra.mxu0 %v5170_v40 }
0x22eb   :  { %v2577_v33 = vpop.f32.mrb[52].mxu0 }
0x22ec   :  { %v2586_v38 = vadd.f32 %v2577_v33, %v5028_v0  ;;  %v2579_v63 = vpop.f32.mrb[53].mxu0 }
0x22ed   :  { %v2588_v26 = vadd.f32 %v2579_v63, %v5019_v6  ;;  %v2581_v16 = vpop.f32.mrb[54].mxu0 }
0x22ee   :  { %3976 = vtanh.f32 %v2586_v38  ;;  %v2587_v50 = vadd.f32 %v2581_v16, %v5034_v17  ;;  %v2583_v61 = vpop.f32.mrb[55].mxu0  ;;  %v3376_v0 = vmul.f32 -1.442695, %v2586_v38 }
0x22ef   :  { %v2589_v45 = vadd.f32 %v2583_v61, %v5025_v60  ;;  %3978 = vtanh.f32 %v2588_v26  ;;  %v3378_v17 = vmul.f32 -1.442695, %v2588_v26 }
0x22f0   :  { %3980 = vtanh.f32 %v2587_v50  ;;  %v3377_v27 = vmul.f32 -1.442695, %v2587_v50 }
0x22f1   :  { %3982 = vtanh.f32 %v2589_v45  ;;  %v3379_v60 = vmul.f32 -1.442695, %v2589_v45 }
0x22f2   :  { %3984 = vpow2.f32 %v3376_v0 }
0x22f3   :  { %3986 = vpow2.f32 %v3378_v17 }
0x22f4   :  { %3988 = vpow2.f32 %v3377_v27 }
0x22f5   :  { %3990 = vpow2.f32 %v3379_v60 }
0x22f8   :  { %v3977_v11 = vpop.eup %3976 }
0x22f9   :  { %2608 = vrot.lane.b32.xlu0 %v3977_v11, %s4106_s0  ;;  %v3979_v4 = vpop.eup %3978 }
0x22fa   :  { %v3981_v3 = vpop.eup %3980 }
0x22fb   :  { %2610 = vrot.lane.b32.xlu1 %v3981_v3, %s4106_s0  ;;  %v3983_v6 = vpop.eup %3982 }
0x22fc   :  { %v3985_v57 = vpop.eup %3984 }
0x22fd   :  { %2656 = vrot.lane.b32.xlu0 %v3979_v4, %s4106_s0  ;;  %v2596_v58 = vadd.f32 1.0, %v3985_v57  ;;  %v3987_v52 = vpop.eup %3986 }
0x22fe   :  { %v3989_v43 = vpop.eup %3988  ;;  %v2644_v7 = vadd.f32 1.0, %v3987_v52 }
0x22ff   :  { %2658 = vrot.lane.b32.xlu1 %v3983_v6, %s4106_s0  ;;  %3992 = vrcp.f32 %v2596_v58  ;;  %v2597_v29 = vadd.f32 1.0, %v3989_v43  ;;  %v3991_v19 = vpop.eup %3990 }
0x2300   :  { %3994 = vrcp.f32 %v2644_v7  ;;  %v2645_v46 = vadd.f32 1.0, %v3991_v19 }
0x2301   :  { %3996 = vrcp.f32 %v2597_v29 }
0x2302   :  { %3998 = vrcp.f32 %v2645_v46 }
0x2309   :  { %v3993_v48 = vpop.eup %3992 }
0x230a   :  { %v3995_v41 = vpop.eup %3994  ;;  %v2604_v45 = vmul.f32 %v3993_v48, %v5332_v25 }
0x230b   :  { %v3997_v33 = vpop.eup %3996  ;;  %v2652_v3 = vmul.f32 %v3995_v41, %v5337_v24 }
0x230c   :  { %v3999_v16 = vpop.eup %3998  ;;  %v2605_v6 = vmul.f32 %v3997_v33, %v5339_v62 }
0x230d   :  { %v2653_v25 = vmul.f32 %v3999_v16, %v5344_v28 }
0x236b   :  { %v2609_v55 = vpop.permute.xlu0 %2608 }
0x236c   :  { %v2614_v51 = vmul.f32 %v3993_v48, %v2609_v55 }
0x236d   :  { %v2611_v38 = vpop.permute.xlu1 %2610 }
0x236e   :  { %2618 = vrot.lane.b32.xlu0 %v2614_v51, %s4106_s0  ;;  %v2615_v26 = vmul.f32 %v3997_v33, %v2611_v38 }
0x236f   :  { %v2657_v36 = vpop.permute.xlu0 %2656 }
0x2370   :  { %v2662_v63 = vmul.f32 %v3995_v41, %v2657_v36  ;;  %2620 = vrot.lane.b32.xlu1 %v2615_v26, %s4106_s0 }
0x2371   :  { %v2659_v50 = vpop.permute.xlu1 %2658 }
0x2372   :  { %2666 = vrot.lane.b32.xlu0 %v2662_v63, %s4106_s0  ;;  %v2663_v61 = vmul.f32 %v3999_v16, %v2659_v50 }
0x2374   :  { %2668 = vrot.lane.b32.xlu1 %v2663_v61, %s4106_s0 }
0x23e0   :  { %v2619_v11 = vpop.permute.xlu0 %2618 }
0x23e1   :  { %v5397_v4 = vadd.f32 %v2619_v11, %v2604_v45 }
0x23e2   :  { %v2621_v17 = vpop.permute.xlu1 %2620 }
0x23e3   :  { %4000 = vtanh.f32 %v5397_v4  ;;  %v5404_v60 = vadd.f32 %v2621_v17, %v2605_v6 }
0x23e4   :  { %v2667_v0 = vpop.permute.xlu0 %2666 }
0x23e5   :  { %v5402_v27 = vadd.f32 %v2667_v0, %v2652_v3 }
0x23e6   :  { %v2669_v57 = vpop.permute.xlu1 %2668 }
0x23e7   :  { %4002 = vtanh.f32 %v5402_v27  ;;  %v5409_v58 = vadd.f32 %v2669_v57, %v2653_v25 }
0x23e8   :  { %4004 = vtanh.f32 %v5404_v60 }
0x23e9   :  { %4006 = vtanh.f32 %v5409_v58 }
0x23ed   :  { %v4001_v24 = vpop.eup %4000 }
0x23ee   :  { %2630 = vrot.lane.b32.xlu0 %v4001_v24, %s4106_s0 }
0x23f1   :  { %v4003_v62 = vpop.eup %4002 }
0x23f2   :  { %v4005_v52 = vpop.eup %4004  ;;  %2678 = vrot.lane.b32.xlu0 %v4003_v62, %s4106_s0 }
0x23f3   :  { %2632 = vrot.lane.b32.xlu1 %v4005_v52, %s4106_s0  ;;  %v4007_v43 = vpop.eup %4006 }
0x23f7   :  { %2680 = vrot.lane.b32.xlu1 %v4007_v43, %s4106_s0 }
0x2460   :  { %v2631_v7 = vpop.permute.xlu0 %2630 }
0x2461   :  { %v2636_v29 = vmul.f32 %v3993_v48, %v2631_v7 }
0x2463   :  { %v5419_v28 = vmax.f32 %v2536_v54, %v2636_v29 }
0x2464   :  { %v2679_v19 = vpop.permute.xlu0 %2678 }
0x2465   :  { %v2633_v46 = vpop.permute.xlu1 %2632  ;;  %v2684_v55 = vmul.f32 %v3995_v41, %v2679_v19 }
0x2466   :  { %v2637_v51 = vmul.f32 %v3997_v33, %v2633_v46 }
0x2467   :  { %v5424_v36 = vmax.f32 %v2538_v5, %v2684_v55 }
0x2468   :  { %v3512_v38 = vpack.i.bf16 %v2637_v51, %v2636_v29  ;;  %v5429_v63 = vmax.f32 %v2537_v21, %v2637_v51 }
0x2469   :  { %v2681_v48 = vpop.permute.xlu1 %2680 }
0x246a   :  { %v2685_v26 = vmul.f32 %v3999_v16, %v2681_v48  ;;  %3513 = vrot.lane.b32.xlu0 %v3512_v38, %s4107_s28 }
0x246c   :  { %v3517_v15 = vpack.i.bf16 %v2685_v26, %v2684_v55  ;;  %v5435_v14 = vmax.f32 %v2539_v37, %v2685_v26 }
0x246e   :  { %3518 = vrot.lane.b32.xlu1 %v3517_v15, %s4108_s2 }
0x24dc   :  { %v3514_v22 = vpop.permute.xlu0 %3513 }
0x24dd   :  { %v3516_v20 = vunpack.i.h.bf16 %v3514_v22  ;;  %v3515_v5 = vunpack.i.l.bf16 %v3514_v22 }
0x24e0   :  { %v3519_v54 = vpop.permute.xlu1 %3518 }
0x24e1   :  { %v3521_v41 = vunpack.i.h.bf16 %v3519_v54  ;;  %v3520_v39 = vunpack.i.l.bf16 %v3519_v54 }
0x24e3   :  { %v2703_v47 = vsel %vm130_vm0, %v3516_v20, %v3521_v41  ;;  %v2702_v21 = vsel %vm130_vm0, %v3515_v5, %v3520_v39 }
0x24e4   :  { %v2704_v33 = vpack.c.bf16 %v2703_v47, %v2702_v21 }
0x24e6   :  { %3380 = vmatmul.mubr.msk.bf16.vlgmr.msra.gmra.mrb[52].mxu1 %vm444_vm1, %v2704_v33 }
0x24e7   :  { %3051 = vmatpush1.bf16.msra.mxu1 %v4104_v12  ;;  %3082 = vmatprep.mubr.bf16.mxu1 %v4105_v1 }
0x24e8   :  { %3052 = vmatprep.subr.bf16.mxu1 %v5125_v32 }
0x24eb   :  { %3053 = vmatpush1.bf16.msra.mxu1 %v5132_v2 }
0x24ec   :  { %3054 = vmatprep.subr.bf16.mxu1 %v5139_v9 }
0x24ef   :  { %3055 = vmatpush1.bf16.msra.mxu1 %v5146_v44 }
0x24f0   :  { %3056 = vmatprep.subr.bf16.mxu1 %v5165_v34 }
0x24f3   :  { %3057 = vmatpush1.bf16.msra.mxu1 %v5170_v40 }
0x25b9   :  { %v2746_v56 = vpop.f32.mrb[52].mxu1 }
0x25ba   :  { %v2755_v37 = vadd.f32 %v2746_v56, %v5040_v53  ;;  %v2748_v16 = vpop.f32.mrb[53].mxu1 }
0x25bb   :  { %v2757_v50 = vadd.f32 %v2748_v16, %v5007_v42  ;;  %v2750_v61 = vpop.f32.mrb[54].mxu1 }
0x25bc   :  { %4008 = vtanh.f32 %v2755_v37  ;;  %v2756_v1 = vadd.f32 %v2750_v61, %v5046_v49  ;;  %v2752_v32 = vpop.f32.mrb[55].mxu1  ;;  %v3381_v53 = vmul.f32 -1.442695, %v2755_v37 }
0x25bd   :  { %v2758_v2 = vadd.f32 %v2752_v32, %v5013_v10  ;;  %4010 = vtanh.f32 %v2757_v50  ;;  %v3383_v49 = vmul.f32 -1.442695, %v2757_v50 }
0x25be   :  { %4012 = vtanh.f32 %v2756_v1  ;;  %v3382_v40 = vmul.f32 -1.442695, %v2756_v1 }
0x25bf   :  { %4014 = vtanh.f32 %v2758_v2  ;;  %v3384_v10 = vmul.f32 -1.442695, %v2758_v2 }
0x25c0   :  { %4016 = vpow2.f32 %v3381_v53 }
0x25c1   :  { %4018 = vpow2.f32 %v3383_v49 }
0x25c2   :  { %4020 = vpow2.f32 %v3382_v40 }
0x25c3   :  { %4022 = vpow2.f32 %v3384_v10 }
0x25c6   :  { %v4009_v9 = vpop.eup %4008 }
0x25c7   :  { %2777 = vrot.lane.b32.xlu0 %v4009_v9, %s4106_s0  ;;  %v4011_v44 = vpop.eup %4010 }
0x25c8   :  { %v4013_v34 = vpop.eup %4012 }
0x25c9   :  { %2779 = vrot.lane.b32.xlu1 %v4013_v34, %s4106_s0  ;;  %v4015_v42 = vpop.eup %4014 }
0x25ca   :  { %v4017_v45 = vpop.eup %4016 }
0x25cb   :  { %2825 = vrot.lane.b32.xlu0 %v4011_v44, %s4106_s0  ;;  %v2765_v11 = vadd.f32 1.0, %v4017_v45  ;;  %v4019_v3 = vpop.eup %4018 }
0x25cc   :  { %v4021_v6 = vpop.eup %4020  ;;  %v2813_v0 = vadd.f32 1.0, %v4019_v3 }
0x25cd   :  { %2827 = vrot.lane.b32.xlu1 %v4015_v42, %s4106_s0  ;;  %4024 = vrcp.f32 %v2765_v11  ;;  %v2766_v17 = vadd.f32 1.0, %v4021_v6  ;;  %v4023_v25 = vpop.eup %4022 }
0x25ce   :  { %4026 = vrcp.f32 %v2813_v0  ;;  %v2814_v57 = vadd.f32 1.0, %v4023_v25 }
0x25cf   :  { %4028 = vrcp.f32 %v2766_v17 }
0x25d0   :  { %4030 = vrcp.f32 %v2814_v57 }
0x25d7   :  { %v4025_v24 = vpop.eup %4024 }
0x25d8   :  { %v4027_v43 = vpop.eup %4026  ;;  %v2773_v26 = vmul.f32 %v4025_v24, %v5397_v4 }
0x25d9   :  { %v4029_v29 = vpop.eup %4028  ;;  %v2821_v54 = vmul.f32 %v4027_v43, %v5402_v27 }
0x25da   :  { %v4031_v51 = vpop.eup %4030  ;;  %v2774_v20 = vmul.f32 %v4029_v29, %v5404_v60 }
0x25db   :  { %v2822_v4 = vmul.f32 %v4031_v51, %v5409_v58 }
0x2639   :  { %v2778_v62 = vpop.permute.xlu0 %2777 }
0x263a   :  { %v2783_v52 = vmul.f32 %v4025_v24, %v2778_v62 }
0x263b   :  { %v2780_v19 = vpop.permute.xlu1 %2779 }
0x263c   :  { %2787 = vrot.lane.b32.xlu0 %v2783_v52, %s4106_s0  ;;  %v2784_v55 = vmul.f32 %v4029_v29, %v2780_v19 }
0x263d   :  { %v2826_v7 = vpop.permute.xlu0 %2825 }
0x263e   :  { %v2831_v46 = vmul.f32 %v4027_v43, %v2826_v7  ;;  %2789 = vrot.lane.b32.xlu1 %v2784_v55, %s4106_s0 }
0x263f   :  { %v2828_v38 = vpop.permute.xlu1 %2827 }
0x2640   :  { %2835 = vrot.lane.b32.xlu0 %v2831_v46, %s4106_s0  ;;  %v2832_v48 = vmul.f32 %v4031_v51, %v2828_v38 }
0x2642   :  { %2837 = vrot.lane.b32.xlu1 %v2832_v48, %s4106_s0 }
0x26ae   :  { %v2788_v15 = vpop.permute.xlu0 %2787 }
0x26af   :  { %v5464_v22 = vadd.f32 %v2788_v15, %v2773_v26 }
0x26b0   :  { %v2790_v41 = vpop.permute.xlu1 %2789 }
0x26b1   :  { %4032 = vtanh.f32 %v5464_v22  ;;  %v5471_v47 = vadd.f32 %v2790_v41, %v2774_v20 }
0x26b2   :  { %v2836_v5 = vpop.permute.xlu0 %2835 }
0x26b3   :  { %v5469_v39 = vadd.f32 %v2836_v5, %v2821_v54 }
0x26b4   :  { %v2838_v21 = vpop.permute.xlu1 %2837 }
0x26b5   :  { %4034 = vtanh.f32 %v5469_v39  ;;  %v5476_v33 = vadd.f32 %v2838_v21, %v2822_v4 }
0x26b6   :  { %4036 = vtanh.f32 %v5471_v47 }
0x26b7   :  { %4038 = vtanh.f32 %v5476_v33 }
0x26bb   :  { %v4033_v27 = vpop.eup %4032 }
0x26bc   :  { %2799 = vrot.lane.b32.xlu0 %v4033_v27, %s4106_s0 }
0x26bf   :  { %v4035_v60 = vpop.eup %4034 }
0x26c0   :  { %v4037_v12 = vpop.eup %4036  ;;  %2847 = vrot.lane.b32.xlu0 %v4035_v60, %s4106_s0 }
0x26c1   :  { %2801 = vrot.lane.b32.xlu1 %v4037_v12, %s4106_s0  ;;  %v4039_v56 = vpop.eup %4038 }
0x26c5   :  { %2849 = vrot.lane.b32.xlu1 %v4039_v56, %s4106_s0 }
0x272e   :  { %v2800_v37 = vpop.permute.xlu0 %2799 }
0x272f   :  { %v5483_v16 = vmul.f32 %v4025_v24, %v2800_v37 }
0x2731   :  { %v2874_v58 = vmax.f32 %v5419_v28, %v5483_v16 }
0x2732   :  { %v2848_v50 = vpop.permute.xlu0 %2847 }
0x2733   :  { %v2802_v61 = vpop.permute.xlu1 %2801  ;;  %v5487_v1 = vmul.f32 %v4027_v43, %v2848_v50 }
0x2734   :  { %v5489_v32 = vmul.f32 %v4029_v29, %v2802_v61 }
0x2735   :  { %v2876_v2 = vmax.f32 %v5424_v36, %v5487_v1 }
0x2736   :  { %v3522_v9 = vpack.i.bf16 %v5489_v32, %v5483_v16  ;;  %v2875_v44 = vmax.f32 %v5429_v63, %v5489_v32 }
0x2737   :  { %v2850_v34 = vpop.permute.xlu1 %2849 }
0x2738   :  { %v5497_v42 = vmul.f32 %v4031_v51, %v2850_v34  ;;  %3523 = vrot.lane.b32.xlu0 %v3522_v9, %s4107_s28 }
0x273a   :  { %v3527_v53 = vpack.i.bf16 %v5497_v42, %v5487_v1  ;;  %v2877_v49 = vmax.f32 %v5435_v14, %v5497_v42 }
0x273c   :  { %3528 = vrot.lane.b32.xlu1 %v3527_v53, %s4108_s2 }
0x27aa   :  { %v3524_v40 = vpop.permute.xlu0 %3523 }
0x27ab   :  { %v3526_v45 = vunpack.i.h.bf16 %v3524_v40  ;;  %v3525_v11 = vunpack.i.l.bf16 %v3524_v40 }
0x27ae   :  { %v3529_v10 = vpop.permute.xlu1 %3528 }
0x27af   :  { %v3531_v3 = vunpack.i.h.bf16 %v3529_v10  ;;  %v3530_v6 = vunpack.i.l.bf16 %v3529_v10 }
0x27b1   :  { %v2872_v0 = vsel %vm130_vm0, %v3526_v45, %v3531_v3  ;;  %v2871_v17 = vsel %vm130_vm0, %v3525_v11, %v3530_v6 }
0x27b2   :  { %v2873_v25 = vpack.c.bf16 %v2872_v0, %v2871_v17 }
0x27b4   :  { %3385 = vmatmul.mubr.msk.bf16.vlgmr.msra.gmra.mrb[56].mxu0 %vm444_vm1, %v2873_v25 }
0x2887   :  { %v2915_v57 = vpop.f32.mrb[56].mxu0 }
0x2888   :  { %v2924_v24 = vadd.f32 %v2915_v57, %v5052_v59  ;;  %v2917_v62 = vpop.f32.mrb[57].mxu0 }
0x2889   :  { %v2926_v52 = vadd.f32 %v2917_v62, %v4993_v18  ;;  %v2919_v43 = vpop.f32.mrb[58].mxu0 }
0x288a   :  { %4040 = vtanh.f32 %v2924_v24  ;;  %v2925_v7 = vadd.f32 %v2919_v43, %v5058_v23  ;;  %v2921_v29 = vpop.f32.mrb[59].mxu0  ;;  %v3386_v59 = vmul.f32 -1.442695, %v2924_v24 }
0x288b   :  { %v2927_v19 = vadd.f32 %v2921_v29, %v4999_v13  ;;  %4042 = vtanh.f32 %v2926_v52  ;;  %v3388_v23 = vmul.f32 -1.442695, %v2926_v52 }
0x288c   :  { %4044 = vtanh.f32 %v2925_v7  ;;  %v3387_v38 = vmul.f32 -1.442695, %v2925_v7 }
0x288d   :  { %4046 = vtanh.f32 %v2927_v19  ;;  %v3389_v13 = vmul.f32 -1.442695, %v2927_v19 }
0x288e   :  { %4048 = vpow2.f32 %v3386_v59 }
0x288f   :  { %4050 = vpow2.f32 %v3388_v23 }
0x2890   :  { %4052 = vpow2.f32 %v3387_v38 }
0x2891   :  { %4054 = vpow2.f32 %v3389_v13 }
0x2894   :  { %v4041_v46 = vpop.eup %4040 }
0x2895   :  { %2946 = vrot.lane.b32.xlu0 %v4041_v46, %s4106_s0  ;;  %v4043_v55 = vpop.eup %4042 }
0x2896   :  { %v4045_v51 = vpop.eup %4044 }
0x2897   :  { %2948 = vrot.lane.b32.xlu1 %v4045_v51, %s4106_s0  ;;  %v4047_v18 = vpop.eup %4046 }
0x2898   :  { %v4049_v48 = vpop.eup %4048 }
0x2899   :  { %2994 = vrot.lane.b32.xlu0 %v4043_v55, %s4106_s0  ;;  %v2934_v26 = vadd.f32 1.0, %v4049_v48  ;;  %v4051_v15 = vpop.eup %4050 }
0x289a   :  { %v4053_v54 = vpop.eup %4052  ;;  %v2982_v20 = vadd.f32 1.0, %v4051_v15 }
0x289b   :  { %2996 = vrot.lane.b32.xlu1 %v4047_v18, %s4106_s0  ;;  %4056 = vrcp.f32 %v2934_v26  ;;  %v2935_v5 = vadd.f32 1.0, %v4053_v54  ;;  %v4055_v41 = vpop.eup %4054 }
0x289c   :  { %4058 = vrcp.f32 %v2982_v20  ;;  %v2983_v4 = vadd.f32 1.0, %v4055_v41 }
0x289d   :  { %4060 = vrcp.f32 %v2935_v5 }
0x289e   :  { %4062 = vrcp.f32 %v2983_v4 }
0x28a5   :  { %v4057_v21 = vpop.eup %4056 }
0x28a6   :  { %v4059_v12 = vpop.eup %4058  ;;  %v2942_v10 = vmul.f32 %v4057_v21, %v5464_v22 }
0x28a7   :  { %v4061_v37 = vpop.eup %4060  ;;  %v2990_v3 = vmul.f32 %v4059_v12, %v5469_v39 }
0x28a8   :  { %v4063_v34 = vpop.eup %4062  ;;  %v2943_v6 = vmul.f32 %v4061_v37, %v5471_v47 }
0x28a9   :  { %v2991_v22 = vmul.f32 %v4063_v34, %v5476_v33 }
0x2907   :  { %v2947_v27 = vpop.permute.xlu0 %2946 }
0x2908   :  { %v2952_v60 = vmul.f32 %v4057_v21, %v2947_v27 }
0x2909   :  { %v2949_v50 = vpop.permute.xlu1 %2948 }
0x290a   :  { %2956 = vrot.lane.b32.xlu0 %v2952_v60, %s4106_s0  ;;  %v2953_v9 = vmul.f32 %v4061_v37, %v2949_v50 }
0x290b   :  { %v2995_v56 = vpop.permute.xlu0 %2994 }
0x290c   :  { %v3000_v61 = vmul.f32 %v4059_v12, %v2995_v56  ;;  %2958 = vrot.lane.b32.xlu1 %v2953_v9, %s4106_s0 }
0x290d   :  { %v2997_v53 = vpop.permute.xlu1 %2996 }
0x290e   :  { %3004 = vrot.lane.b32.xlu0 %v3000_v61, %s4106_s0  ;;  %v3001_v40 = vmul.f32 %v4063_v34, %v2997_v53 }
0x2910   :  { %3006 = vrot.lane.b32.xlu1 %v3001_v40, %s4106_s0 }
0x297c   :  { %v2957_v45 = vpop.permute.xlu0 %2956 }
0x297d   :  { %v5521_v11 = vadd.f32 %v2957_v45, %v2942_v10 }
0x297e   :  { %v2959_v17 = vpop.permute.xlu1 %2958 }
0x297f   :  { %4064 = vtanh.f32 %v5521_v11  ;;  %v5528_v57 = vadd.f32 %v2959_v17, %v2943_v6 }
0x2980   :  { %v3005_v0 = vpop.permute.xlu0 %3004 }
0x2981   :  { %v5526_v25 = vadd.f32 %v3005_v0, %v2990_v3 }
0x2982   :  { %v3007_v24 = vpop.permute.xlu1 %3006 }
0x2983   :  { %4066 = vtanh.f32 %v5526_v25  ;;  %v5533_v62 = vadd.f32 %v3007_v24, %v2991_v22 }
0x2984   :  { %4068 = vtanh.f32 %v5528_v57 }
0x2985   :  { %4070 = vtanh.f32 %v5533_v62 }
0x2989   :  { %v4065_v39 = vpop.eup %4064 }
0x298a   :  { %2968 = vrot.lane.b32.xlu0 %v4065_v39, %s4106_s0 }
0x298d   :  { %v4067_v47 = vpop.eup %4066 }
0x298e   :  { %v4069_v52 = vpop.eup %4068  ;;  %3016 = vrot.lane.b32.xlu0 %v4067_v47, %s4106_s0 }
0x298f   :  { %2970 = vrot.lane.b32.xlu1 %v4069_v52, %s4106_s0  ;;  %v4071_v43 = vpop.eup %4070 }
0x2993   :  { %3018 = vrot.lane.b32.xlu1 %v4071_v43, %s4106_s0 }
0x29fc   :  { %v2969_v7 = vpop.permute.xlu0 %2968 }
0x29fd   :  { %v2974_v29 = vmul.f32 %v4057_v21, %v2969_v7 }
0x29ff   :  { %v5543_v33 = vmax.f32 %v2874_v58, %v2974_v29 }
0x2a00   :  { %v3017_v19 = vpop.permute.xlu0 %3016 }
0x2a01   :  { %v2971_v46 = vpop.permute.xlu1 %2970  ;;  %v3022_v55 = vmul.f32 %v4059_v12, %v3017_v19 }
0x2a02   :  { %v2975_v51 = vmul.f32 %v4061_v37, %v2971_v46 }
0x2a03   :  { %v5548_v18 = vmax.f32 %v2876_v2, %v3022_v55 }
0x2a04   :  { %v3532_v59 = vpack.i.bf16 %v2975_v51, %v2974_v29  ;;  %v5553_v23 = vmax.f32 %v2875_v44, %v2975_v51 }
0x2a05   :  { %v3019_v38 = vpop.permute.xlu1 %3018 }
0x2a06   :  { %v3023_v13 = vmul.f32 %v4063_v34, %v3019_v38  ;;  %3533 = vrot.lane.b32.xlu0 %v3532_v59, %s4107_s28 }
0x2a08   :  { %v3537_v28 = vpack.i.bf16 %v3023_v13, %v3022_v55  ;;  %v5559_v16 = vmax.f32 %v2877_v49, %v3023_v13 }
0x2a0a   :  { %3538 = vrot.lane.b32.xlu1 %v3537_v28, %s4108_s2 }
0x2a78   :  { %v3534_v36 = vpop.permute.xlu0 %3533 }
0x2a79   :  { %v3536_v1 = vunpack.i.h.bf16 %v3534_v36  ;;  %v3535_v2 = vunpack.i.l.bf16 %v3534_v36 }
0x2a7c   :  { %v3539_v58 = vpop.permute.xlu1 %3538 }
0x2a7d   :  { %v3541_v48 = vunpack.i.h.bf16 %v3539_v58  ;;  %v3540_v63 = vunpack.i.l.bf16 %v3539_v58 }
0x2a7f   :  { %v3041_v32 = vsel %vm130_vm0, %v3536_v1, %v3541_v48  ;;  %v3040_v44 = vsel %vm130_vm0, %v3535_v2, %v3540_v63 }
0x2a80   :  { %v3042_v26 = vpack.c.bf16 %v3041_v32, %v3040_v44 }
0x2a82   :  { %3390 = vmatmul.mubr.msk.bf16.vlgmr.msra.gmra.mrb[56].mxu1 %vm444_vm1, %v3042_v26 }
0x2b55   :  { %v3084_v15 = vpop.f32.mrb[56].mxu1 }
0x2b56   :  { %v3093_v14 = vadd.f32 %v3084_v15, %v5064_v8  ;;  %v3086_v42 = vpop.f32.mrb[57].mxu1 }
0x2b57   :  { %v3095_v49 = vadd.f32 %v3086_v42, %v4979_v31  ;;  %v3088_v54 = vpop.f32.mrb[58].mxu1 }
0x2b58   :  { %4072 = vtanh.f32 %v3093_v14  ;;  %v3094_v20 = vadd.f32 %v3088_v54, %v5068_v35  ;;  %v3090_v5 = vpop.f32.mrb[59].mxu1  ;;  %v3391_v8 = vmul.f32 -1.442695, %v3093_v14 }
0x2b59   :  { %v3096_v41 = vadd.f32 %v3090_v5, %v4986_v30  ;;  %4074 = vtanh.f32 %v3095_v49  ;;  %v3393_v35 = vmul.f32 -1.442695, %v3095_v49 }
0x2b5a   :  { %4076 = vtanh.f32 %v3094_v20  ;;  %v3392_v60 = vmul.f32 -1.442695, %v3094_v20 }
0x2b5b   :  { %4078 = vtanh.f32 %v3096_v41  ;;  %v3394_v30 = vmul.f32 -1.442695, %v3096_v41 }
0x2b5c   :  { %4080 = vpow2.f32 %v3391_v8 }
0x2b5d   :  { %4082 = vpow2.f32 %v3393_v35 }
0x2b5e   :  { %4084 = vpow2.f32 %v3392_v60 }
0x2b5f   :  { %4086 = vpow2.f32 %v3394_v30 }
0x2b62   :  { %v4073_v4 = vpop.eup %4072 }
0x2b63   :  { %3115 = vrot.lane.b32.xlu0 %v4073_v4, %s4106_s0  ;;  %v4075_v21 = vpop.eup %4074 }
0x2b64   :  { %v4077_v27 = vpop.eup %4076 }
0x2b65   :  { %3117 = vrot.lane.b32.xlu1 %v4077_v27, %s4106_s0  ;;  %v4079_v31 = vpop.eup %4078 }
0x2b66   :  { %v4081_v12 = vpop.eup %4080 }
0x2b67   :  { %3163 = vrot.lane.b32.xlu0 %v4075_v21, %s4106_s0  ;;  %v3103_v56 = vadd.f32 1.0, %v4081_v12  ;;  %v4083_v37 = vpop.eup %4082  ;;  %v15_v12 = vstv %s5623_s9 }
0x2b68   :  { %v4085_v50 = vpop.eup %4084  ;;  %v3151_v61 = vadd.f32 1.0, %v4083_v37  ;;  %16 = vst [vmem:[#allocation3] sm:$0x1] %v15_v12 }
0x2b69   :  { %3165 = vrot.lane.b32.xlu1 %v4079_v31, %s4106_s0  ;;  %4088 = vrcp.f32 %v3103_v56  ;;  %v3104_v9 = vadd.f32 1.0, %v4085_v50  ;;  %v4087_v34 = vpop.eup %4086 }
0x2b6a   :  { %4090 = vrcp.f32 %v3151_v61  ;;  %v3152_v53 = vadd.f32 1.0, %v4087_v34 }
0x2b6b   :  { %4092 = vrcp.f32 %v3104_v9 }
0x2b6c   :  { %4094 = vrcp.f32 %v3152_v53 }
0x2b6f   :  { %v3397_v37 = vld [vmem:[#allocation3] ss:$0 sm:$0xff] }
0x2b73   :  { %v4089_v40 = vpop.eup %4088 }
0x2b74   :  { %v4091_v3 = vpop.eup %4090  ;;  %v3111_v43 = vmul.f32 %v4089_v40, %v5521_v11 }
0x2b75   :  { %v4093_v0 = vpop.eup %4092  ;;  %v3159_v19 = vmul.f32 %v4091_v3, %v5526_v25  ;;  %v3395_v25 = vld [vmem:[%s5621_s7] ss:$0 sm:$0xff] }
0x2b76   :  { %v4095_v39 = vpop.eup %4094  ;;  %v3112_v46 = vmul.f32 %v4093_v0, %v5528_v57 }
0x2b77   :  { %v3160_v13 = vmul.f32 %v4095_v39, %v5533_v62  ;;  %v3396_v62 = vld [vmem:[%s5622_s8] ss:$0 sm:$0xff] }
0x2bd5   :  { %v3116_v10 = vpop.permute.xlu0 %3115 }
0x2bd6   :  { %v3121_v45 = vmul.f32 %v4089_v40, %v3116_v10 }
0x2bd7   :  { %v3118_v17 = vpop.permute.xlu1 %3117 }
0x2bd8   :  { %3125 = vrot.lane.b32.xlu0 %v3121_v45, %s4106_s0  ;;  %v3122_v24 = vmul.f32 %v4093_v0, %v3118_v17 }
0x2bd9   :  { %v3164_v6 = vpop.permute.xlu0 %3163 }
0x2bda   :  { %v3169_v22 = vmul.f32 %v4091_v3, %v3164_v6  ;;  %3127 = vrot.lane.b32.xlu1 %v3122_v24, %s4106_s0 }
0x2bdb   :  { %v3166_v47 = vpop.permute.xlu1 %3165 }
0x2bdc   :  { %3173 = vrot.lane.b32.xlu0 %v3169_v22, %s4106_s0  ;;  %v3170_v52 = vmul.f32 %v4095_v39, %v3166_v47 }
0x2bde   :  { %3175 = vrot.lane.b32.xlu1 %v3170_v52, %s4106_s0 }
0x2c4a   :  { %v3126_v7 = vpop.permute.xlu0 %3125 }
0x2c4b   :  { %v3131_v29 = vadd.f32 %v3126_v7, %v3111_v43 }
0x2c4c   :  { %v3128_v51 = vpop.permute.xlu1 %3127 }
0x2c4d   :  { %4096 = vtanh.f32 %v3131_v29  ;;  %v3132_v38 = vadd.f32 %v3128_v51, %v3112_v46 }
0x2c4e   :  { %v3174_v55 = vpop.permute.xlu0 %3173 }
0x2c4f   :  { %v3179_v59 = vadd.f32 %v3174_v55, %v3159_v19 }
0x2c50   :  { %v3176_v28 = vpop.permute.xlu1 %3175 }
0x2c51   :  { %4098 = vtanh.f32 %v3179_v59  ;;  %v3180_v36 = vadd.f32 %v3176_v28, %v3160_v13 }
0x2c52   :  { %4100 = vtanh.f32 %v3132_v38 }
0x2c53   :  { %4102 = vtanh.f32 %v3180_v36 }
0x2c57   :  { %v4097_v58 = vpop.eup %4096 }
0x2c58   :  { %3137 = vrot.lane.b32.xlu0 %v4097_v58, %s4106_s0 }
0x2c5b   :  { %v4099_v11 = vpop.eup %4098 }
0x2c5c   :  { %v4101_v1 = vpop.eup %4100  ;;  %3185 = vrot.lane.b32.xlu0 %v4099_v11, %s4106_s0 }
0x2c5d   :  { %3139 = vrot.lane.b32.xlu1 %v4101_v1, %s4106_s0  ;;  %v4103_v57 = vpop.eup %4102 }
0x2c60   :  { %3203 = vrot.lane.b32.xlu0 %v3395_v25, %s4107_s28 }
0x2c61   :  { %3187 = vrot.lane.b32.xlu1 %v4103_v57, %s4106_s0 }
0x2c65   :  { %3228 = vrot.lane.b32.xlu1 %v3396_v62, %s4107_s28 }
0x2cca   :  { %v3138_v2 = vpop.permute.xlu0 %3137 }
0x2ccb   :  { %v3143_v48 = vmul.f32 %v4089_v40, %v3138_v2 }
0x2ccd   :  { %v3193_v26 = vmax.f32 %v5543_v33, %v3143_v48 }
0x2cce   :  { %v3186_v63 = vpop.permute.xlu0 %3185 }
0x2ccf   :  { %v3140_v32 = vpop.permute.xlu1 %3139  ;;  %v3191_v14 = vmul.f32 %v4091_v3, %v3186_v63 }
0x2cd0   :  { %v3144_v44 = vmul.f32 %v4093_v0, %v3140_v32 }
0x2cd1   :  { %v3195_v41 = vmax.f32 %v5548_v18, %v3191_v14 }
0x2cd2   :  { %v3194_v15 = vmax.f32 %v5553_v23, %v3144_v44  ;;  %v3204_v42 = vpop.permute.xlu0 %3203 }
0x2cd3   :  { %v3188_v49 = vpop.permute.xlu1 %3187  ;;  %v3206_v54 = vmul.f32 %v3204_v42, %v3193_v26 }
0x2cd4   :  { %v3192_v20 = vmul.f32 %v4095_v39, %v3188_v49  ;;  %v3207_v5 = vmul.f32 %v3204_v42, %v3194_v15 }
0x2cd5   :  { %3210 = vrot.lane.b32.xlu0 %v3206_v54, %s4107_s28 }
0x2cd6   :  { %v3196_v4 = vmax.f32 %v5559_v16, %v3192_v20  ;;  %3212 = vrot.lane.b32.xlu1 %v3207_v5, %s4107_s28 }
0x2cd7   :  { %v3229_v21 = vpop.permute.xlu1 %3228 }
0x2cd8   :  { %v3231_v27 = vmul.f32 %v3229_v21, %v3195_v41  ;;  %v3232_v31 = vmul.f32 %v3229_v21, %v3196_v4 }
0x2cda   :  { %3235 = vrot.lane.b32.xlu0 %v3231_v27, %s4107_s28  ;;  %3237 = vrot.lane.b32.xlu1 %v3232_v31, %s4107_s28 }
0x2d47   :  { %v3211_v33 = vpop.permute.xlu0 %3210 }
0x2d48   :  { %v3216_v23 = vsel %vm130_vm0, %v3211_v33, 0.0  ;;  %v3213_v8 = vpop.permute.xlu1 %3212 }
0x2d49   :  { %v3219_v35 = vsel %vm130_vm0, %v3213_v8, 0.0  ;;  %3217 = vadd.xlane.f32.xlu0 %v3216_v23 }
0x2d4a   :  { %3220 = vadd.xlane.f32.xlu1 %v3219_v35 }
0x2d4c   :  { %v3236_v18 = vpop.permute.xlu0 %3235  ;;  %v3238_v60 = vpop.permute.xlu1 %3237 }
0x2d4d   :  { %v3241_v16 = vsel %vm130_vm0, %v3236_v18, 0.0  ;;  %v3244_v30 = vsel %vm130_vm0, %v3238_v60, 0.0 }
0x2d4e   :  { %3242 = vadd.xlane.f32.xlu0 %v3241_v16 }
0x2d52   :  { %3245 = vadd.xlane.f32.xlu0 %v3244_v30 }
0x2dd6   :  { %v3218_v56 = vpop.xlane.xlu0 %3217 }
0x2dd7   :  { %v3221_v34 = vpop.xlane.xlu1 %3220 }
0x2ddb   :  { %v3243_v50 = vpop.xlane.xlu0 %3242 }
0x2ddc   :  { %v3247_v61 = vadd.f32 %v3243_v50, %v3218_v56 }
0x2dde   :  { %v3256_v9 = vadd.f32 %v3397_v37, %v3247_v61 }
0x2ddf   :  { %v3246_v53 = vpop.xlane.xlu0 %3245 }
0x2de0   :  { %3259 = vst.msk [vmem:[%s5624_s10] sm:$0xff] %vm3258_vm3, %v3256_v9  ;;  %v3248_v40 = vadd.f32 %v3246_v53, %v3221_v34 }
0x2de2   :  { %v3257_v10 = vadd.f32 %v3397_v37, %v3248_v40 }
0x2de4   :  { %3260 = vst.msk [vmem:[%s5624_s10 + $0x8] sm:$0xff] %vm3258_vm3, %v3257_v10 }

</bundles_post_ra>
